<compile_context>
chip_gen: v7x
topology: tpu7x:2x2x1
jax: 0.10.0
libtpu: 0.0.40
codegen_flags: <defaults>
</compile_context>

<pallas_src>
import functools
import math

import jax
import jax.numpy as jnp
from jax.experimental import pallas as pl
from jax.experimental.pallas import tpu as pltpu

NUM_CLASSES = 10          # BaseModel(num_classes)
LANE = 128                # lane-padded channel width for dense stores


# ----------------------------------------------------------------------------- kernels
def _conv_relu_kernel(a_ref, w_ref, b_ref, o_ref):
    # o = relu(A @ W + b); A/W bf16 on the MXU, epilogue in f32.
    y = jnp.dot(a_ref[...], w_ref[...], preferred_element_type=jnp.float32)
    y = jnp.maximum(y + b_ref[...], 0.0)
    o_ref[...] = y.astype(o_ref.dtype)


def _conv_relu_pool_kernel(a_ref, w_ref, b_ref, o_ref, *, q):
    # A rows are ordered (dy, dx, hp, wp): the 2x2 max-pool is an elementwise
    # max of 4 contiguous, sublane-aligned slabs of the matmul output.
    # bias + ReLU commute with max, so they run on the pooled (q, C) tile only.
    y = jnp.dot(a_ref[...], w_ref[...], preferred_element_type=jnp.float32)
    m = jnp.maximum(jnp.maximum(y[0:q], y[q:2 * q]),
                    jnp.maximum(y[2 * q:3 * q], y[3 * q:4 * q]))
    m = jnp.maximum(m + b_ref[...], 0.0)
    o_ref[...] = m.astype(o_ref.dtype)


def _conv_relu_pool_gap_fc_kernel(a_ref, w_ref, b_ref, wf_ref, bf_ref, o_ref, *, q):
    # conv3 matmul -> 2x2 max-pool -> bias + ReLU -> AdaptiveAvgPool(1,1) -> fc.
    y = jnp.dot(a_ref[...], w_ref[...], preferred_element_type=jnp.float32)
    m = jnp.maximum(jnp.maximum(y[0:q], y[q:2 * q]),
                    jnp.maximum(y[2 * q:3 * q], y[3 * q:4 * q]))
    m = jnp.maximum(m + b_ref[...], 0.0)                        # (q, C) f32
    pooled = jnp.sum(m, axis=0, keepdims=True) * (1.0 / q)      # (1, C) f32
    logits = jnp.dot(pooled, wf_ref[...],
                     preferred_element_type=jnp.float32) + bf_ref[...]
    o_ref[...] = logits.astype(o_ref.dtype)


# ----------------------------------------------------------------------------- wrappers
def conv_relu(a, w, b):
    """a:(N,P,K) bf16 @ w:(K,C) bf16, bias (1,C) f32, fused ReLU. Grid over batch."""
    N, P, K = a.shape
    C = w.shape[1]
    return pl.pallas_call(
        _conv_relu_kernel,
        out_shape=jax.ShapeDtypeStruct((N, P, C), jnp.bfloat16),
        grid=(N,),
        in_specs=[
            pl.BlockSpec((None, P, K), lambda n: (n, 0, 0)),
            pl.BlockSpec((K, C), lambda n: (0, 0)),
            pl.BlockSpec((1, C), lambda n: (0, 0)),
        ],
        out_specs=pl.BlockSpec((None, P, C), lambda n: (n, 0, 0)),
        compiler_params=pltpu.CompilerParams(dimension_semantics=("parallel",)),
    )(a, w, b)


def conv_relu_pool(a, w, b):
    """Fused conv-matmul + 2x2 max-pool + bias + ReLU. A rows ordered (dy,dx,hp,wp)."""
    N, P, K = a.shape
    C = w.shape[1]
    q = P // 4
    return pl.pallas_call(
        functools.partial(_conv_relu_pool_kernel, q=q),
        out_shape=jax.ShapeDtypeStruct((N, q, C), jnp.bfloat16),
        grid=(N,),
        in_specs=[
            pl.BlockSpec((None, P, K), lambda n: (n, 0, 0)),
            pl.BlockSpec((K, C), lambda n: (0, 0)),
            pl.BlockSpec((1, C), lambda n: (0, 0)),
        ],
        out_specs=pl.BlockSpec((None, q, C), lambda n: (n, 0, 0)),
        compiler_params=pltpu.CompilerParams(dimension_semantics=("parallel",)),
    )(a, w, b)


def conv_relu_pool_gap_fc(a, w, b, wf, bf):
    """Fused conv3 + ReLU + 2x2 max-pool + global-avg-pool + fc (whole tail)."""
    N, P, K = a.shape
    C = w.shape[1]
    Cf = wf.shape[1]
    q = P // 4
    return pl.pallas_call(
        functools.partial(_conv_relu_pool_gap_fc_kernel, q=q),
        out_shape=jax.ShapeDtypeStruct((N, 1, Cf), jnp.float32),
        grid=(N,),
        in_specs=[
            pl.BlockSpec((None, P, K), lambda n: (n, 0, 0)),
            pl.BlockSpec((K, C), lambda n: (0, 0)),
            pl.BlockSpec((1, C), lambda n: (0, 0)),
            pl.BlockSpec((C, Cf), lambda n: (0, 0)),
            pl.BlockSpec((1, Cf), lambda n: (0, 0)),
        ],
        out_specs=pl.BlockSpec((None, 1, Cf), lambda n: (n, 0, 0)),
        compiler_params=pltpu.CompilerParams(dimension_semantics=("parallel",)),
    )(a, w, b, wf, bf)


# ----------------------------------------------------------------------------- XLA glue
def _im2col(x, k):
    """NHWC valid-conv patches -> (N, Ho*Wo, k*k*C), rows in natural (h, w) order."""
    N, H, W, C = x.shape
    Ho, Wo = H - k + 1, W - k + 1
    cols = [x[:, i:i + Ho, j:j + Wo, :] for i in range(k) for j in range(k)]
    p = jnp.concatenate(cols, axis=-1)                     # (N, Ho, Wo, k*k*C)
    return p.reshape(N, Ho * Wo, k * k * C), (Ho, Wo)


def _im2col_pool_order(x, k):
    """Same patches, rows ordered (dy, dx, hp, wp) with (h, w) = (2hp+dy, 2wp+dx),
    so the in-kernel 2x2 max-pool becomes a max of 4 contiguous row slabs."""
    N, H, W, C = x.shape
    Ho, Wo = H - k + 1, W - k + 1
    Hp, Wp = Ho // 2, Wo // 2
    cols = [x[:, i:i + Ho, j:j + Wo, :] for i in range(k) for j in range(k)]
    p = jnp.concatenate(cols, axis=-1)                     # (N, Ho, Wo, k*k*C)
    p = p.reshape(N, Hp, 2, Wp, 2, k * k * C)
    p = jnp.transpose(p, (0, 2, 4, 1, 3, 5))               # (N, dy, dx, Hp, Wp, K)
    return p.reshape(N, 4 * Hp * Wp, k * k * C), (Hp, Wp)


def base_model_forward(params, x_nchw):
    x = jnp.transpose(x_nchw, (0, 2, 3, 1)).astype(jnp.bfloat16)   # NHWC bf16
    N = x.shape[0]

    # conv1: 7x7 (3 -> 32, output stored 128-lane padded), stride 1, valid; + ReLU
    a1, (H1, W1) = _im2col(x, 7)                                   # (N, 676, 147)
    y1 = conv_relu(a1, params["w1"], params["b1"])                 # (N, 676, 128) bf16
    y1 = y1.reshape(N, H1, W1, LANE)[..., :32]                     # de-pad K for conv2

    # conv2: 3x3 (32 -> 64) + ReLU + max_pool2d(2); dropout1 = identity at eval
    a2, (Hp2, Wp2) = _im2col_pool_order(y1, 3)                     # (N, 576, 288)
    y2 = conv_relu_pool(a2, params["w2"], params["b2"])            # (N, 144, 128) bf16
    y2 = y2.reshape(N, Hp2, Wp2, LANE)[..., :64]                   # de-pad K for conv3

    # conv3: 3x3 (64 -> 128) + ReLU + max_pool2d(2) + avgpool(1,1) + flatten + fc
    # dropout2 = identity at eval
    a3, _ = _im2col_pool_order(y2, 3)                              # (N, 100, 576)
    logits = conv_relu_pool_gap_fc(a3, params["w3"], params["b3"],
                                   params["wf"], params["bf"])     # (N, 1, 128) f32
    return logits.reshape(N, LANE)[:, :NUM_CLASSES]                # slice once at end


# ----------------------------------------------------------------------------- params
def init_params(key):
    ks = jax.random.split(key, 8)

    def conv_w(k, ksize, cin, cout):
        # rows ordered (tap = ki*ksize+kj, cin) to match the im2col concat order;
        # columns padded to LANE with exact zeros (padded outputs are sliced away).
        fan_in = ksize * ksize * cin
        w = jax.random.normal(k, (fan_in, cout), jnp.float32) / math.sqrt(float(fan_in))
        wp = jnp.zeros((fan_in, LANE), jnp.float32).at[:, :cout].set(w)
        return wp.astype(jnp.bfloat16)

    def bias(k, cout):
        b = jax.random.uniform(k, (cout,), jnp.float32, -0.05, 0.05)
        return jnp.zeros((1, LANE), jnp.float32).at[0, :cout].set(b)

    p = {}
    p["w1"] = conv_w(ks[0], 7, 3, 32);   p["b1"] = bias(ks[1], 32)
    p["w2"] = conv_w(ks[2], 3, 32, 64);  p["b2"] = bias(ks[3], 64)
    p["w3"] = conv_w(ks[4], 3, 64, 128); p["b3"] = bias(ks[5], 128)

    wf = jax.random.normal(ks[6], (128, NUM_CLASSES), jnp.float32) / math.sqrt(128.0)
    p["wf"] = jnp.zeros((LANE, LANE), jnp.float32).at[:, :NUM_CLASSES].set(wf)  # f32 fc
    p["bf"] = bias(ks[7], NUM_CLASSES)
    return p


# ----------------------------------------------------------------------------- main
if __name__ == "__main__":
    root = jax.random.PRNGKey(0)
    kx, kp = jax.random.split(root)
    params = init_params(kp)
    # Small input consistent with the module: NCHW, 3 channels, 32x32
    x = jax.random.normal(kx, (2, 3, 32, 32), jnp.float32)

    fwd = jax.jit(base_model_forward)
    out = jax.block_until_ready(fwd(params, x))

    assert out.shape == (2, NUM_CLASSES), out.shape
    assert out.dtype == jnp.float32
    assert bool(jnp.all(jnp.isfinite(out)))
    print("KERNEL_OK")
</pallas_src>

<mosaic_0001>
module attributes {stable_mosaic.version = 11 : i64} {
  func.func @_conv_relu_kernel(%arg0: i32, %arg1: memref<1x676x147xbf16, #tpu.memory_space<vmem>>, %arg2: memref<147x128xbf16, #tpu.memory_space<vmem>>, %arg3: memref<1x128xf32, #tpu.memory_space<vmem>>, %arg4: memref<1x676x128xbf16, #tpu.memory_space<vmem>>) attributes {dimension_semantics = [#tpu.dimension_semantics<parallel>], iteration_bounds = array<i64: 2>, scalar_prefetch = 0 : i64, scratch_operands = 0 : i64, tpu.core_type = #tpu.core_type<tc>, window_params = [{transform_indices = @transform_0, window_bounds = array<i64: 1, 676, 147>}, {pipeline_mode = #tpu.pipeline_mode<synchronous>, transform_indices = @transform_1, window_bounds = array<i64: 147, 128>}, {pipeline_mode = #tpu.pipeline_mode<synchronous>, transform_indices = @transform_2, window_bounds = array<i64: 1, 128>}, {transform_indices = @transform_3, window_bounds = array<i64: 1, 676, 128>}]} {
    %c0 = arith.constant 0 : index
    %c0_0 = arith.constant 0 : index
    %c0_1 = arith.constant 0 : index
    %0 = vector.load %arg1[%c0, %c0_0, %c0_1] : memref<1x676x147xbf16, #tpu.memory_space<vmem>>, vector<1x676x147xbf16>
    %1 = vector.shape_cast %0 : vector<1x676x147xbf16> to vector<676x147xbf16>
    %c0_2 = arith.constant 0 : index
    %c0_3 = arith.constant 0 : index
    %2 = vector.load %arg2[%c0_2, %c0_3] : memref<147x128xbf16, #tpu.memory_space<vmem>>, vector<147x128xbf16>
    %cst = arith.constant dense<0.000000e+00> : vector<676x128xf32>
    %3 = tpu.matmul %1, %2, %cst {dimension_numbers = #tpu.dot_dimension_numbers<[1], [0], [0], [1], [0, 0, 1, 1], [], []>} : vector<676x147xbf16>, vector<147x128xbf16>, vector<676x128xf32> -> vector<676x128xf32>
    %c0_4 = arith.constant 0 : index
    %c0_5 = arith.constant 0 : index
    %4 = vector.load %arg3[%c0_4, %c0_5] : memref<1x128xf32, #tpu.memory_space<vmem>>, vector<1x128xf32>
    %5 = vector.broadcast %4 : vector<1x128xf32> to vector<676x128xf32>
    %6 = arith.addf %3, %5 : vector<676x128xf32>
    %cst_6 = arith.constant 0.000000e+00 : f32
    %7 = vector.broadcast %cst_6 : f32 to vector<676x128xf32>
    %8 = arith.maximumf %6, %7 : vector<676x128xf32>
    %9 = arith.truncf %8 : vector<676x128xf32> to vector<676x128xbf16>
    %c0_7 = arith.constant 0 : index
    %c0_8 = arith.constant 0 : index
    %c0_9 = arith.constant 0 : index
    %10 = vector.load %arg4[%c0_7, %c0_8, %c0_9] : memref<1x676x128xbf16, #tpu.memory_space<vmem>>, vector<1x676x128xbf16>
    %11 = vector.shape_cast %10 : vector<1x676x128xbf16> to vector<676x128xbf16>
    %12 = vector.shape_cast %9 : vector<676x128xbf16> to vector<1x676x128xbf16>
    tpu.vector_store %arg4[%c0_7, %c0_8, %c0_9], %12 {strides = array<i32>} : memref<1x676x128xbf16, #tpu.memory_space<vmem>>, vector<1x676x128xbf16>,
    return
  }
  func.func @transform_0(%arg0: i32) -> (i32, i32, i32) {
    %c0_i32 = arith.constant 0 : i32
    %c0_i32_0 = arith.constant 0 : i32
    %c0_i32_1 = arith.constant 0 : i32
    return %arg0, %c0_i32, %c0_i32_0 : i32, i32, i32
  }
  func.func @transform_1(%arg0: i32) -> (i32, i32) {
    %c0_i32 = arith.constant 0 : i32
    %c0_i32_0 = arith.constant 0 : i32
    %c0_i32_1 = arith.constant 0 : i32
    return %c0_i32, %c0_i32_0 : i32, i32
  }
  func.func @transform_2(%arg0: i32) -> (i32, i32) {
    %c0_i32 = arith.constant 0 : i32
    %c0_i32_0 = arith.constant 0 : i32
    %c0_i32_1 = arith.constant 0 : i32
    return %c0_i32, %c0_i32_0 : i32, i32
  }
  func.func @transform_3(%arg0: i32) -> (i32, i32, i32) {
    %c0_i32 = arith.constant 0 : i32
    %c0_i32_0 = arith.constant 0 : i32
    %c0_i32_1 = arith.constant 0 : i32
    return %arg0, %c0_i32, %c0_i32_0 : i32, i32, i32
  }
}

module attributes {stable_mosaic.version = 11 : i64} {
  func.func @_conv_relu_pool_kernel(%arg0: i32, %arg1: memref<1x576x288xbf16, #tpu.memory_space<vmem>>, %arg2: memref<288x128xbf16, #tpu.memory_space<vmem>>, %arg3: memref<1x128xf32, #tpu.memory_space<vmem>>, %arg4: memref<1x144x128xbf16, #tpu.memory_space<vmem>>) attributes {dimension_semantics = [#tpu.dimension_semantics<parallel>], iteration_bounds = array<i64: 2>, scalar_prefetch = 0 : i64, scratch_operands = 0 : i64, tpu.core_type = #tpu.core_type<tc>, window_params = [{transform_indices = @transform_0, window_bounds = array<i64: 1, 576, 288>}, {pipeline_mode = #tpu.pipeline_mode<synchronous>, transform_indices = @transform_1, window_bounds = array<i64: 288, 128>}, {pipeline_mode = #tpu.pipeline_mode<synchronous>, transform_indices = @transform_2, window_bounds = array<i64: 1, 128>}, {transform_indices = @transform_3, window_bounds = array<i64: 1, 144, 128>}]} {
    %c0 = arith.constant 0 : index
    %c0_0 = arith.constant 0 : index
    %c0_1 = arith.constant 0 : index
    %0 = vector.load %arg1[%c0, %c0_0, %c0_1] : memref<1x576x288xbf16, #tpu.memory_space<vmem>>, vector<1x576x288xbf16>
    %1 = vector.shape_cast %0 : vector<1x576x288xbf16> to vector<576x288xbf16>
    %c0_2 = arith.constant 0 : index
    %c0_3 = arith.constant 0 : index
    %2 = vector.load %arg2[%c0_2, %c0_3] : memref<288x128xbf16, #tpu.memory_space<vmem>>, vector<288x128xbf16>
    %cst = arith.constant dense<0.000000e+00> : vector<576x128xf32>
    %3 = tpu.matmul %1, %2, %cst {dimension_numbers = #tpu.dot_dimension_numbers<[1], [0], [0], [1], [0, 0, 1, 1], [], []>} : vector<576x288xbf16>, vector<288x128xbf16>, vector<576x128xf32> -> vector<576x128xf32>
    %4 = vector.extract_strided_slice %3 {offsets = [0, 0], sizes = [144, 128], strides = [1, 1]} : vector<576x128xf32> to vector<144x128xf32>
    %5 = vector.extract_strided_slice %3 {offsets = [144, 0], sizes = [144, 128], strides = [1, 1]} : vector<576x128xf32> to vector<144x128xf32>
    %6 = arith.maximumf %4, %5 : vector<144x128xf32>
    %7 = vector.extract_strided_slice %3 {offsets = [288, 0], sizes = [144, 128], strides = [1, 1]} : vector<576x128xf32> to vector<144x128xf32>
    %8 = vector.extract_strided_slice %3 {offsets = [432, 0], sizes = [144, 128], strides = [1, 1]} : vector<576x128xf32> to vector<144x128xf32>
    %9 = arith.maximumf %7, %8 : vector<144x128xf32>
    %10 = arith.maximumf %6, %9 : vector<144x128xf32>
    %c0_4 = arith.constant 0 : index
    %c0_5 = arith.constant 0 : index
    %11 = vector.load %arg3[%c0_4, %c0_5] : memref<1x128xf32, #tpu.memory_space<vmem>>, vector<1x128xf32>
    %12 = vector.broadcast %11 : vector<1x128xf32> to vector<144x128xf32>
    %13 = arith.addf %10, %12 : vector<144x128xf32>
    %cst_6 = arith.constant 0.000000e+00 : f32
    %14 = vector.broadcast %cst_6 : f32 to vector<144x128xf32>
    %15 = arith.maximumf %13, %14 : vector<144x128xf32>
    %16 = arith.truncf %15 : vector<144x128xf32> to vector<144x128xbf16>
    %c0_7 = arith.constant 0 : index
    %c0_8 = arith.constant 0 : index
    %c0_9 = arith.constant 0 : index
    %17 = vector.load %arg4[%c0_7, %c0_8, %c0_9] : memref<1x144x128xbf16, #tpu.memory_space<vmem>>, vector<1x144x128xbf16>
    %18 = vector.shape_cast %17 : vector<1x144x128xbf16> to vector<144x128xbf16>
    %19 = vector.shape_cast %16 : vector<144x128xbf16> to vector<1x144x128xbf16>
    tpu.vector_store %arg4[%c0_7, %c0_8, %c0_9], %19 {strides = array<i32>} : memref<1x144x128xbf16, #tpu.memory_space<vmem>>, vector<1x144x128xbf16>,
    return
  }
  func.func @transform_0(%arg0: i32) -> (i32, i32, i32) {
    %c0_i32 = arith.constant 0 : i32
    %c0_i32_0 = arith.constant 0 : i32
    %c0_i32_1 = arith.constant 0 : i32
    return %arg0, %c0_i32, %c0_i32_0 : i32, i32, i32
  }
  func.func @transform_1(%arg0: i32) -> (i32, i32) {
    %c0_i32 = arith.constant 0 : i32
    %c0_i32_0 = arith.constant 0 : i32
    %c0_i32_1 = arith.constant 0 : i32
    return %c0_i32, %c0_i32_0 : i32, i32
  }
  func.func @transform_2(%arg0: i32) -> (i32, i32) {
    %c0_i32 = arith.constant 0 : i32
    %c0_i32_0 = arith.constant 0 : i32
    %c0_i32_1 = arith.constant 0 : i32
    return %c0_i32, %c0_i32_0 : i32, i32
  }
  func.func @transform_3(%arg0: i32) -> (i32, i32, i32) {
    %c0_i32 = arith.constant 0 : i32
    %c0_i32_0 = arith.constant 0 : i32
    %c0_i32_1 = arith.constant 0 : i32
    return %arg0, %c0_i32, %c0_i32_0 : i32, i32, i32
  }
}

module attributes {stable_mosaic.version = 11 : i64} {
  func.func @_conv_relu_pool_gap_fc_kernel(%arg0: i32, %arg1: memref<1x100x576xbf16, #tpu.memory_space<vmem>>, %arg2: memref<576x128xbf16, #tpu.memory_space<vmem>>, %arg3: memref<1x128xf32, #tpu.memory_space<vmem>>, %arg4: memref<128x128xf32, #tpu.memory_space<vmem>>, %arg5: memref<1x128xf32, #tpu.memory_space<vmem>>, %arg6: memref<1x1x128xf32, #tpu.memory_space<vmem>>) attributes {dimension_semantics = [#tpu.dimension_semantics<parallel>], iteration_bounds = array<i64: 2>, scalar_prefetch = 0 : i64, scratch_operands = 0 : i64, tpu.core_type = #tpu.core_type<tc>, window_params = [{transform_indices = @transform_0, window_bounds = array<i64: 1, 100, 576>}, {pipeline_mode = #tpu.pipeline_mode<synchronous>, transform_indices = @transform_1, window_bounds = array<i64: 576, 128>}, {pipeline_mode = #tpu.pipeline_mode<synchronous>, transform_indices = @transform_2, window_bounds = array<i64: 1, 128>}, {pipeline_mode = #tpu.pipeline_mode<synchronous>, transform_indices = @transform_3, window_bounds = array<i64: 128, 128>}, {pipeline_mode = #tpu.pipeline_mode<synchronous>, transform_indices = @transform_4, window_bounds = array<i64: 1, 128>}, {transform_indices = @transform_5, window_bounds = array<i64: 1, 1, 128>}]} {
    %c0 = arith.constant 0 : index
    %c0_0 = arith.constant 0 : index
    %c0_1 = arith.constant 0 : index
    %0 = vector.load %arg1[%c0, %c0_0, %c0_1] : memref<1x100x576xbf16, #tpu.memory_space<vmem>>, vector<1x100x576xbf16>
    %1 = vector.shape_cast %0 : vector<1x100x576xbf16> to vector<100x576xbf16>
    %c0_2 = arith.constant 0 : index
    %c0_3 = arith.constant 0 : index
    %2 = vector.load %arg2[%c0_2, %c0_3] : memref<576x128xbf16, #tpu.memory_space<vmem>>, vector<576x128xbf16>
    %cst = arith.constant dense<0.000000e+00> : vector<100x128xf32>
    %3 = tpu.matmul %1, %2, %cst {dimension_numbers = #tpu.dot_dimension_numbers<[1], [0], [0], [1], [0, 0, 1, 1], [], []>} : vector<100x576xbf16>, vector<576x128xbf16>, vector<100x128xf32> -> vector<100x128xf32>
    %4 = vector.extract_strided_slice %3 {offsets = [0, 0], sizes = [25, 128], strides = [1, 1]} : vector<100x128xf32> to vector<25x128xf32>
    %5 = vector.extract_strided_slice %3 {offsets = [25, 0], sizes = [25, 128], strides = [1, 1]} : vector<100x128xf32> to vector<25x128xf32>
    %6 = arith.maximumf %4, %5 : vector<25x128xf32>
    %7 = vector.extract_strided_slice %3 {offsets = [50, 0], sizes = [25, 128], strides = [1, 1]} : vector<100x128xf32> to vector<25x128xf32>
    %8 = vector.extract_strided_slice %3 {offsets = [75, 0], sizes = [25, 128], strides = [1, 1]} : vector<100x128xf32> to vector<25x128xf32>
    %9 = arith.maximumf %7, %8 : vector<25x128xf32>
    %10 = arith.maximumf %6, %9 : vector<25x128xf32>
    %c0_4 = arith.constant 0 : index
    %c0_5 = arith.constant 0 : index
    %11 = vector.load %arg3[%c0_4, %c0_5] : memref<1x128xf32, #tpu.memory_space<vmem>>, vector<1x128xf32>
    %12 = vector.broadcast %11 : vector<1x128xf32> to vector<25x128xf32>
    %13 = arith.addf %10, %12 : vector<25x128xf32>
    %cst_6 = arith.constant 0.000000e+00 : f32
    %14 = vector.broadcast %cst_6 : f32 to vector<25x128xf32>
    %15 = arith.maximumf %13, %14 : vector<25x128xf32>
    %cst_7 = arith.constant dense<0.000000e+00> : vector<128xf32>
    %16 = vector.multi_reduction <add>, %15, %cst_7 [0] : vector<25x128xf32> to vector<128xf32>
    %17 = vector.shape_cast %16 : vector<128xf32> to vector<1x128xf32>
    %cst_8 = arith.constant 4.000000e-02 : f32
    %18 = vector.broadcast %cst_8 : f32 to vector<1x128xf32>
    %19 = arith.mulf %17, %18 : vector<1x128xf32>
    %c0_9 = arith.constant 0 : index
    %c0_10 = arith.constant 0 : index
    %20 = vector.load %arg4[%c0_9, %c0_10] : memref<128x128xf32, #tpu.memory_space<vmem>>, vector<128x128xf32>
    %cst_11 = arith.constant dense<0.000000e+00> : vector<1x128xf32>
    %21 = tpu.matmul %19, %20, %cst_11 {dimension_numbers = #tpu.dot_dimension_numbers<[1], [0], [0], [1], [0, 0, 1, 1], [], []>} : vector<1x128xf32>, vector<128x128xf32>, vector<1x128xf32> -> vector<1x128xf32>
    %c0_12 = arith.constant 0 : index
    %c0_13 = arith.constant 0 : index
    %22 = vector.load %arg5[%c0_12, %c0_13] : memref<1x128xf32, #tpu.memory_space<vmem>>, vector<1x128xf32>
    %23 = arith.addf %21, %22 : vector<1x128xf32>
    %c0_14 = arith.constant 0 : index
    %c0_15 = arith.constant 0 : index
    %c0_16 = arith.constant 0 : index
    %24 = vector.load %arg6[%c0_14, %c0_15, %c0_16] : memref<1x1x128xf32, #tpu.memory_space<vmem>>, vector<1x1x128xf32>
    %25 = vector.shape_cast %24 : vector<1x1x128xf32> to vector<1x128xf32>
    %26 = vector.shape_cast %23 : vector<1x128xf32> to vector<1x1x128xf32>
    tpu.vector_store %arg6[%c0_14, %c0_15, %c0_16], %26 {strides = array<i32>} : memref<1x1x128xf32, #tpu.memory_space<vmem>>, vector<1x1x128xf32>,
    return
  }
  func.func @transform_0(%arg0: i32) -> (i32, i32, i32) {
    %c0_i32 = arith.constant 0 : i32
    %c0_i32_0 = arith.constant 0 : i32
    %c0_i32_1 = arith.constant 0 : i32
    return %arg0, %c0_i32, %c0_i32_0 : i32, i32, i32
  }
  func.func @transform_1(%arg0: i32) -> (i32, i32) {
    %c0_i32 = arith.constant 0 : i32
    %c0_i32_0 = arith.constant 0 : i32
    %c0_i32_1 = arith.constant 0 : i32
    return %c0_i32, %c0_i32_0 : i32, i32
  }
  func.func @transform_2(%arg0: i32) -> (i32, i32) {
    %c0_i32 = arith.constant 0 : i32
    %c0_i32_0 = arith.constant 0 : i32
    %c0_i32_1 = arith.constant 0 : i32
    return %c0_i32, %c0_i32_0 : i32, i32
  }
  func.func @transform_3(%arg0: i32) -> (i32, i32) {
    %c0_i32 = arith.constant 0 : i32
    %c0_i32_0 = arith.constant 0 : i32
    %c0_i32_1 = arith.constant 0 : i32
    return %c0_i32, %c0_i32_0 : i32, i32
  }
  func.func @transform_4(%arg0: i32) -> (i32, i32) {
    %c0_i32 = arith.constant 0 : i32
    %c0_i32_0 = arith.constant 0 : i32
    %c0_i32_1 = arith.constant 0 : i32
    return %c0_i32, %c0_i32_0 : i32, i32
  }
  func.func @transform_5(%arg0: i32) -> (i32, i32, i32) {
    %c0_i32 = arith.constant 0 : i32
    %c0_i32_0 = arith.constant 0 : i32
    %c0_i32_1 = arith.constant 0 : i32
    return %arg0, %c0_i32, %c0_i32_0 : i32, i32, i32
  }
}

</mosaic_0001>

<bundles_post_ra>
// kernel: base_model_forward.3
= control target key start
LH: loop header
LB: loop body
LE: loop exit
PB: predicated region body
PF: predicated region fallthrough
CT: control target
= control target key end

     0   :  { %s2573_s12 = smov 0   ;;  %s2889_s0 = inlined_call_operand.vmem [shape: bf16[2,676,147], index: 0, kind: input, shape index: {}]   ;;  %s2890_s1 = inlined_call_operand.vmem [shape: bf16[147,128], index: 1, kind: input, shape index: {}]   ;;  %s2891_s2 = inlined_call_operand.vmem [shape: f32[1,128], index: 2, kind: input, shape index: {}]   ;;  %s2892_s3 = inlined_call_operand.vmem [shape: bf16[2,676,128], index: 3, kind: output, shape index: {}]  }
   0x1 LB: > { %s1803_s13 = sadd.s32 4294967295, %s2549_s12   ;;  %p1807_p0 = scmp.ge.s32.totalorder %s2549_s12, 1  ;;  %s2549_s12 = sphi %s2573_s12, %s13_s12  }
   0x2   : > { %p137_p1 = scmp.lt.s32.totalorder %s2549_s12, 3 }
   0x4   : > { %p138_p2 = pnand %p1807_p0, %p137_p1 }
   0x5   : > { %v2405_v0 = vld [vmem:[%s2890_s1] sm:$0xff] (!%p138_p2)   ;;  %v2551_v1 = vmov (!%p138_p2), 0   ;;  %v2406_v2 = vld [vmem:[%s2890_s1 + $0x8] sm:$0xff] (!%p138_p2)   ;;  %v2407_v3 = vld [vmem:[%s2890_s1 + $0x10] sm:$0xff] (!%p138_p2)   ;;  %p161_p3 = scmp.lt.s32.totalorder (!%p138_p2), %s1803_s13, 1  ;;  %vm724_vm0 = vcmask (!%p138_p2), 154624  }
   0x6   : > { %141 = sbr.rel (%p138_p2) target bundleno = 435 (0x1b3), region = 32  ;;  %861 = vmatprep.subr.bf16.mxu0 (!%p138_p2), %v2551_v1  ;;  %2373 = vmatprep.subr.bf16.mxu1 (!%p138_p2), %v2551_v1  ;;  %v2408_v4 = vld [vmem:[%s2890_s1 + $0x18] sm:$0xff] (!%p138_p2)   ;;  %v2409_v5 = vld [vmem:[%s2890_s1 + $0x20] sm:$0xff] (!%p138_p2)   ;;  %v2410_v8 = vld [vmem:[%s2890_s1 + $0x28] sm:$0xff] (!%p138_p2)   ;;  %vm854_vm1 = vcmask (!%p138_p2), 1040384   ;;  %vm855_vm2 = vcmask (!%p138_p2), 1041408  }
   0x7   : > { %862 = vmatpush1.bf16.msra.mxu0 (!%p138_p2), %v2405_v0  ;;  %2383 = vmatpush1.bf16.msra.mxu1 (!%p138_p2), %v2405_v0  ;;  %v2411_v9 = vld [vmem:[%s2890_s1 + $0x30] sm:$0xff] (!%p138_p2)   ;;  %v2412_v10 = vld [vmem:[%s2890_s1 + $0x38] sm:$0xff] (!%p138_p2)   ;;  %v2552_v11 = vmov (!%p138_p2), 65535   ;;  %v2413_v13 = vld [vmem:[%s2890_s1 + $0x40] sm:$0xff] (!%p138_p2)  }
   0x8   : > { %863 = vmatprep.subr.bf16.mxu0 (!%p138_p2), %v2551_v1  ;;  %2374 = vmatprep.subr.bf16.mxu1 (!%p138_p2), %v2551_v1  ;;  %v856_v12 = vsel (!%p138_p2), %vm854_vm1, 4294967295, %v2552_v11  ;;  %v2414_v14 = vld [vmem:[%s2890_s1 + $0x48] ss:$0 sps:$4 sm:$0x33] (!%p138_p2)  }
   0x9   : > { %v857_v15 = vsel (!%p138_p2), %vm855_vm2, %v856_v12, 0 }
   0xa   : > { %v859_v16 = vand.u32 (!%p138_p2), %v2414_v14, %v857_v15 }
   0xb   : > { %864 = vmatpush1.bf16.msra.mxu0 (!%p138_p2), %v2406_v2  ;;  %2384 = vmatpush1.bf16.msra.mxu1 (!%p138_p2), %v2406_v2 }
   0xc   : > { %865 = vmatprep.subr.bf16.mxu0 (!%p138_p2), %v2551_v1  ;;  %2375 = vmatprep.subr.bf16.mxu1 (!%p138_p2), %v2551_v1 }
   0xd   : > { %s2894_s13 = smov (!%p161_p3, %s1803_s13), 1 }
   0xe   : > { %s2393_s22 = smul.u32 680, %s2894_s13 }
   0xf   : > { %866 = vmatpush1.bf16.msra.mxu0 %v2407_v3  ;;  %2385 = vmatpush1.bf16.msra.mxu1 %v2407_v3  ;;  %s2394_s15 = smul.u32 340, %s2894_s13 }
  0x10   : > { %867 = vmatprep.subr.bf16.mxu0 %v2551_v1  ;;  %2376 = vmatprep.subr.bf16.mxu1 %v2551_v1  ;;  %s2599_s25 = scalar_lea.vmem %s2889_s0, %s2393_s22 }
  0x11   : > { %v2417_v6 = vld [vmem:[%s2599_s25 + $0x4] ss:$8 sps:$4 sm:$0xff]   ;;  %v2415_v17 = vld [vmem:[%s2599_s25] ss:$8 sps:$4 sm:$0xff]   ;;  %v2421_v19 = vld [vmem:[%s2599_s25 + $0x14] ss:$8 sps:$4 sm:$0xff]   ;;  %s2760_s18 = scalar_lea.vmem %s2892_s3, %s2394_s15 }
  0x12   : > { %v2420_v7 = vld [vmem:[%s2599_s25 + $0x164] ss:$8 sps:$4 sm:$0xff]   ;;  %1907 = vmatprep.mubr.msk.bf16.mxu0 %vm724_vm0, %v2417_v6  ;;  %v2418_v18 = vld [vmem:[%s2599_s25 + $0x160] ss:$8 sps:$4 sm:$0xff]   ;;  %v2424_v20 = vld [vmem:[%s2599_s25 + $0x174] ss:$8 sps:$4 sm:$0xff]  }
  0x13   : > { %868 = vmatpush1.bf16.msra.mxu0 %v2408_v4  ;;  %2386 = vmatpush1.bf16.msra.mxu1 %v2408_v4  ;;  %v2423_v21 = vld [vmem:[%s2599_s25 + $0x10] ss:$8 sps:$4 sm:$0xff]   ;;  %v2426_v22 = vld [vmem:[%s2599_s25 + $0x24] ss:$8 sps:$4 sm:$0xff]   ;;  %v2429_v25 = vld [vmem:[%s2599_s25 + $0x20] ss:$8 sps:$4 sm:$0xff]  }
  0x14   : > { %869 = vmatprep.subr.bf16.mxu0 %v2551_v1  ;;  %2377 = vmatprep.subr.bf16.mxu1 %v2551_v1  ;;  %v2428_v23 = vld [vmem:[%s2599_s25 + $0x170] ss:$8 sps:$4 sm:$0xff]   ;;  %v2430_v24 = vld [vmem:[%s2599_s25 + $0x184] ss:$8 sps:$4 sm:$0xff]   ;;  %v2432_v26 = vld [vmem:[%s2599_s25 + $0x34] ss:$8 sps:$4 sm:$0xff]  }
  0x15   : > { %1929 = vmatprep.mubr.msk.bf16.mxu1 %vm724_vm0, %v2420_v7  ;;  %v2434_v27 = vld [vmem:[%s2599_s25 + $0x180] ss:$8 sps:$4 sm:$0xff]   ;;  %v2436_v28 = vld [vmem:[%s2599_s25 + $0x194] ss:$8 sps:$4 sm:$0xff]   ;;  %v2435_v29 = vld [vmem:[%s2599_s25 + $0x30] ss:$8 sps:$4 sm:$0xff]  }
  0x16   : > { %v2438_v30 = vld [vmem:[%s2599_s25 + $0x44] ss:$8 sps:$4 sm:$0xff]   ;;  %v2440_v31 = vld [vmem:[%s2599_s25 + $0x190] ss:$8 sps:$4 sm:$0xff]   ;;  %v2441_v33 = vld [vmem:[%s2599_s25 + $0x40] ss:$8 sps:$4 sm:$0xff]  }
  0x17   : > { %870 = vmatpush1.bf16.msra.mxu0 %v2409_v5  ;;  %2387 = vmatpush1.bf16.msra.mxu1 %v2409_v5  ;;  %v2442_v32 = vld [vmem:[%s2599_s25 + $0x1a4] ss:$8 sps:$4 sm:$0xff]   ;;  %v2446_v34 = vld [vmem:[%s2599_s25 + $0x1a0] ss:$8 sps:$4 sm:$0xff]   ;;  %v2444_v35 = vld [vmem:[%s2599_s25 + $0x54] ss:$8 sps:$4 sm:$0xff]  }
  0x18   : > { %871 = vmatprep.subr.bf16.mxu0 %v2551_v1  ;;  %2378 = vmatprep.subr.bf16.mxu1 %v2551_v1  ;;  %v2448_v36 = vld [vmem:[%s2599_s25 + $0x1b4] ss:$8 sps:$4 sm:$0xff]   ;;  %v2447_v37 = vld [vmem:[%s2599_s25 + $0x50] ss:$8 sps:$4 sm:$0xff]   ;;  %v2450_v39 = vld [vmem:[%s2599_s25 + $0x64] ss:$8 sps:$4 sm:$0xff]  }
  0x19   : > { %v2452_v38 = vld [vmem:[%s2599_s25 + $0x1b0] ss:$8 sps:$4 sm:$0xff]   ;;  %v2454_v40 = vld [vmem:[%s2599_s25 + $0x1c4] ss:$8 sps:$4 sm:$0xff]   ;;  %v2453_v41 = vld [vmem:[%s2599_s25 + $0x60] ss:$8 sps:$4 sm:$0xff]  }
  0x1a   : > { %v2458_v42 = vld [vmem:[%s2599_s25 + $0x1c0] ss:$8 sps:$4 sm:$0xff]   ;;  %v2456_v43 = vld [vmem:[%s2599_s25 + $0x74] ss:$8 sps:$4 sm:$0xff]   ;;  %v2459_v45 = vld [vmem:[%s2599_s25 + $0x70] ss:$8 sps:$4 sm:$0xff]  }
  0x1b   : > { %872 = vmatpush1.bf16.msra.mxu0 %v2410_v8  ;;  %2388 = vmatpush1.bf16.msra.mxu1 %v2410_v8  ;;  %v2460_v44 = vld [vmem:[%s2599_s25 + $0x1d4] ss:$8 sps:$4 sm:$0xff]   ;;  %v2464_v46 = vld [vmem:[%s2599_s25 + $0x1d0] ss:$8 sps:$4 sm:$0xff]   ;;  %v2462_v47 = vld [vmem:[%s2599_s25 + $0x84] ss:$8 sps:$4 sm:$0xff]  }
  0x1c   : > { %873 = vmatprep.subr.bf16.mxu0 %v2551_v1  ;;  %2379 = vmatprep.subr.bf16.mxu1 %v2551_v1  ;;  %v2466_v48 = vld [vmem:[%s2599_s25 + $0x1e4] ss:$8 sps:$4 sm:$0xff]   ;;  %v2465_v49 = vld [vmem:[%s2599_s25 + $0x80] ss:$8 sps:$4 sm:$0xff]   ;;  %v2468_v51 = vld [vmem:[%s2599_s25 + $0x94] ss:$8 sps:$4 sm:$0xff]  }
  0x1d   : > { %v2470_v50 = vld [vmem:[%s2599_s25 + $0x1e0] ss:$8 sps:$4 sm:$0xff]   ;;  %v2472_v52 = vld [vmem:[%s2599_s25 + $0x1f4] ss:$8 sps:$4 sm:$0xff]   ;;  %v2471_v53 = vld [vmem:[%s2599_s25 + $0x90] ss:$8 sps:$4 sm:$0xff]  }
  0x1e   : > { %v2476_v54 = vld [vmem:[%s2599_s25 + $0x1f0] ss:$8 sps:$4 sm:$0xff]   ;;  %v2474_v55 = vld [vmem:[%s2599_s25 + $0xa4] ss:$8 sps:$4 sm:$0xff]   ;;  %v2477_v57 = vld [vmem:[%s2599_s25 + $0xa0] ss:$8 sps:$4 sm:$0xff]  }
  0x1f   : > { %874 = vmatpush1.bf16.msra.mxu0 %v2411_v9  ;;  %2389 = vmatpush1.bf16.msra.mxu1 %v2411_v9  ;;  %v2478_v56 = vld [vmem:[%s2599_s25 + $0x204] ss:$8 sps:$4 sm:$0xff]   ;;  %v2482_v58 = vld [vmem:[%s2599_s25 + $0x200] ss:$8 sps:$4 sm:$0xff]   ;;  %v2480_v59 = vld [vmem:[%s2599_s25 + $0xb4] ss:$8 sps:$4 sm:$0xff]  }
  0x20   : > { %875 = vmatprep.subr.bf16.mxu0 %v2551_v1  ;;  %2380 = vmatprep.subr.bf16.mxu1 %v2551_v1  ;;  %v2484_v60 = vld [vmem:[%s2599_s25 + $0x214] ss:$8 sps:$4 sm:$0xff]   ;;  %v2483_v61 = vld [vmem:[%s2599_s25 + $0xb0] ss:$8 sps:$4 sm:$0xff]   ;;  %v2486_v63 = vld [vmem:[%s2599_s25 + $0xc4] ss:$8 sps:$4 sm:$0xff]  }
  0x21   : > { %v2488_v62 = vld [vmem:[%s2599_s25 + $0x210] ss:$8 sps:$4 sm:$0xff]   ;;  %v2490_v0 = vld [vmem:[%s2599_s25 + $0x224] ss:$8 sps:$4 sm:$0xff]   ;;  %v2494_v2 = vld [vmem:[%s2599_s25 + $0x220] ss:$8 sps:$4 sm:$0xff]  }
  0x22   : > { %v2492_v3 = vld [vmem:[%s2599_s25 + $0xd4] ss:$8 sps:$4 sm:$0xff]   ;;  %v2495_v5 = vld [vmem:[%s2599_s25 + $0xd0] ss:$8 sps:$4 sm:$0xff]   ;;  %v2498_v7 = vld [vmem:[%s2599_s25 + $0xe4] ss:$8 sps:$4 sm:$0xff]  }
  0x23   : > { %876 = vmatpush1.bf16.msra.mxu0 %v2412_v10  ;;  %2390 = vmatpush1.bf16.msra.mxu1 %v2412_v10  ;;  %v2496_v4 = vld [vmem:[%s2599_s25 + $0x234] ss:$8 sps:$4 sm:$0xff]   ;;  %v2500_v6 = vld [vmem:[%s2599_s25 + $0x230] ss:$8 sps:$4 sm:$0xff]   ;;  %v2502_v8 = vld [vmem:[%s2599_s25 + $0x244] ss:$8 sps:$4 sm:$0xff]  }
  0x24   : > { %877 = vmatprep.subr.bf16.mxu0 %v2551_v1  ;;  %2381 = vmatprep.subr.bf16.mxu1 %v2551_v1  ;;  %v2501_v9 = vld [vmem:[%s2599_s25 + $0xe0] ss:$8 sps:$4 sm:$0xff]   ;;  %v2504_v11 = vld [vmem:[%s2599_s25 + $0xf4] ss:$8 sps:$4 sm:$0xff]   ;;  %v2512_v14 = vld [vmem:[%s2599_s25 + $0x250] ss:$8 sps:$4 sm:$0xff]  }
  0x25   : > { %v2506_v10 = vld [vmem:[%s2599_s25 + $0x240] ss:$8 sps:$4 sm:$0xff]   ;;  %v2508_v12 = vld [vmem:[%s2599_s25 + $0x254] ss:$8 sps:$4 sm:$0xff]   ;;  %v2510_v15 = vld [vmem:[%s2599_s25 + $0x104] ss:$8 sps:$4 sm:$0xff]  }
  0x27   : > { %878 = vmatpush1.bf16.msra.mxu0 %v2413_v13  ;;  %2391 = vmatpush1.bf16.msra.mxu1 %v2413_v13  ;;  %v2507_v13 = vld [vmem:[%s2599_s25 + $0xf0] ss:$8 sps:$4 sm:$0xff]  }
  0x28   : > { %879 = vmatprep.subr.bf16.mxu0 %v2551_v1  ;;  %2382 = vmatprep.subr.bf16.mxu1 %v2551_v1  ;;  %v2489_v1 = vld [vmem:[%s2599_s25 + $0xc0] ss:$8 sps:$4 sm:$0xff]  }
  0x2b   : > { %880 = vmatpush1.bf16.msra.mxu0 %v859_v16  ;;  %2392 = vmatpush1.bf16.msra.mxu1 %v859_v16  ;;  %v2514_v16 = vld [vmem:[%s2599_s25 + $0x264] ss:$8 sps:$4 sm:$0xff]  }
  0x2e   : > { %894 = vmatmul.mubr.bf16.vlgmr.msra.gmra.mrb[0].mxu0 %v2415_v17  ;;  %1070 = vmatmul.mubr.bf16.vlgmr.msra.gmra.mrb[0].mxu1 %v2418_v18  ;;  %v2513_v17 = vld [vmem:[%s2599_s25 + $0x100] ss:$8 sps:$4 sm:$0xff]  }
  0x2f   : > { %1908 = vmatprep.mubr.msk.bf16.mxu0 %vm724_vm0, %v2421_v19  ;;  %1930 = vmatprep.mubr.msk.bf16.mxu1 %vm724_vm0, %v2424_v20  ;;  %v2518_v18 = vld [vmem:[%s2599_s25 + $0x260] ss:$8 sps:$4 sm:$0xff]   ;;  %v2516_v19 = vld [vmem:[%s2599_s25 + $0x114] ss:$8 sps:$4 sm:$0xff]  }
  0x30   : > { %v2520_v20 = vld [vmem:[%s2599_s25 + $0x274] ss:$8 sps:$4 sm:$0xff]  }
  0x36   : > { %902 = vmatmul.mubr.bf16.gmra.mrb[4].mxu0 %v2423_v21  ;;  %1078 = vmatmul.mubr.bf16.gmra.mrb[4].mxu1 %v2428_v23  ;;  %v2519_v21 = vld [vmem:[%s2599_s25 + $0x110] ss:$8 sps:$4 sm:$0xff]   ;;  %v2522_v23 = vld [vmem:[%s2599_s25 + $0x124] ss:$8 sps:$4 sm:$0xff]  }
  0x37   : > { %1909 = vmatprep.mubr.msk.bf16.mxu0 %vm724_vm0, %v2426_v22  ;;  %1931 = vmatprep.mubr.msk.bf16.mxu1 %vm724_vm0, %v2430_v24  ;;  %v2524_v22 = vld [vmem:[%s2599_s25 + $0x270] ss:$8 sps:$4 sm:$0xff]   ;;  %v2526_v24 = vld [vmem:[%s2599_s25 + $0x284] ss:$8 sps:$4 sm:$0xff]  }
  0x3e   : > { %910 = vmatmul.mubr.bf16.gmra.mrb[8].mxu0 %v2429_v25  ;;  %1086 = vmatmul.mubr.bf16.gmra.mrb[8].mxu1 %v2434_v27  ;;  %v2525_v25 = vld [vmem:[%s2599_s25 + $0x120] ss:$8 sps:$4 sm:$0xff]   ;;  %v2528_v27 = vld [vmem:[%s2599_s25 + $0x134] ss:$8 sps:$4 sm:$0xff]  }
  0x3f   : > { %1910 = vmatprep.mubr.msk.bf16.mxu0 %vm724_vm0, %v2432_v26  ;;  %1932 = vmatprep.mubr.msk.bf16.mxu1 %vm724_vm0, %v2436_v28  ;;  %v2530_v26 = vld [vmem:[%s2599_s25 + $0x280] ss:$8 sps:$4 sm:$0xff]   ;;  %v2532_v28 = vld [vmem:[%s2599_s25 + $0x294] ss:$8 sps:$4 sm:$0xff]  }
  0x46   : > { %918 = vmatmul.mubr.bf16.gmra.mrb[12].mxu0 %v2435_v29  ;;  %1094 = vmatmul.mubr.bf16.gmra.mrb[12].mxu1 %v2440_v31  ;;  %v256_v29 = vld [vmem:[%s2599_s25 + $0x2a0] sm:$0x33]  ;;  %v2536_v31 = vld [vmem:[%s2599_s25 + $0x290] ss:$8 sps:$4 sm:$0xff]  }
  0x47   : > { %1911 = vmatprep.mubr.msk.bf16.mxu0 %vm724_vm0, %v2438_v30  ;;  %1933 = vmatprep.mubr.msk.bf16.mxu1 %vm724_vm0, %v2442_v32  ;;  %v2531_v30 = vld [vmem:[%s2599_s25 + $0x130] ss:$8 sps:$4 sm:$0xff]   ;;  %v2534_v32 = vld [vmem:[%s2599_s25 + $0x144] ss:$8 sps:$4 sm:$0xff]  }
  0x4e   : > { %926 = vmatmul.mubr.bf16.gmra.mrb[16].mxu0 %v2441_v33  ;;  %1102 = vmatmul.mubr.bf16.gmra.mrb[16].mxu1 %v2446_v34  ;;  %v1896_v33 = vcombine.high %v256_v29, %v256_v29  ;;  %v2537_v34 = vld [vmem:[%s2599_s25 + $0x140] ss:$8 sps:$4 sm:$0xff]  }
  0x4f   : > { %1912 = vmatprep.mubr.msk.bf16.mxu0 %vm724_vm0, %v2444_v35  ;;  %1934 = vmatprep.mubr.msk.bf16.mxu1 %vm724_vm0, %v2448_v36  ;;  %v1895_v35 = vcombine.low %v256_v29, %v256_v29  ;;  %v2539_v36 = vld [vmem:[%s2599_s25 + $0x154] ss:$8 sps:$4 sm:$0xff]  }
  0x56   : > { %934 = vmatmul.mubr.bf16.gmra.mrb[20].mxu0 %v2447_v37  ;;  %1110 = vmatmul.mubr.bf16.gmra.mrb[20].mxu1 %v2452_v38  ;;  %v2542_v37 = vld [vmem:[%s2599_s25 + $0x150] ss:$8 sps:$4 sm:$0xff]   ;;  %v2750_v38 = vld [vmem:[%s2891_s2] ss:$0 sm:$0xff] }
  0x57   : > { %1913 = vmatprep.mubr.msk.bf16.mxu0 %vm724_vm0, %v2450_v39  ;;  %1935 = vmatprep.mubr.msk.bf16.mxu1 %vm724_vm0, %v2454_v40 }
  0x5e   : > { %942 = vmatmul.mubr.bf16.gmra.mrb[24].mxu0 %v2453_v41  ;;  %1118 = vmatmul.mubr.bf16.gmra.mrb[24].mxu1 %v2458_v42 }
  0x5f   : > { %1914 = vmatprep.mubr.msk.bf16.mxu0 %vm724_vm0, %v2456_v43  ;;  %1936 = vmatprep.mubr.msk.bf16.mxu1 %vm724_vm0, %v2460_v44 }
  0x66   : > { %950 = vmatmul.mubr.bf16.gmra.mrb[28].mxu0 %v2459_v45  ;;  %1126 = vmatmul.mubr.bf16.gmra.mrb[28].mxu1 %v2464_v46 }
  0x67   : > { %1915 = vmatprep.mubr.msk.bf16.mxu0 %vm724_vm0, %v2462_v47  ;;  %1937 = vmatprep.mubr.msk.bf16.mxu1 %vm724_vm0, %v2466_v48 }
  0x6e   : > { %958 = vmatmul.mubr.bf16.gmra.mrb[32].mxu0 %v2465_v49  ;;  %1134 = vmatmul.mubr.bf16.gmra.mrb[32].mxu1 %v2470_v50 }
  0x6f   : > { %1916 = vmatprep.mubr.msk.bf16.mxu0 %vm724_vm0, %v2468_v51  ;;  %1938 = vmatprep.mubr.msk.bf16.mxu1 %vm724_vm0, %v2472_v52 }
  0x76   : > { %966 = vmatmul.mubr.bf16.gmra.mrb[36].mxu0 %v2471_v53  ;;  %1142 = vmatmul.mubr.bf16.gmra.mrb[36].mxu1 %v2476_v54 }
  0x77   : > { %1917 = vmatprep.mubr.msk.bf16.mxu0 %vm724_vm0, %v2474_v55  ;;  %1939 = vmatprep.mubr.msk.bf16.mxu1 %vm724_vm0, %v2478_v56 }
  0x7e   : > { %974 = vmatmul.mubr.bf16.gmra.mrb[40].mxu0 %v2477_v57  ;;  %1150 = vmatmul.mubr.bf16.gmra.mrb[40].mxu1 %v2482_v58 }
  0x7f   : > { %1918 = vmatprep.mubr.msk.bf16.mxu0 %vm724_vm0, %v2480_v59  ;;  %1940 = vmatprep.mubr.msk.bf16.mxu1 %vm724_vm0, %v2484_v60 }
  0x86   : > { %982 = vmatmul.mubr.bf16.gmra.mrb[44].mxu0 %v2483_v61  ;;  %1158 = vmatmul.mubr.bf16.gmra.mrb[44].mxu1 %v2488_v62 }
  0x87   : > { %1919 = vmatprep.mubr.msk.bf16.mxu0 %vm724_vm0, %v2486_v63  ;;  %1941 = vmatprep.mubr.msk.bf16.mxu1 %vm724_vm0, %v2490_v0 }
  0x8e   : > { %990 = vmatmul.mubr.bf16.gmra.mrb[48].mxu0 %v2489_v1  ;;  %1166 = vmatmul.mubr.bf16.gmra.mrb[48].mxu1 %v2494_v2 }
  0x8f   : > { %1920 = vmatprep.mubr.msk.bf16.mxu0 %vm724_vm0, %v2492_v3  ;;  %1942 = vmatprep.mubr.msk.bf16.mxu1 %vm724_vm0, %v2496_v4 }
  0x96   : > { %998 = vmatmul.mubr.bf16.gmra.mrb[52].mxu0 %v2495_v5  ;;  %1174 = vmatmul.mubr.bf16.gmra.mrb[52].mxu1 %v2500_v6 }
  0x97   : > { %1921 = vmatprep.mubr.msk.bf16.mxu0 %vm724_vm0, %v2498_v7  ;;  %1943 = vmatprep.mubr.msk.bf16.mxu1 %vm724_vm0, %v2502_v8 }
  0x9e   : > { %1006 = vmatmul.mubr.bf16.gmra.mrb[56].mxu0 %v2501_v9  ;;  %1182 = vmatmul.mubr.bf16.gmra.mrb[56].mxu1 %v2506_v10 }
  0x9f   : > { %1922 = vmatprep.mubr.msk.bf16.mxu0 %vm724_vm0, %v2504_v11  ;;  %1944 = vmatprep.mubr.msk.bf16.mxu1 %vm724_vm0, %v2508_v12 }
  0xa6   : > { %1014 = vmatmul.mubr.bf16.gmra.mrb[60].mxu0 %v2507_v13  ;;  %1190 = vmatmul.mubr.bf16.gmra.mrb[60].mxu1 %v2512_v14 }
  0xa7   : > { %1923 = vmatprep.mubr.msk.bf16.mxu0 %vm724_vm0, %v2510_v15  ;;  %1945 = vmatprep.mubr.msk.bf16.mxu1 %vm724_vm0, %v2514_v16 }
  0xae   : > { %1022 = vmatmul.mubr.bf16.gmra.mrb[64].mxu0 %v2513_v17  ;;  %1198 = vmatmul.mubr.bf16.gmra.mrb[64].mxu1 %v2518_v18 }
  0xaf   : > { %1924 = vmatprep.mubr.msk.bf16.mxu0 %vm724_vm0, %v2516_v19  ;;  %1946 = vmatprep.mubr.msk.bf16.mxu1 %vm724_vm0, %v2520_v20 }
  0xb6   : > { %1030 = vmatmul.mubr.bf16.gmra.mrb[68].mxu0 %v2519_v21  ;;  %1206 = vmatmul.mubr.bf16.gmra.mrb[68].mxu1 %v2524_v22 }
  0xb7   : > { %1925 = vmatprep.mubr.msk.bf16.mxu0 %vm724_vm0, %v2522_v23  ;;  %1947 = vmatprep.mubr.msk.bf16.mxu1 %vm724_vm0, %v2526_v24 }
  0xbe   : > { %1038 = vmatmul.mubr.bf16.gmra.mrb[72].mxu0 %v2525_v25  ;;  %1214 = vmatmul.mubr.bf16.gmra.mrb[72].mxu1 %v2530_v26 }
  0xbf   : > { %1926 = vmatprep.mubr.msk.bf16.mxu0 %vm724_vm0, %v2528_v27  ;;  %1948 = vmatprep.mubr.msk.bf16.mxu1 %vm724_vm0, %v2532_v28 }
  0xc6   : > { %1046 = vmatmul.mubr.bf16.gmra.mrb[76].mxu0 %v2531_v30  ;;  %1222 = vmatmul.mubr.bf16.gmra.mrb[76].mxu1 %v2536_v31 }
  0xc7   : > { %1927 = vmatprep.mubr.msk.bf16.mxu0 %vm724_vm0, %v2534_v32  ;;  %1949 = vmatprep.mubr.msk.bf16.mxu1 %vm724_vm0, %v1896_v33 }
  0xce   : > { %1054 = vmatmul.mubr.bf16.gmra.mrb[80].mxu0 %v2537_v34  ;;  %1230 = vmatmul.mubr.bf16.gmra.mrb[80].mxu1 %v1895_v35 }
  0xcf   : > { %1928 = vmatprep.mubr.msk.bf16.mxu0 %vm724_vm0, %v2539_v36 }
  0xd6   : > { %1062 = vmatmul.mubr.bf16.gmra.mrb[84].mxu0 %v2542_v37 }
 0x101   : > { %v895_v39 = vpop.f32.mrb[0].mxu0  ;;  %v1071_v40 = vpop.f32.mrb[0].mxu1 }
 0x102   : > { %v896_v41 = vadd.f32 %v2750_v38, %v895_v39  ;;  %v897_v42 = vpop.f32.mrb[1].mxu0  ;;  %v1072_v43 = vadd.f32 %v2750_v38, %v1071_v40  ;;  %v1073_v44 = vpop.f32.mrb[1].mxu1 }
 0x103   : > { %v898_v45 = vpop.f32.mrb[2].mxu0  ;;  %v1074_v46 = vpop.f32.mrb[2].mxu1 }
 0x104   : > { %v899_v47 = vadd.f32 %v2750_v38, %v898_v45  ;;  %v900_v48 = vpop.f32.mrb[3].mxu0  ;;  %v1281_v49 = vmax.f32 %v1072_v43, 0.0  ;;  %v1075_v50 = vadd.f32 %v2750_v38, %v1074_v46  ;;  %v1076_v51 = vpop.f32.mrb[3].mxu1  ;;  %v1237_v52 = vmax.f32 %v896_v41, 0.0 }
 0x106   : > { %v1238_v53 = vmax.f32 %v899_v47, 0.0  ;;  %v1282_v54 = vmax.f32 %v1075_v50, 0.0 }
 0x108   : > { %v2125_v55 = vpack.c.bf16 %v1238_v53, %v1237_v52  ;;  %v2235_v56 = vpack.c.bf16 %v1282_v54, %v1281_v49 }
 0x109   : > { %v903_v57 = vpop.f32.mrb[4].mxu0  ;;  %v1079_v58 = vpop.f32.mrb[4].mxu1 }
 0x10a   : > { %2126 = vst [vmem:[%s2760_s18] sm:$0xff] %v2125_v55   ;;  %v904_v59 = vadd.f32 %v2750_v38, %v903_v57  ;;  %v905_v60 = vpop.f32.mrb[5].mxu0  ;;  %2353 = vst [vmem:[%s2760_s18 + $0xb0] sm:$0xff] %v2235_v56   ;;  %v1080_v61 = vadd.f32 %v2750_v38, %v1079_v58  ;;  %v1081_v62 = vpop.f32.mrb[5].mxu1 }
 0x10b   : > { %v906_v63 = vpop.f32.mrb[6].mxu0  ;;  %v1082_v0 = vpop.f32.mrb[6].mxu1 }
 0x10c   : > { %v907_v1 = vadd.f32 %v2750_v38, %v906_v63  ;;  %v908_v2 = vpop.f32.mrb[7].mxu0  ;;  %v1283_v3 = vmax.f32 %v1080_v61, 0.0  ;;  %v1083_v4 = vadd.f32 %v2750_v38, %v1082_v0  ;;  %v1084_v5 = vpop.f32.mrb[7].mxu1  ;;  %v1239_v6 = vmax.f32 %v904_v59, 0.0 }
 0x10e   : > { %v1240_v7 = vmax.f32 %v907_v1, 0.0  ;;  %v1284_v8 = vmax.f32 %v1083_v4, 0.0 }
 0x110   : > { %v2130_v9 = vpack.c.bf16 %v1240_v7, %v1239_v6  ;;  %v2240_v10 = vpack.c.bf16 %v1284_v8, %v1283_v3 }
 0x111   : > { %v911_v11 = vpop.f32.mrb[8].mxu0  ;;  %v1087_v12 = vpop.f32.mrb[8].mxu1 }
 0x112   : > { %2332 = vst [vmem:[%s2760_s18 + $0x8] sm:$0xff] %v2130_v9   ;;  %v912_v13 = vadd.f32 %v2750_v38, %v911_v11  ;;  %v913_v14 = vpop.f32.mrb[9].mxu0  ;;  %2354 = vst [vmem:[%s2760_s18 + $0xb8] sm:$0xff] %v2240_v10   ;;  %v1088_v15 = vadd.f32 %v2750_v38, %v1087_v12  ;;  %v1089_v16 = vpop.f32.mrb[9].mxu1 }
 0x113   : > { %v914_v17 = vpop.f32.mrb[10].mxu0  ;;  %v1090_v18 = vpop.f32.mrb[10].mxu1 }
 0x114   : > { %v915_v19 = vadd.f32 %v2750_v38, %v914_v17  ;;  %v916_v20 = vpop.f32.mrb[11].mxu0  ;;  %v1285_v21 = vmax.f32 %v1088_v15, 0.0  ;;  %v1091_v22 = vadd.f32 %v2750_v38, %v1090_v18  ;;  %v1092_v23 = vpop.f32.mrb[11].mxu1  ;;  %v1241_v24 = vmax.f32 %v912_v13, 0.0 }
 0x116   : > { %v1242_v25 = vmax.f32 %v915_v19, 0.0  ;;  %v1286_v26 = vmax.f32 %v1091_v22, 0.0 }
 0x118   : > { %v2135_v27 = vpack.c.bf16 %v1242_v25, %v1241_v24  ;;  %v2245_v28 = vpack.c.bf16 %v1286_v26, %v1285_v21 }
 0x119   : > { %v919_v29 = vpop.f32.mrb[12].mxu0  ;;  %v1095_v30 = vpop.f32.mrb[12].mxu1 }
 0x11a   : > { %2333 = vst [vmem:[%s2760_s18 + $0x10] sm:$0xff] %v2135_v27   ;;  %v920_v31 = vadd.f32 %v2750_v38, %v919_v29  ;;  %v921_v32 = vpop.f32.mrb[13].mxu0  ;;  %2355 = vst [vmem:[%s2760_s18 + $0xc0] sm:$0xff] %v2245_v28   ;;  %v1096_v33 = vadd.f32 %v2750_v38, %v1095_v30  ;;  %v1097_v34 = vpop.f32.mrb[13].mxu1 }
 0x11b   : > { %v922_v35 = vpop.f32.mrb[14].mxu0  ;;  %v1098_v36 = vpop.f32.mrb[14].mxu1 }
 0x11c   : > { %v923_v37 = vadd.f32 %v2750_v38, %v922_v35  ;;  %v924_v39 = vpop.f32.mrb[15].mxu0  ;;  %v1287_v40 = vmax.f32 %v1096_v33, 0.0  ;;  %v1099_v41 = vadd.f32 %v2750_v38, %v1098_v36  ;;  %v1100_v42 = vpop.f32.mrb[15].mxu1  ;;  %v1243_v43 = vmax.f32 %v920_v31, 0.0 }
 0x11e   : > { %v1244_v44 = vmax.f32 %v923_v37, 0.0  ;;  %v1288_v45 = vmax.f32 %v1099_v41, 0.0 }
 0x120   : > { %v2140_v46 = vpack.c.bf16 %v1244_v44, %v1243_v43  ;;  %v2250_v47 = vpack.c.bf16 %v1288_v45, %v1287_v40 }
 0x121   : > { %v927_v48 = vpop.f32.mrb[16].mxu0  ;;  %v1103_v49 = vpop.f32.mrb[16].mxu1 }
 0x122   : > { %2334 = vst [vmem:[%s2760_s18 + $0x18] sm:$0xff] %v2140_v46   ;;  %v928_v50 = vadd.f32 %v2750_v38, %v927_v48  ;;  %v929_v51 = vpop.f32.mrb[17].mxu0  ;;  %2356 = vst [vmem:[%s2760_s18 + $0xc8] sm:$0xff] %v2250_v47   ;;  %v1104_v52 = vadd.f32 %v2750_v38, %v1103_v49  ;;  %v1105_v53 = vpop.f32.mrb[17].mxu1 }
 0x123   : > { %v930_v54 = vpop.f32.mrb[18].mxu0  ;;  %v1106_v55 = vpop.f32.mrb[18].mxu1 }
 0x124   : > { %v931_v56 = vadd.f32 %v2750_v38, %v930_v54  ;;  %v932_v57 = vpop.f32.mrb[19].mxu0  ;;  %v1289_v58 = vmax.f32 %v1104_v52, 0.0  ;;  %v1107_v59 = vadd.f32 %v2750_v38, %v1106_v55  ;;  %v1108_v60 = vpop.f32.mrb[19].mxu1  ;;  %v1245_v61 = vmax.f32 %v928_v50, 0.0 }
 0x126   : > { %v1246_v62 = vmax.f32 %v931_v56, 0.0  ;;  %v1290_v63 = vmax.f32 %v1107_v59, 0.0 }
 0x128   : > { %v2145_v0 = vpack.c.bf16 %v1246_v62, %v1245_v61  ;;  %v2255_v1 = vpack.c.bf16 %v1290_v63, %v1289_v58 }
 0x129   : > { %v935_v2 = vpop.f32.mrb[20].mxu0  ;;  %v1111_v3 = vpop.f32.mrb[20].mxu1 }
 0x12a   : > { %2335 = vst [vmem:[%s2760_s18 + $0x20] sm:$0xff] %v2145_v0   ;;  %v936_v4 = vadd.f32 %v2750_v38, %v935_v2  ;;  %v937_v5 = vpop.f32.mrb[21].mxu0  ;;  %2357 = vst [vmem:[%s2760_s18 + $0xd0] sm:$0xff] %v2255_v1   ;;  %v1112_v6 = vadd.f32 %v2750_v38, %v1111_v3  ;;  %v1113_v7 = vpop.f32.mrb[21].mxu1 }
 0x12b   : > { %v938_v8 = vpop.f32.mrb[22].mxu0  ;;  %v1114_v9 = vpop.f32.mrb[22].mxu1 }
 0x12c   : > { %v939_v10 = vadd.f32 %v2750_v38, %v938_v8  ;;  %v940_v11 = vpop.f32.mrb[23].mxu0  ;;  %v1291_v12 = vmax.f32 %v1112_v6, 0.0  ;;  %v1115_v13 = vadd.f32 %v2750_v38, %v1114_v9  ;;  %v1116_v14 = vpop.f32.mrb[23].mxu1  ;;  %v1247_v15 = vmax.f32 %v936_v4, 0.0 }
 0x12e   : > { %v1248_v16 = vmax.f32 %v939_v10, 0.0  ;;  %v1292_v17 = vmax.f32 %v1115_v13, 0.0 }
 0x130   : > { %v2150_v18 = vpack.c.bf16 %v1248_v16, %v1247_v15  ;;  %v2260_v19 = vpack.c.bf16 %v1292_v17, %v1291_v12 }
 0x131   : > { %v943_v20 = vpop.f32.mrb[24].mxu0  ;;  %v1119_v21 = vpop.f32.mrb[24].mxu1 }
 0x132   : > { %2336 = vst [vmem:[%s2760_s18 + $0x28] sm:$0xff] %v2150_v18   ;;  %v944_v22 = vadd.f32 %v2750_v38, %v943_v20  ;;  %v945_v23 = vpop.f32.mrb[25].mxu0  ;;  %2358 = vst [vmem:[%s2760_s18 + $0xd8] sm:$0xff] %v2260_v19   ;;  %v1120_v24 = vadd.f32 %v2750_v38, %v1119_v21  ;;  %v1121_v25 = vpop.f32.mrb[25].mxu1 }
 0x133   : > { %v946_v26 = vpop.f32.mrb[26].mxu0  ;;  %v1122_v27 = vpop.f32.mrb[26].mxu1 }
 0x134   : > { %v947_v28 = vadd.f32 %v2750_v38, %v946_v26  ;;  %v948_v29 = vpop.f32.mrb[27].mxu0  ;;  %v1293_v30 = vmax.f32 %v1120_v24, 0.0  ;;  %v1123_v31 = vadd.f32 %v2750_v38, %v1122_v27  ;;  %v1124_v32 = vpop.f32.mrb[27].mxu1  ;;  %v1249_v33 = vmax.f32 %v944_v22, 0.0 }
 0x136   : > { %v1250_v34 = vmax.f32 %v947_v28, 0.0  ;;  %v1294_v35 = vmax.f32 %v1123_v31, 0.0 }
 0x138   : > { %v2155_v36 = vpack.c.bf16 %v1250_v34, %v1249_v33  ;;  %v2265_v37 = vpack.c.bf16 %v1294_v35, %v1293_v30 }
 0x139   : > { %v951_v39 = vpop.f32.mrb[28].mxu0  ;;  %v1127_v40 = vpop.f32.mrb[28].mxu1 }
 0x13a   : > { %2337 = vst [vmem:[%s2760_s18 + $0x30] sm:$0xff] %v2155_v36   ;;  %v952_v41 = vadd.f32 %v2750_v38, %v951_v39  ;;  %v953_v42 = vpop.f32.mrb[29].mxu0  ;;  %2359 = vst [vmem:[%s2760_s18 + $0xe0] sm:$0xff] %v2265_v37   ;;  %v1128_v43 = vadd.f32 %v2750_v38, %v1127_v40  ;;  %v1129_v44 = vpop.f32.mrb[29].mxu1 }
 0x13b   : > { %v954_v45 = vpop.f32.mrb[30].mxu0  ;;  %v1130_v46 = vpop.f32.mrb[30].mxu1 }
 0x13c   : > { %v955_v47 = vadd.f32 %v2750_v38, %v954_v45  ;;  %v956_v48 = vpop.f32.mrb[31].mxu0  ;;  %v1295_v49 = vmax.f32 %v1128_v43, 0.0  ;;  %v1131_v50 = vadd.f32 %v2750_v38, %v1130_v46  ;;  %v1132_v51 = vpop.f32.mrb[31].mxu1  ;;  %v1251_v52 = vmax.f32 %v952_v41, 0.0 }
 0x13e   : > { %v1252_v53 = vmax.f32 %v955_v47, 0.0  ;;  %v1296_v54 = vmax.f32 %v1131_v50, 0.0 }
 0x140   : > { %v2160_v55 = vpack.c.bf16 %v1252_v53, %v1251_v52  ;;  %v2270_v56 = vpack.c.bf16 %v1296_v54, %v1295_v49 }
 0x141   : > { %v959_v57 = vpop.f32.mrb[32].mxu0  ;;  %v1135_v58 = vpop.f32.mrb[32].mxu1 }
 0x142   : > { %2338 = vst [vmem:[%s2760_s18 + $0x38] sm:$0xff] %v2160_v55   ;;  %v960_v59 = vadd.f32 %v2750_v38, %v959_v57  ;;  %v961_v60 = vpop.f32.mrb[33].mxu0  ;;  %2360 = vst [vmem:[%s2760_s18 + $0xe8] sm:$0xff] %v2270_v56   ;;  %v1136_v61 = vadd.f32 %v2750_v38, %v1135_v58  ;;  %v1137_v62 = vpop.f32.mrb[33].mxu1 }
 0x143   : > { %v962_v63 = vpop.f32.mrb[34].mxu0  ;;  %v1138_v0 = vpop.f32.mrb[34].mxu1 }
 0x144   : > { %v963_v1 = vadd.f32 %v2750_v38, %v962_v63  ;;  %v964_v2 = vpop.f32.mrb[35].mxu0  ;;  %v1297_v3 = vmax.f32 %v1136_v61, 0.0  ;;  %v1139_v4 = vadd.f32 %v2750_v38, %v1138_v0  ;;  %v1140_v5 = vpop.f32.mrb[35].mxu1  ;;  %v1253_v6 = vmax.f32 %v960_v59, 0.0 }
 0x146   : > { %v1254_v7 = vmax.f32 %v963_v1, 0.0  ;;  %v1298_v8 = vmax.f32 %v1139_v4, 0.0 }
 0x148   : > { %v2165_v9 = vpack.c.bf16 %v1254_v7, %v1253_v6  ;;  %v2275_v10 = vpack.c.bf16 %v1298_v8, %v1297_v3 }
 0x149   : > { %v967_v11 = vpop.f32.mrb[36].mxu0  ;;  %v1143_v12 = vpop.f32.mrb[36].mxu1 }
 0x14a   : > { %2339 = vst [vmem:[%s2760_s18 + $0x40] sm:$0xff] %v2165_v9   ;;  %v968_v13 = vadd.f32 %v2750_v38, %v967_v11  ;;  %v969_v14 = vpop.f32.mrb[37].mxu0  ;;  %2361 = vst [vmem:[%s2760_s18 + $0xf0] sm:$0xff] %v2275_v10   ;;  %v1144_v15 = vadd.f32 %v2750_v38, %v1143_v12  ;;  %v1145_v16 = vpop.f32.mrb[37].mxu1 }
 0x14b   : > { %v970_v17 = vpop.f32.mrb[38].mxu0  ;;  %v1146_v18 = vpop.f32.mrb[38].mxu1 }
 0x14c   : > { %v971_v19 = vadd.f32 %v2750_v38, %v970_v17  ;;  %v972_v20 = vpop.f32.mrb[39].mxu0  ;;  %v1299_v21 = vmax.f32 %v1144_v15, 0.0  ;;  %v1147_v22 = vadd.f32 %v2750_v38, %v1146_v18  ;;  %v1148_v23 = vpop.f32.mrb[39].mxu1  ;;  %v1255_v24 = vmax.f32 %v968_v13, 0.0 }
 0x14e   : > { %v1256_v25 = vmax.f32 %v971_v19, 0.0  ;;  %v1300_v26 = vmax.f32 %v1147_v22, 0.0 }
 0x150   : > { %v2170_v27 = vpack.c.bf16 %v1256_v25, %v1255_v24  ;;  %v2280_v28 = vpack.c.bf16 %v1300_v26, %v1299_v21 }
 0x151   : > { %v975_v29 = vpop.f32.mrb[40].mxu0  ;;  %v1151_v30 = vpop.f32.mrb[40].mxu1 }
 0x152   : > { %2340 = vst [vmem:[%s2760_s18 + $0x48] sm:$0xff] %v2170_v27   ;;  %v976_v31 = vadd.f32 %v2750_v38, %v975_v29  ;;  %v977_v32 = vpop.f32.mrb[41].mxu0  ;;  %2362 = vst [vmem:[%s2760_s18 + $0xf8] sm:$0xff] %v2280_v28   ;;  %v1152_v33 = vadd.f32 %v2750_v38, %v1151_v30  ;;  %v1153_v34 = vpop.f32.mrb[41].mxu1 }
 0x153   : > { %v978_v35 = vpop.f32.mrb[42].mxu0  ;;  %v1154_v36 = vpop.f32.mrb[42].mxu1 }
 0x154   : > { %v979_v37 = vadd.f32 %v2750_v38, %v978_v35  ;;  %v980_v39 = vpop.f32.mrb[43].mxu0  ;;  %v1301_v40 = vmax.f32 %v1152_v33, 0.0  ;;  %v1155_v41 = vadd.f32 %v2750_v38, %v1154_v36  ;;  %v1156_v42 = vpop.f32.mrb[43].mxu1  ;;  %v1257_v43 = vmax.f32 %v976_v31, 0.0 }
 0x156   : > { %v1258_v44 = vmax.f32 %v979_v37, 0.0  ;;  %v1302_v45 = vmax.f32 %v1155_v41, 0.0 }
 0x158   : > { %v2175_v46 = vpack.c.bf16 %v1258_v44, %v1257_v43  ;;  %v2285_v47 = vpack.c.bf16 %v1302_v45, %v1301_v40 }
 0x159   : > { %v983_v48 = vpop.f32.mrb[44].mxu0  ;;  %v1159_v49 = vpop.f32.mrb[44].mxu1 }
 0x15a   : > { %2341 = vst [vmem:[%s2760_s18 + $0x50] sm:$0xff] %v2175_v46   ;;  %v984_v50 = vadd.f32 %v2750_v38, %v983_v48  ;;  %v985_v51 = vpop.f32.mrb[45].mxu0  ;;  %2363 = vst [vmem:[%s2760_s18 + $0x100] sm:$0xff] %v2285_v47   ;;  %v1160_v52 = vadd.f32 %v2750_v38, %v1159_v49  ;;  %v1161_v53 = vpop.f32.mrb[45].mxu1 }
 0x15b   : > { %v986_v54 = vpop.f32.mrb[46].mxu0  ;;  %v1162_v55 = vpop.f32.mrb[46].mxu1 }
 0x15c   : > { %v987_v56 = vadd.f32 %v2750_v38, %v986_v54  ;;  %v988_v57 = vpop.f32.mrb[47].mxu0  ;;  %v1303_v58 = vmax.f32 %v1160_v52, 0.0  ;;  %v1163_v59 = vadd.f32 %v2750_v38, %v1162_v55  ;;  %v1164_v60 = vpop.f32.mrb[47].mxu1  ;;  %v1259_v61 = vmax.f32 %v984_v50, 0.0 }
 0x15e   : > { %v1260_v62 = vmax.f32 %v987_v56, 0.0  ;;  %v1304_v63 = vmax.f32 %v1163_v59, 0.0 }
 0x160   : > { %v2180_v0 = vpack.c.bf16 %v1260_v62, %v1259_v61  ;;  %v2290_v1 = vpack.c.bf16 %v1304_v63, %v1303_v58 }
 0x161   : > { %v991_v2 = vpop.f32.mrb[48].mxu0  ;;  %v1167_v3 = vpop.f32.mrb[48].mxu1 }
 0x162   : > { %2342 = vst [vmem:[%s2760_s18 + $0x58] sm:$0xff] %v2180_v0   ;;  %v992_v4 = vadd.f32 %v2750_v38, %v991_v2  ;;  %v993_v5 = vpop.f32.mrb[49].mxu0  ;;  %2364 = vst [vmem:[%s2760_s18 + $0x108] sm:$0xff] %v2290_v1   ;;  %v1168_v6 = vadd.f32 %v2750_v38, %v1167_v3  ;;  %v1169_v7 = vpop.f32.mrb[49].mxu1 }
 0x163   : > { %v994_v8 = vpop.f32.mrb[50].mxu0  ;;  %v1170_v9 = vpop.f32.mrb[50].mxu1 }
 0x164   : > { %v995_v10 = vadd.f32 %v2750_v38, %v994_v8  ;;  %v996_v11 = vpop.f32.mrb[51].mxu0  ;;  %v1305_v12 = vmax.f32 %v1168_v6, 0.0  ;;  %v1171_v13 = vadd.f32 %v2750_v38, %v1170_v9  ;;  %v1172_v14 = vpop.f32.mrb[51].mxu1  ;;  %v1261_v15 = vmax.f32 %v992_v4, 0.0 }
 0x166   : > { %v1262_v16 = vmax.f32 %v995_v10, 0.0  ;;  %v1306_v17 = vmax.f32 %v1171_v13, 0.0 }
 0x168   : > { %v2185_v18 = vpack.c.bf16 %v1262_v16, %v1261_v15  ;;  %v2295_v19 = vpack.c.bf16 %v1306_v17, %v1305_v12 }
 0x169   : > { %v999_v20 = vpop.f32.mrb[52].mxu0  ;;  %v1175_v21 = vpop.f32.mrb[52].mxu1 }
 0x16a   : > { %2343 = vst [vmem:[%s2760_s18 + $0x60] sm:$0xff] %v2185_v18   ;;  %v1000_v22 = vadd.f32 %v2750_v38, %v999_v20  ;;  %v1001_v23 = vpop.f32.mrb[53].mxu0  ;;  %2365 = vst [vmem:[%s2760_s18 + $0x110] sm:$0xff] %v2295_v19   ;;  %v1176_v24 = vadd.f32 %v2750_v38, %v1175_v21  ;;  %v1177_v25 = vpop.f32.mrb[53].mxu1 }
 0x16b   : > { %v1002_v26 = vpop.f32.mrb[54].mxu0  ;;  %v1178_v27 = vpop.f32.mrb[54].mxu1 }
 0x16c   : > { %v1003_v28 = vadd.f32 %v2750_v38, %v1002_v26  ;;  %v1004_v29 = vpop.f32.mrb[55].mxu0  ;;  %v1307_v30 = vmax.f32 %v1176_v24, 0.0  ;;  %v1179_v31 = vadd.f32 %v2750_v38, %v1178_v27  ;;  %v1180_v32 = vpop.f32.mrb[55].mxu1  ;;  %v1263_v33 = vmax.f32 %v1000_v22, 0.0 }
 0x16e   : > { %v1264_v34 = vmax.f32 %v1003_v28, 0.0  ;;  %v1308_v35 = vmax.f32 %v1179_v31, 0.0 }
 0x170   : > { %v2190_v36 = vpack.c.bf16 %v1264_v34, %v1263_v33  ;;  %v2300_v37 = vpack.c.bf16 %v1308_v35, %v1307_v30 }
 0x171   : > { %v1007_v39 = vpop.f32.mrb[56].mxu0  ;;  %v1183_v40 = vpop.f32.mrb[56].mxu1 }
 0x172   : > { %2344 = vst [vmem:[%s2760_s18 + $0x68] sm:$0xff] %v2190_v36   ;;  %v1008_v41 = vadd.f32 %v2750_v38, %v1007_v39  ;;  %v1009_v42 = vpop.f32.mrb[57].mxu0  ;;  %2366 = vst [vmem:[%s2760_s18 + $0x118] sm:$0xff] %v2300_v37   ;;  %v1184_v43 = vadd.f32 %v2750_v38, %v1183_v40  ;;  %v1185_v44 = vpop.f32.mrb[57].mxu1 }
 0x173   : > { %v1010_v45 = vpop.f32.mrb[58].mxu0  ;;  %v1186_v46 = vpop.f32.mrb[58].mxu1 }
 0x174   : > { %v1011_v47 = vadd.f32 %v2750_v38, %v1010_v45  ;;  %v1012_v48 = vpop.f32.mrb[59].mxu0  ;;  %v1309_v49 = vmax.f32 %v1184_v43, 0.0  ;;  %v1187_v50 = vadd.f32 %v2750_v38, %v1186_v46  ;;  %v1188_v51 = vpop.f32.mrb[59].mxu1  ;;  %v1265_v52 = vmax.f32 %v1008_v41, 0.0 }
 0x176   : > { %v1266_v53 = vmax.f32 %v1011_v47, 0.0  ;;  %v1310_v54 = vmax.f32 %v1187_v50, 0.0 }
 0x178   : > { %v2195_v55 = vpack.c.bf16 %v1266_v53, %v1265_v52  ;;  %v2305_v56 = vpack.c.bf16 %v1310_v54, %v1309_v49 }
 0x179   : > { %v1015_v57 = vpop.f32.mrb[60].mxu0  ;;  %v1191_v58 = vpop.f32.mrb[60].mxu1 }
 0x17a   : > { %2345 = vst [vmem:[%s2760_s18 + $0x70] sm:$0xff] %v2195_v55   ;;  %v1016_v59 = vadd.f32 %v2750_v38, %v1015_v57  ;;  %v1017_v60 = vpop.f32.mrb[61].mxu0  ;;  %2367 = vst [vmem:[%s2760_s18 + $0x120] sm:$0xff] %v2305_v56   ;;  %v1192_v61 = vadd.f32 %v2750_v38, %v1191_v58  ;;  %v1193_v62 = vpop.f32.mrb[61].mxu1 }
 0x17b   : > { %v1018_v63 = vpop.f32.mrb[62].mxu0  ;;  %v1194_v0 = vpop.f32.mrb[62].mxu1 }
 0x17c   : > { %v1019_v1 = vadd.f32 %v2750_v38, %v1018_v63  ;;  %v1020_v2 = vpop.f32.mrb[63].mxu0  ;;  %v1311_v3 = vmax.f32 %v1192_v61, 0.0  ;;  %v1195_v4 = vadd.f32 %v2750_v38, %v1194_v0  ;;  %v1196_v5 = vpop.f32.mrb[63].mxu1  ;;  %v1267_v6 = vmax.f32 %v1016_v59, 0.0 }
 0x17e   : > { %v1268_v7 = vmax.f32 %v1019_v1, 0.0  ;;  %v1312_v8 = vmax.f32 %v1195_v4, 0.0 }
 0x180   : > { %v2200_v9 = vpack.c.bf16 %v1268_v7, %v1267_v6  ;;  %v2310_v10 = vpack.c.bf16 %v1312_v8, %v1311_v3 }
 0x181   : > { %v1023_v11 = vpop.f32.mrb[64].mxu0  ;;  %v1199_v12 = vpop.f32.mrb[64].mxu1 }
 0x182   : > { %2346 = vst [vmem:[%s2760_s18 + $0x78] sm:$0xff] %v2200_v9   ;;  %v1024_v13 = vadd.f32 %v2750_v38, %v1023_v11  ;;  %v1025_v14 = vpop.f32.mrb[65].mxu0  ;;  %2368 = vst [vmem:[%s2760_s18 + $0x128] sm:$0xff] %v2310_v10   ;;  %v1200_v15 = vadd.f32 %v2750_v38, %v1199_v12  ;;  %v1201_v16 = vpop.f32.mrb[65].mxu1 }
 0x183   : > { %v1026_v17 = vpop.f32.mrb[66].mxu0  ;;  %v1202_v18 = vpop.f32.mrb[66].mxu1 }
 0x184   : > { %v1027_v19 = vadd.f32 %v2750_v38, %v1026_v17  ;;  %v1028_v20 = vpop.f32.mrb[67].mxu0  ;;  %v1313_v21 = vmax.f32 %v1200_v15, 0.0  ;;  %v1203_v22 = vadd.f32 %v2750_v38, %v1202_v18  ;;  %v1204_v23 = vpop.f32.mrb[67].mxu1  ;;  %v1269_v24 = vmax.f32 %v1024_v13, 0.0 }
 0x186   : > { %v1270_v25 = vmax.f32 %v1027_v19, 0.0  ;;  %v1314_v26 = vmax.f32 %v1203_v22, 0.0 }
 0x188   : > { %v2205_v27 = vpack.c.bf16 %v1270_v25, %v1269_v24  ;;  %v2315_v28 = vpack.c.bf16 %v1314_v26, %v1313_v21 }
 0x189   : > { %v1031_v29 = vpop.f32.mrb[68].mxu0  ;;  %v1207_v30 = vpop.f32.mrb[68].mxu1 }
 0x18a   : > { %2347 = vst [vmem:[%s2760_s18 + $0x80] sm:$0xff] %v2205_v27   ;;  %v1032_v31 = vadd.f32 %v2750_v38, %v1031_v29  ;;  %v1033_v32 = vpop.f32.mrb[69].mxu0  ;;  %2369 = vst [vmem:[%s2760_s18 + $0x130] sm:$0xff] %v2315_v28   ;;  %v1208_v33 = vadd.f32 %v2750_v38, %v1207_v30  ;;  %v1209_v34 = vpop.f32.mrb[69].mxu1 }
 0x18b   : > { %v1034_v35 = vpop.f32.mrb[70].mxu0  ;;  %v1210_v36 = vpop.f32.mrb[70].mxu1 }
 0x18c   : > { %v1035_v37 = vadd.f32 %v2750_v38, %v1034_v35  ;;  %v1036_v39 = vpop.f32.mrb[71].mxu0  ;;  %v1315_v40 = vmax.f32 %v1208_v33, 0.0  ;;  %v1211_v41 = vadd.f32 %v2750_v38, %v1210_v36  ;;  %v1212_v42 = vpop.f32.mrb[71].mxu1  ;;  %v1271_v43 = vmax.f32 %v1032_v31, 0.0 }
 0x18e   : > { %v1272_v44 = vmax.f32 %v1035_v37, 0.0  ;;  %v1316_v45 = vmax.f32 %v1211_v41, 0.0 }
 0x190   : > { %v2210_v46 = vpack.c.bf16 %v1272_v44, %v1271_v43  ;;  %v2320_v47 = vpack.c.bf16 %v1316_v45, %v1315_v40 }
 0x191   : > { %v1039_v48 = vpop.f32.mrb[72].mxu0  ;;  %v1215_v49 = vpop.f32.mrb[72].mxu1 }
 0x192   : > { %2348 = vst [vmem:[%s2760_s18 + $0x88] sm:$0xff] %v2210_v46   ;;  %v1040_v50 = vadd.f32 %v2750_v38, %v1039_v48  ;;  %v1041_v51 = vpop.f32.mrb[73].mxu0  ;;  %2370 = vst [vmem:[%s2760_s18 + $0x138] sm:$0xff] %v2320_v47   ;;  %v1216_v52 = vadd.f32 %v2750_v38, %v1215_v49  ;;  %v1217_v53 = vpop.f32.mrb[73].mxu1 }
 0x193   : > { %v1042_v54 = vpop.f32.mrb[74].mxu0  ;;  %v1218_v55 = vpop.f32.mrb[74].mxu1 }
 0x194   : > { %v1043_v56 = vadd.f32 %v2750_v38, %v1042_v54  ;;  %v1044_v57 = vpop.f32.mrb[75].mxu0  ;;  %v1317_v58 = vmax.f32 %v1216_v52, 0.0  ;;  %v1219_v59 = vadd.f32 %v2750_v38, %v1218_v55  ;;  %v1220_v60 = vpop.f32.mrb[75].mxu1  ;;  %v1273_v61 = vmax.f32 %v1040_v50, 0.0 }
 0x196   : > { %v1274_v62 = vmax.f32 %v1043_v56, 0.0  ;;  %v1318_v63 = vmax.f32 %v1219_v59, 0.0 }
 0x198   : > { %v2215_v0 = vpack.c.bf16 %v1274_v62, %v1273_v61  ;;  %v2325_v1 = vpack.c.bf16 %v1318_v63, %v1317_v58 }
 0x199   : > { %v1047_v2 = vpop.f32.mrb[76].mxu0  ;;  %v1223_v3 = vpop.f32.mrb[76].mxu1 }
 0x19a   : > { %2349 = vst [vmem:[%s2760_s18 + $0x90] sm:$0xff] %v2215_v0   ;;  %v1048_v4 = vadd.f32 %v2750_v38, %v1047_v2  ;;  %v1049_v5 = vpop.f32.mrb[77].mxu0  ;;  %2371 = vst [vmem:[%s2760_s18 + $0x140] sm:$0xff] %v2325_v1   ;;  %v1224_v6 = vadd.f32 %v2750_v38, %v1223_v3  ;;  %v1225_v7 = vpop.f32.mrb[77].mxu1 }
 0x19b   : > { %v1050_v8 = vpop.f32.mrb[78].mxu0  ;;  %v1226_v9 = vpop.f32.mrb[78].mxu1 }
 0x19c   : > { %v1051_v10 = vadd.f32 %v2750_v38, %v1050_v8  ;;  %v1052_v11 = vpop.f32.mrb[79].mxu0  ;;  %v1319_v12 = vmax.f32 %v1224_v6, 0.0  ;;  %v1227_v13 = vadd.f32 %v2750_v38, %v1226_v9  ;;  %v1228_v14 = vpop.f32.mrb[79].mxu1  ;;  %v1275_v15 = vmax.f32 %v1048_v4, 0.0 }
 0x19e   : > { %v1276_v16 = vmax.f32 %v1051_v10, 0.0  ;;  %v1320_v17 = vmax.f32 %v1227_v13, 0.0 }
 0x1a0   : > { %v2220_v18 = vpack.c.bf16 %v1276_v16, %v1275_v15  ;;  %v2330_v19 = vpack.c.bf16 %v1320_v17, %v1319_v12 }
 0x1a1   : > { %v1055_v20 = vpop.f32.mrb[80].mxu0  ;;  %v1231_v21 = vpop.f32.mrb[80].mxu1 }
 0x1a2   : > { %2350 = vst [vmem:[%s2760_s18 + $0x98] sm:$0xff] %v2220_v18   ;;  %v1056_v22 = vadd.f32 %v2750_v38, %v1055_v20  ;;  %v1057_v23 = vpop.f32.mrb[81].mxu0  ;;  %2372 = vst [vmem:[%s2760_s18 + $0x148] sm:$0xff] %v2330_v19   ;;  %v1232_v24 = vadd.f32 %v2750_v38, %v1231_v21  ;;  %v1233_v25 = vpop.f32.mrb[81].mxu1 }
 0x1a3   : > { %v1058_v26 = vpop.f32.mrb[82].mxu0  ;;  %v1234_v27 = vpop.f32.mrb[82].mxu1 }
 0x1a4   : > { %v1059_v28 = vadd.f32 %v2750_v38, %v1058_v26  ;;  %v1060_v29 = vpop.f32.mrb[83].mxu0  ;;  %v1321_v30 = vmax.f32 %v1232_v24, 0.0  ;;  %v1235_v31 = vpop.f32.mrb[83].mxu1  ;;  %v1277_v32 = vmax.f32 %v1056_v22, 0.0 }
 0x1a6   : > { %v1278_v33 = vmax.f32 %v1059_v28, 0.0  ;;  %v2121_v34 = vpack.c.bf16 %v1321_v30, %v1321_v30 }
 0x1a8   : > { %v2225_v35 = vpack.c.bf16 %v1278_v33, %v1277_v32  ;;  %1747 = vst [vmem:[%s2760_s18 + $0x150] sm:$0x3] %v2121_v34 }
 0x1a9   : > { %v1063_v36 = vpop.f32.mrb[84].mxu0 }
 0x1aa   : > { %2351 = vst [vmem:[%s2760_s18 + $0xa0] sm:$0xff] %v2225_v35   ;;  %v1064_v37 = vadd.f32 %v2750_v38, %v1063_v36  ;;  %v1065_v39 = vpop.f32.mrb[85].mxu0 }
 0x1ab   : > { %v1066_v40 = vpop.f32.mrb[86].mxu0 }
 0x1ac   : > { %v1067_v41 = vadd.f32 %v2750_v38, %v1066_v40  ;;  %v1068_v42 = vpop.f32.mrb[87].mxu0  ;;  %v1279_v43 = vmax.f32 %v1064_v37, 0.0 }
 0x1ae   : > { %v1280_v44 = vmax.f32 %v1067_v41, 0.0 }
 0x1b0   : > { %v2230_v45 = vpack.c.bf16 %v1280_v44, %v1279_v43 }
 0x1b2   : > { %2352 = vst [vmem:[%s2760_s18 + $0xa8] sm:$0xff] %v2230_v45  }
 0x1b3 PF: > { %s13_s12 = sadd.s32 1, %s2549_s12  }
 0x1b4   : > { %p10_p4 = scmp.ge.s32.totalorder %s13_s12, 4  }
 0x1b6   :  { %12 = sbr.rel (!%p10_p4) target bundleno = 1 (0x1), region = 62 }

// kernel: base_model_forward.4
= control target key start
LH: loop header
LB: loop body
LE: loop exit
PB: predicated region body
PF: predicated region fallthrough
CT: control target
= control target key end

     0   :  { %s2602_s12 = smov 0   ;;  %s3180_s0 = inlined_call_operand.vmem [shape: bf16[2,576,288], index: 0, kind: input, shape index: {}]   ;;  %s3181_s1 = inlined_call_operand.vmem [shape: bf16[288,128], index: 1, kind: input, shape index: {}]   ;;  %s3182_s2 = inlined_call_operand.vmem [shape: f32[1,128], index: 2, kind: input, shape index: {}]   ;;  %s3183_s3 = inlined_call_operand.vmem [shape: bf16[2,144,128], index: 3, kind: output, shape index: {}]  }
   0x1 LB: > { %s1993_s13 = sadd.s32 4294967295, %s2579_s12   ;;  %p1997_p0 = scmp.ge.s32.totalorder %s2579_s12, 1  ;;  %s2579_s12 = sphi %s2602_s12, %s13_s12  }
   0x2   : > { %p137_p1 = scmp.lt.s32.totalorder %s2579_s12, 3 }
   0x4   : > { %p138_p2 = pnand %p1997_p0, %p137_p1 }
   0x6   : > { %141 = sbr.rel (%p138_p2) target bundleno = 514 (0x202), region = 32 }
   0xd   : > { %v2411_v0 = vld [vmem:[%s3181_s1] sm:$0xff]   ;;  %v2581_v1 = vmov 0   ;;  %v2412_v2 = vld [vmem:[%s3181_s1 + $0x8] sm:$0xff]   ;;  %p161_p3 = scmp.lt.s32.totalorder %s1993_s13, 1  ;;  %v2413_v3 = vld [vmem:[%s3181_s1 + $0x10] sm:$0xff]   ;;  %vm1000_vm0 = vcmask 261120  }
   0xe   : > { %1109 = vmatprep.subr.bf16.mxu0 %v2581_v1  ;;  %2368 = vmatprep.subr.bf16.mxu1 %v2581_v1  ;;  %v2414_v4 = vld [vmem:[%s3181_s1 + $0x18] sm:$0xff]   ;;  %v2415_v5 = vld [vmem:[%s3181_s1 + $0x20] sm:$0xff]   ;;  %v2416_v7 = vld [vmem:[%s3181_s1 + $0x28] sm:$0xff]  }
   0xf   : > { %1110 = vmatpush1.bf16.msra.mxu0 %v2411_v0  ;;  %2384 = vmatpush1.bf16.msra.mxu1 %v2411_v0  ;;  %s3260_s13 = smov (!%p161_p3, %s1993_s13), 1  ;;  %v2417_v9 = vld [vmem:[%s3181_s1 + $0x30] sm:$0xff]   ;;  %v2418_v10 = vld [vmem:[%s3181_s1 + $0x38] sm:$0xff]   ;;  %v2419_v11 = vld [vmem:[%s3181_s1 + $0x40] sm:$0xff]  }
  0x10   : > { %1111 = vmatprep.subr.bf16.mxu0 %v2581_v1  ;;  %2369 = vmatprep.subr.bf16.mxu1 %v2581_v1  ;;  %s2400_s22 = smul.u32 864, %s3260_s13  ;;  %v2420_v12 = vld [vmem:[%s3181_s1 + $0x48] sm:$0xff]   ;;  %v2421_v13 = vld [vmem:[%s3181_s1 + $0x50] sm:$0xff]   ;;  %v2422_v14 = vld [vmem:[%s3181_s1 + $0x58] sm:$0xff]  }
  0x11   : > { %v2423_v15 = vld [vmem:[%s3181_s1 + $0x60] sm:$0xff]   ;;  %v2424_v16 = vld [vmem:[%s3181_s1 + $0x68] sm:$0xff]   ;;  %v2425_v17 = vld [vmem:[%s3181_s1 + $0x70] sm:$0xff]   ;;  %s2401_s4 = smul.u32 72, %s3260_s13 }
  0x12   : > { %s2639_s27 = scalar_lea.vmem %s3180_s0, %s2400_s22  ;;  %v2426_v18 = vld [vmem:[%s3181_s1 + $0x78] sm:$0xff]   ;;  %v2433_v19 = vld [vmem:[%s3181_s1 + $0x80] sm:$0xff]   ;;  %v2458_v24 = vld [vmem:[%s3181_s1 + $0x88] sm:$0xff]  }
  0x13   : > { %1112 = vmatpush1.bf16.msra.mxu0 %v2412_v2  ;;  %2385 = vmatpush1.bf16.msra.mxu1 %v2412_v2  ;;  %v2429_v6 = vld [vmem:[%s2639_s27 + $0x4] ss:$12 sps:$4 sm:$0xff]   ;;  %v2432_v8 = vld [vmem:[%s2639_s27 + $0x28c] ss:$12 sps:$4 sm:$0xff]   ;;  %v2430_v21 = vld [vmem:[%s2639_s27 + $0x288] ss:$12 sps:$4 sm:$0xff]   ;;  %s3076_s6 = scalar_lea.vmem %s3183_s3, %s2401_s4 }
  0x14   : > { %1113 = vmatprep.subr.bf16.mxu0 %v2581_v1  ;;  %2370 = vmatprep.subr.bf16.mxu1 %v2581_v1  ;;  %v2427_v20 = vld [vmem:[%s2639_s27] ss:$12 sps:$4 sm:$0xff]   ;;  %v2434_v22 = vld [vmem:[%s2639_s27 + $0x1c] ss:$12 sps:$4 sm:$0xff]   ;;  %v2436_v23 = vld [vmem:[%s2639_s27 + $0x2a4] ss:$12 sps:$4 sm:$0xff]  }
  0x15   : > { %1141 = vmatprep.mubr.bf16.mxu0 %v2429_v6  ;;  %1357 = vmatprep.mubr.bf16.mxu1 %v2432_v8  ;;  %v2438_v25 = vld [vmem:[%s2639_s27 + $0x18] ss:$12 sps:$4 sm:$0xff]   ;;  %v2439_v26 = vld [vmem:[%s2639_s27 + $0x2a0] ss:$12 sps:$4 sm:$0xff]   ;;  %v2442_v28 = vld [vmem:[%s2639_s27 + $0x2bc] ss:$12 sps:$4 sm:$0xff]  }
  0x16   : > { %v2440_v27 = vld [vmem:[%s2639_s27 + $0x34] ss:$12 sps:$4 sm:$0xff]   ;;  %v2444_v29 = vld [vmem:[%s2639_s27 + $0x30] ss:$12 sps:$4 sm:$0xff]   ;;  %v2445_v30 = vld [vmem:[%s2639_s27 + $0x2b8] ss:$12 sps:$4 sm:$0xff]  }
  0x17   : > { %1114 = vmatpush1.bf16.msra.mxu0 %v2413_v3  ;;  %2386 = vmatpush1.bf16.msra.mxu1 %v2413_v3  ;;  %v2446_v31 = vld [vmem:[%s2639_s27 + $0x4c] ss:$12 sps:$4 sm:$0xff]   ;;  %v2448_v32 = vld [vmem:[%s2639_s27 + $0x2d4] ss:$12 sps:$4 sm:$0xff]   ;;  %v2451_v34 = vld [vmem:[%s2639_s27 + $0x2d0] ss:$12 sps:$4 sm:$0xff]  }
  0x18   : > { %1115 = vmatprep.subr.bf16.mxu0 %v2581_v1  ;;  %2371 = vmatprep.subr.bf16.mxu1 %v2581_v1  ;;  %v2450_v33 = vld [vmem:[%s2639_s27 + $0x48] ss:$12 sps:$4 sm:$0xff]   ;;  %v2452_v35 = vld [vmem:[%s2639_s27 + $0x64] ss:$12 sps:$4 sm:$0xff]   ;;  %v2454_v36 = vld [vmem:[%s2639_s27 + $0x2ec] ss:$12 sps:$4 sm:$0xff]  }
  0x19   : > { %v2456_v37 = vld [vmem:[%s2639_s27 + $0x60] ss:$12 sps:$4 sm:$0xff]   ;;  %v2457_v38 = vld [vmem:[%s2639_s27 + $0x2e8] ss:$12 sps:$4 sm:$0xff]   ;;  %v2461_v40 = vld [vmem:[%s2639_s27 + $0x304] ss:$12 sps:$4 sm:$0xff]  }
  0x1a   : > { %v2459_v39 = vld [vmem:[%s2639_s27 + $0x7c] ss:$12 sps:$4 sm:$0xff]   ;;  %v2463_v41 = vld [vmem:[%s2639_s27 + $0x78] ss:$12 sps:$4 sm:$0xff]   ;;  %v2464_v42 = vld [vmem:[%s2639_s27 + $0x300] ss:$12 sps:$4 sm:$0xff]  }
  0x1b   : > { %1116 = vmatpush1.bf16.msra.mxu0 %v2414_v4  ;;  %2387 = vmatpush1.bf16.msra.mxu1 %v2414_v4  ;;  %v2465_v43 = vld [vmem:[%s2639_s27 + $0x94] ss:$12 sps:$4 sm:$0xff]   ;;  %v2467_v44 = vld [vmem:[%s2639_s27 + $0x31c] ss:$12 sps:$4 sm:$0xff]   ;;  %v2470_v46 = vld [vmem:[%s2639_s27 + $0x318] ss:$12 sps:$4 sm:$0xff]  }
  0x1c   : > { %1117 = vmatprep.subr.bf16.mxu0 %v2581_v1  ;;  %2372 = vmatprep.subr.bf16.mxu1 %v2581_v1  ;;  %v2469_v45 = vld [vmem:[%s2639_s27 + $0x90] ss:$12 sps:$4 sm:$0xff]   ;;  %v2471_v47 = vld [vmem:[%s2639_s27 + $0xac] ss:$12 sps:$4 sm:$0xff]   ;;  %v2473_v48 = vld [vmem:[%s2639_s27 + $0x334] ss:$12 sps:$4 sm:$0xff]  }
  0x1d   : > { %v2475_v49 = vld [vmem:[%s2639_s27 + $0xa8] ss:$12 sps:$4 sm:$0xff]   ;;  %v2476_v50 = vld [vmem:[%s2639_s27 + $0x330] ss:$12 sps:$4 sm:$0xff]   ;;  %v2479_v52 = vld [vmem:[%s2639_s27 + $0x34c] ss:$12 sps:$4 sm:$0xff]  }
  0x1e   : > { %v2477_v51 = vld [vmem:[%s2639_s27 + $0xc4] ss:$12 sps:$4 sm:$0xff]   ;;  %v2481_v53 = vld [vmem:[%s2639_s27 + $0xc0] ss:$12 sps:$4 sm:$0xff]   ;;  %v2482_v54 = vld [vmem:[%s2639_s27 + $0x348] ss:$12 sps:$4 sm:$0xff]  }
  0x1f   : > { %1118 = vmatpush1.bf16.msra.mxu0 %v2415_v5  ;;  %2388 = vmatpush1.bf16.msra.mxu1 %v2415_v5  ;;  %v2483_v55 = vld [vmem:[%s2639_s27 + $0xdc] ss:$12 sps:$4 sm:$0xff]   ;;  %v2486_v57 = vld [vmem:[%s2639_s27 + $0xd8] ss:$12 sps:$4 sm:$0xff]   ;;  %v2487_v58 = vld [vmem:[%s2639_s27 + $0x20] ss:$12 sps:$4 sm:$0xff]  }
  0x20   : > { %1119 = vmatprep.subr.bf16.mxu0 %v2581_v1  ;;  %2373 = vmatprep.subr.bf16.mxu1 %v2581_v1  ;;  %v2485_v56 = vld [vmem:[%s2639_s27 + $0x8] ss:$12 sps:$4 sm:$0xff]   ;;  %v2490_v60 = vld [vmem:[%s2639_s27 + $0x38] ss:$12 sps:$4 sm:$0xff]   ;;  %v2491_v61 = vld [vmem:[%s2639_s27 + $0xf0] ss:$12 sps:$4 sm:$0xff]  }
  0x21   : > { %v2488_v59 = vld [vmem:[%s2639_s27 + $0xf4] ss:$12 sps:$4 sm:$0xff]   ;;  %v2492_v62 = vld [vmem:[%s2639_s27 + $0x50] ss:$12 sps:$4 sm:$0xff]   ;;  %v2493_v63 = vld [vmem:[%s2639_s27 + $0x10c] ss:$12 sps:$4 sm:$0xff]  }
  0x22   : > { %v2495_v0 = vld [vmem:[%s2639_s27 + $0x68] ss:$12 sps:$4 sm:$0xff]   ;;  %v2497_v2 = vld [vmem:[%s2639_s27 + $0x80] ss:$12 sps:$4 sm:$0xff]   ;;  %v2498_v3 = vld [vmem:[%s2639_s27 + $0x124] ss:$12 sps:$4 sm:$0xff]  }
  0x23   : > { %1120 = vmatpush1.bf16.msra.mxu0 %v2416_v7  ;;  %2389 = vmatpush1.bf16.msra.mxu1 %v2416_v7  ;;  %v2500_v4 = vld [vmem:[%s2639_s27 + $0x98] ss:$12 sps:$4 sm:$0xff]   ;;  %v2501_v5 = vld [vmem:[%s2639_s27 + $0x120] ss:$12 sps:$4 sm:$0xff]   ;;  %v2502_v6 = vld [vmem:[%s2639_s27 + $0xb0] ss:$12 sps:$4 sm:$0xff]  }
  0x24   : > { %1121 = vmatprep.subr.bf16.mxu0 %v2581_v1  ;;  %2374 = vmatprep.subr.bf16.mxu1 %v2581_v1  ;;  %v2503_v7 = vld [vmem:[%s2639_s27 + $0x13c] ss:$12 sps:$4 sm:$0xff]  }
  0x25   : > { %v2505_v8 = vld [vmem:[%s2639_s27 + $0xc8] ss:$12 sps:$4 sm:$0xff]  }
  0x27   : > { %1122 = vmatpush1.bf16.msra.mxu0 %v2417_v9  ;;  %2390 = vmatpush1.bf16.msra.mxu1 %v2417_v9  ;;  %v2506_v9 = vld [vmem:[%s2639_s27 + $0x138] ss:$12 sps:$4 sm:$0xff]  }
  0x28   : > { %1123 = vmatprep.subr.bf16.mxu0 %v2581_v1  ;;  %2375 = vmatprep.subr.bf16.mxu1 %v2581_v1 }
  0x2b   : > { %1124 = vmatpush1.bf16.msra.mxu0 %v2418_v10  ;;  %2391 = vmatpush1.bf16.msra.mxu1 %v2418_v10  ;;  %v2507_v10 = vld [vmem:[%s2639_s27 + $0xe0] ss:$12 sps:$4 sm:$0xff]  }
  0x2c   : > { %1125 = vmatprep.subr.bf16.mxu0 %v2581_v1  ;;  %2376 = vmatprep.subr.bf16.mxu1 %v2581_v1 }
  0x2f   : > { %1126 = vmatpush1.bf16.msra.mxu0 %v2419_v11  ;;  %2392 = vmatpush1.bf16.msra.mxu1 %v2419_v11  ;;  %v2508_v11 = vld [vmem:[%s2639_s27 + $0x154] ss:$12 sps:$4 sm:$0xff]  }
  0x30   : > { %1127 = vmatprep.subr.bf16.mxu0 %v2581_v1  ;;  %2377 = vmatprep.subr.bf16.mxu1 %v2581_v1 }
  0x33   : > { %1128 = vmatpush1.bf16.msra.mxu0 %v2420_v12  ;;  %2393 = vmatpush1.bf16.msra.mxu1 %v2420_v12  ;;  %v2510_v12 = vld [vmem:[%s2639_s27 + $0xf8] ss:$12 sps:$4 sm:$0xff]  }
  0x34   : > { %1129 = vmatprep.subr.bf16.mxu0 %v2581_v1  ;;  %2378 = vmatprep.subr.bf16.mxu1 %v2581_v1 }
  0x37   : > { %1130 = vmatpush1.bf16.msra.mxu0 %v2421_v13  ;;  %2394 = vmatpush1.bf16.msra.mxu1 %v2421_v13  ;;  %v2511_v13 = vld [vmem:[%s2639_s27 + $0x150] ss:$12 sps:$4 sm:$0xff]  }
  0x38   : > { %1131 = vmatprep.subr.bf16.mxu0 %v2581_v1  ;;  %2379 = vmatprep.subr.bf16.mxu1 %v2581_v1 }
  0x3b   : > { %1132 = vmatpush1.bf16.msra.mxu0 %v2422_v14  ;;  %2395 = vmatpush1.bf16.msra.mxu1 %v2422_v14  ;;  %v2512_v14 = vld [vmem:[%s2639_s27 + $0x110] ss:$12 sps:$4 sm:$0xff]  }
  0x3c   : > { %1133 = vmatprep.subr.bf16.mxu0 %v2581_v1  ;;  %2380 = vmatprep.subr.bf16.mxu1 %v2581_v1 }
  0x3f   : > { %1134 = vmatpush1.bf16.msra.mxu0 %v2423_v15  ;;  %2396 = vmatpush1.bf16.msra.mxu1 %v2423_v15  ;;  %v2513_v15 = vld [vmem:[%s2639_s27 + $0x16c] ss:$12 sps:$4 sm:$0xff]  }
  0x40   : > { %1135 = vmatprep.subr.bf16.mxu0 %v2581_v1  ;;  %2381 = vmatprep.subr.bf16.mxu1 %v2581_v1 }
  0x43   : > { %1136 = vmatpush1.bf16.msra.mxu0 %v2424_v16  ;;  %2397 = vmatpush1.bf16.msra.mxu1 %v2424_v16  ;;  %v2515_v16 = vld [vmem:[%s2639_s27 + $0x128] ss:$12 sps:$4 sm:$0xff]  }
  0x44   : > { %1137 = vmatprep.subr.bf16.mxu0 %v2581_v1  ;;  %2382 = vmatprep.subr.bf16.mxu1 %v2581_v1 }
  0x47   : > { %1138 = vmatpush1.bf16.msra.mxu0 %v2425_v17  ;;  %2398 = vmatpush1.bf16.msra.mxu1 %v2425_v17  ;;  %v2516_v17 = vld [vmem:[%s2639_s27 + $0x168] ss:$12 sps:$4 sm:$0xff]  }
  0x48   : > { %1139 = vmatprep.subr.bf16.mxu0 %v2581_v1  ;;  %2383 = vmatprep.subr.bf16.mxu1 %v2581_v1  ;;  %v2496_v1 = vld [vmem:[%s2639_s27 + $0x108] ss:$12 sps:$4 sm:$0xff]  }
  0x4b   : > { %1140 = vmatpush1.bf16.msra.mxu0 %v2426_v18  ;;  %2399 = vmatpush1.bf16.msra.mxu1 %v2426_v18  ;;  %v2517_v18 = vld [vmem:[%s2639_s27 + $0x140] ss:$12 sps:$4 sm:$0xff]  }
  0x4c   : > { %2292 = vmatprep.subr.bf16.mxu1 %v2433_v19 }
  0x4e   : > { %1142 = vmatmul.mubr.bf16.vlgmr.msra.gmra.mrb[0].mxu0 %v2427_v20  ;;  %1358 = vmatmul.mubr.bf16.vlgmr.msra.gmra.mrb[0].mxu1 %v2430_v21  ;;  %v2520_v20 = vld [vmem:[%s2639_s27 + $0x158] ss:$12 sps:$4 sm:$0xff]   ;;  %v2521_v21 = vld [vmem:[%s2639_s27 + $0x180] ss:$12 sps:$4 sm:$0xff]  }
  0x4f   : > { %2293 = vmatpush3.bf16.msra.mxu1 %v2433_v19  ;;  %1149 = vmatprep.mubr.bf16.mxu0 %v2434_v22  ;;  %v2518_v19 = vld [vmem:[%s2639_s27 + $0x184] ss:$12 sps:$4 sm:$0xff]  }
  0x50   : > { %1365 = vmatprep.mubr.bf16.mxu1 %v2436_v23  ;;  %2294 = vmatprep.subr.bf16.mxu1 %v2458_v24  ;;  %v2522_v22 = vld [vmem:[%s2639_s27 + $0x170] ss:$12 sps:$4 sm:$0xff]  }
  0x51   : > { %v2523_v23 = vld [vmem:[%s2639_s27 + $0x19c] ss:$12 sps:$4 sm:$0xff]  }
  0x53   : > { %2295 = vmatpush3.bf16.msra.mxu1 %v2458_v24  ;;  %v2525_v24 = vld [vmem:[%s2639_s27 + $0x188] ss:$12 sps:$4 sm:$0xff]  }
  0x56   : > { %1150 = vmatmul.mubr.bf16.gmra.mrb[4].mxu0 %v2438_v25  ;;  %1366 = vmatmul.mubr.bf16.gmra.mrb[4].mxu1 %v2439_v26  ;;  %v2526_v25 = vld [vmem:[%s2639_s27 + $0x198] ss:$12 sps:$4 sm:$0xff]   ;;  %v2527_v26 = vld [vmem:[%s2639_s27 + $0x1a0] ss:$12 sps:$4 sm:$0xff]  }
  0x57   : > { %1157 = vmatprep.mubr.bf16.mxu0 %v2440_v27  ;;  %1373 = vmatprep.mubr.bf16.mxu1 %v2442_v28  ;;  %v2528_v27 = vld [vmem:[%s2639_s27 + $0x1b4] ss:$12 sps:$4 sm:$0xff]   ;;  %v2530_v28 = vld [vmem:[%s2639_s27 + $0x1b8] ss:$12 sps:$4 sm:$0xff]  }
  0x5e   : > { %1158 = vmatmul.mubr.bf16.gmra.mrb[8].mxu0 %v2444_v29  ;;  %1374 = vmatmul.mubr.bf16.gmra.mrb[8].mxu1 %v2445_v30  ;;  %v2531_v29 = vld [vmem:[%s2639_s27 + $0x1b0] ss:$12 sps:$4 sm:$0xff]  }
  0x5f   : > { %1165 = vmatprep.mubr.bf16.mxu0 %v2446_v31  ;;  %1381 = vmatprep.mubr.bf16.mxu1 %v2448_v32  ;;  %v2532_v30 = vld [vmem:[%s2639_s27 + $0x1d0] ss:$12 sps:$4 sm:$0xff]   ;;  %v2533_v31 = vld [vmem:[%s2639_s27 + $0x1cc] ss:$12 sps:$4 sm:$0xff]   ;;  %v2535_v32 = vld [vmem:[%s2639_s27 + $0x1e8] ss:$12 sps:$4 sm:$0xff]  }
  0x66   : > { %1166 = vmatmul.mubr.bf16.gmra.mrb[12].mxu0 %v2450_v33  ;;  %1382 = vmatmul.mubr.bf16.gmra.mrb[12].mxu1 %v2451_v34  ;;  %v2536_v33 = vld [vmem:[%s2639_s27 + $0x1c8] ss:$12 sps:$4 sm:$0xff]   ;;  %v2537_v34 = vld [vmem:[%s2639_s27 + $0x200] ss:$12 sps:$4 sm:$0xff]  }
  0x67   : > { %1173 = vmatprep.mubr.bf16.mxu0 %v2452_v35  ;;  %1389 = vmatprep.mubr.bf16.mxu1 %v2454_v36  ;;  %v2538_v35 = vld [vmem:[%s2639_s27 + $0x1e4] ss:$12 sps:$4 sm:$0xff]  }
  0x68   : > { %v2540_v36 = vld [vmem:[%s2639_s27 + $0x218] ss:$12 sps:$4 sm:$0xff]  }
  0x6e   : > { %1174 = vmatmul.mubr.bf16.gmra.mrb[16].mxu0 %v2456_v37  ;;  %1390 = vmatmul.mubr.bf16.gmra.mrb[16].mxu1 %v2457_v38  ;;  %v2541_v37 = vld [vmem:[%s2639_s27 + $0x1e0] ss:$12 sps:$4 sm:$0xff]   ;;  %v2542_v38 = vld [vmem:[%s2639_s27 + $0x230] ss:$12 sps:$4 sm:$0xff]  }
  0x6f   : > { %1181 = vmatprep.mubr.bf16.mxu0 %v2459_v39  ;;  %1397 = vmatprep.mubr.bf16.mxu1 %v2461_v40  ;;  %v2543_v39 = vld [vmem:[%s2639_s27 + $0x1fc] ss:$12 sps:$4 sm:$0xff]  }
  0x70   : > { %v2545_v40 = vld [vmem:[%s2639_s27 + $0x248] ss:$12 sps:$4 sm:$0xff]  }
  0x76   : > { %1182 = vmatmul.mubr.bf16.gmra.mrb[20].mxu0 %v2463_v41  ;;  %1398 = vmatmul.mubr.bf16.gmra.mrb[20].mxu1 %v2464_v42  ;;  %v2546_v41 = vld [vmem:[%s2639_s27 + $0x1f8] ss:$12 sps:$4 sm:$0xff]   ;;  %v2547_v42 = vld [vmem:[%s2639_s27 + $0x260] ss:$12 sps:$4 sm:$0xff]  }
  0x77   : > { %1189 = vmatprep.mubr.bf16.mxu0 %v2465_v43  ;;  %1405 = vmatprep.mubr.bf16.mxu1 %v2467_v44  ;;  %v2548_v43 = vld [vmem:[%s2639_s27 + $0x214] ss:$12 sps:$4 sm:$0xff]   ;;  %v2550_v44 = vld [vmem:[%s2639_s27 + $0x278] ss:$12 sps:$4 sm:$0xff]  }
  0x7e   : > { %1190 = vmatmul.mubr.bf16.gmra.mrb[24].mxu0 %v2469_v45  ;;  %1406 = vmatmul.mubr.bf16.gmra.mrb[24].mxu1 %v2470_v46  ;;  %v2551_v45 = vld [vmem:[%s2639_s27 + $0x210] ss:$12 sps:$4 sm:$0xff]  }
  0x7f   : > { %1197 = vmatprep.mubr.bf16.mxu0 %v2471_v47  ;;  %1413 = vmatprep.mubr.bf16.mxu1 %v2473_v48  ;;  %v2552_v46 = vld [vmem:[%s2639_s27 + $0x290] ss:$12 sps:$4 sm:$0xff]   ;;  %v2553_v47 = vld [vmem:[%s2639_s27 + $0x22c] ss:$12 sps:$4 sm:$0xff]   ;;  %v2555_v48 = vld [vmem:[%s2639_s27 + $0x2a8] ss:$12 sps:$4 sm:$0xff]  }
  0x86   : > { %1198 = vmatmul.mubr.bf16.gmra.mrb[28].mxu0 %v2475_v49  ;;  %1414 = vmatmul.mubr.bf16.gmra.mrb[28].mxu1 %v2476_v50  ;;  %v2556_v49 = vld [vmem:[%s2639_s27 + $0x228] ss:$12 sps:$4 sm:$0xff]   ;;  %v2557_v50 = vld [vmem:[%s2639_s27 + $0x2c0] ss:$12 sps:$4 sm:$0xff]  }
  0x87   : > { %1205 = vmatprep.mubr.bf16.mxu0 %v2477_v51  ;;  %1421 = vmatprep.mubr.bf16.mxu1 %v2479_v52  ;;  %v2558_v51 = vld [vmem:[%s2639_s27 + $0x244] ss:$12 sps:$4 sm:$0xff]  }
  0x88   : > { %v2560_v52 = vld [vmem:[%s2639_s27 + $0x2d8] ss:$12 sps:$4 sm:$0xff]  }
  0x8e   : > { %1206 = vmatmul.mubr.bf16.gmra.mrb[32].mxu0 %v2481_v53  ;;  %1422 = vmatmul.mubr.bf16.gmra.mrb[32].mxu1 %v2482_v54  ;;  %v2561_v53 = vld [vmem:[%s2639_s27 + $0x240] ss:$12 sps:$4 sm:$0xff]   ;;  %v2562_v54 = vld [vmem:[%s2639_s27 + $0x2f0] ss:$12 sps:$4 sm:$0xff]  }
  0x8f   : > { %1213 = vmatprep.mubr.bf16.mxu0 %v2483_v55  ;;  %2296 = vmatprep.mubr.msk.bf16.mxu1 %vm1000_vm0, %v2485_v56  ;;  %v2563_v55 = vld [vmem:[%s2639_s27 + $0x25c] ss:$12 sps:$4 sm:$0xff]  }
  0x90   : > { %v2565_v56 = vld [vmem:[%s2639_s27 + $0x308] ss:$12 sps:$4 sm:$0xff]  }
  0x96   : > { %1214 = vmatmul.mubr.bf16.gmra.mrb[36].mxu0 %v2486_v57  ;;  %2297 = vmatmul.mubr.msk.bf16.vlgmr.msra.gmra.mrb[36].mxu1 %vm1000_vm0, %v2487_v58  ;;  %v2566_v57 = vld [vmem:[%s2639_s27 + $0x258] ss:$12 sps:$4 sm:$0xff]   ;;  %v2567_v58 = vld [vmem:[%s2639_s27 + $0x320] ss:$12 sps:$4 sm:$0xff]  }
  0x97   : > { %1221 = vmatprep.mubr.bf16.mxu0 %v2488_v59  ;;  %2300 = vmatprep.mubr.msk.bf16.mxu1 %vm1000_vm0, %v2490_v60  ;;  %v2568_v59 = vld [vmem:[%s2639_s27 + $0x274] ss:$12 sps:$4 sm:$0xff]   ;;  %v2570_v60 = vld [vmem:[%s2639_s27 + $0x338] ss:$12 sps:$4 sm:$0xff]  }
  0x9e   : > { %1222 = vmatmul.mubr.bf16.gmra.mrb[40].mxu0 %v2491_v61  ;;  %2301 = vmatmul.mubr.msk.bf16.gmra.mrb[40].mxu1 %vm1000_vm0, %v2492_v62  ;;  %v2571_v61 = vld [vmem:[%s2639_s27 + $0x270] ss:$12 sps:$4 sm:$0xff]  }
  0x9f   : > { %1229 = vmatprep.mubr.bf16.mxu0 %v2493_v63  ;;  %2304 = vmatprep.mubr.msk.bf16.mxu1 %vm1000_vm0, %v2495_v0  ;;  %v2572_v62 = vld [vmem:[%s2639_s27 + $0x350] ss:$12 sps:$4 sm:$0xff]  }
  0xa6   : > { %1230 = vmatmul.mubr.bf16.gmra.mrb[44].mxu0 %v2496_v1  ;;  %2305 = vmatmul.mubr.msk.bf16.gmra.mrb[44].mxu1 %vm1000_vm0, %v2497_v2 }
  0xa7   : > { %1237 = vmatprep.mubr.bf16.mxu0 %v2498_v3  ;;  %2308 = vmatprep.mubr.msk.bf16.mxu1 %vm1000_vm0, %v2500_v4 }
  0xae   : > { %1238 = vmatmul.mubr.bf16.gmra.mrb[48].mxu0 %v2501_v5  ;;  %2309 = vmatmul.mubr.msk.bf16.gmra.mrb[48].mxu1 %vm1000_vm0, %v2502_v6 }
  0xaf   : > { %1245 = vmatprep.mubr.bf16.mxu0 %v2503_v7  ;;  %2312 = vmatprep.mubr.msk.bf16.mxu1 %vm1000_vm0, %v2505_v8 }
  0xb6   : > { %1246 = vmatmul.mubr.bf16.gmra.mrb[52].mxu0 %v2506_v9  ;;  %2313 = vmatmul.mubr.msk.bf16.gmra.mrb[52].mxu1 %vm1000_vm0, %v2507_v10 }
  0xb7   : > { %1253 = vmatprep.mubr.bf16.mxu0 %v2508_v11  ;;  %2316 = vmatprep.mubr.msk.bf16.mxu1 %vm1000_vm0, %v2510_v12 }
  0xbe   : > { %1254 = vmatmul.mubr.bf16.gmra.mrb[56].mxu0 %v2511_v13  ;;  %2317 = vmatmul.mubr.msk.bf16.gmra.mrb[56].mxu1 %vm1000_vm0, %v2512_v14 }
  0xbf   : > { %1261 = vmatprep.mubr.bf16.mxu0 %v2513_v15  ;;  %2320 = vmatprep.mubr.msk.bf16.mxu1 %vm1000_vm0, %v2515_v16 }
  0xc6   : > { %1262 = vmatmul.mubr.bf16.gmra.mrb[60].mxu0 %v2516_v17  ;;  %2321 = vmatmul.mubr.msk.bf16.gmra.mrb[60].mxu1 %vm1000_vm0, %v2517_v18 }
  0xc7   : > { %1269 = vmatprep.mubr.bf16.mxu0 %v2518_v19  ;;  %2324 = vmatprep.mubr.msk.bf16.mxu1 %vm1000_vm0, %v2520_v20 }
  0xce   : > { %1270 = vmatmul.mubr.bf16.gmra.mrb[64].mxu0 %v2521_v21  ;;  %2325 = vmatmul.mubr.msk.bf16.gmra.mrb[64].mxu1 %vm1000_vm0, %v2522_v22 }
  0xcf   : > { %1277 = vmatprep.mubr.bf16.mxu0 %v2523_v23  ;;  %2328 = vmatprep.mubr.msk.bf16.mxu1 %vm1000_vm0, %v2525_v24 }
  0xd6   : > { %1278 = vmatmul.mubr.bf16.gmra.mrb[68].mxu0 %v2526_v25  ;;  %2329 = vmatmul.mubr.msk.bf16.gmra.mrb[68].mxu1 %vm1000_vm0, %v2527_v26 }
  0xd7   : > { %1285 = vmatprep.mubr.bf16.mxu0 %v2528_v27  ;;  %2332 = vmatprep.mubr.msk.bf16.mxu1 %vm1000_vm0, %v2530_v28 }
  0xde   : > { %1286 = vmatmul.mubr.bf16.gmra.mrb[72].mxu0 %v2531_v29  ;;  %2333 = vmatmul.mubr.msk.bf16.gmra.mrb[72].mxu1 %vm1000_vm0, %v2532_v30 }
  0xdf   : > { %1293 = vmatprep.mubr.bf16.mxu0 %v2533_v31  ;;  %2336 = vmatprep.mubr.msk.bf16.mxu1 %vm1000_vm0, %v2535_v32 }
  0xe6   : > { %1294 = vmatmul.mubr.bf16.gmra.mrb[76].mxu0 %v2536_v33  ;;  %2337 = vmatmul.mubr.msk.bf16.gmra.mrb[76].mxu1 %vm1000_vm0, %v2537_v34 }
  0xe7   : > { %1301 = vmatprep.mubr.bf16.mxu0 %v2538_v35  ;;  %2340 = vmatprep.mubr.msk.bf16.mxu1 %vm1000_vm0, %v2540_v36 }
  0xee   : > { %1302 = vmatmul.mubr.bf16.gmra.mrb[80].mxu0 %v2541_v37  ;;  %2341 = vmatmul.mubr.msk.bf16.gmra.mrb[80].mxu1 %vm1000_vm0, %v2542_v38 }
  0xef   : > { %1309 = vmatprep.mubr.bf16.mxu0 %v2543_v39  ;;  %2344 = vmatprep.mubr.msk.bf16.mxu1 %vm1000_vm0, %v2545_v40 }
  0xf6   : > { %1310 = vmatmul.mubr.bf16.gmra.mrb[84].mxu0 %v2546_v41  ;;  %2345 = vmatmul.mubr.msk.bf16.gmra.mrb[84].mxu1 %vm1000_vm0, %v2547_v42 }
  0xf7   : > { %1317 = vmatprep.mubr.bf16.mxu0 %v2548_v43  ;;  %2348 = vmatprep.mubr.msk.bf16.mxu1 %vm1000_vm0, %v2550_v44 }
  0xfe   : > { %1318 = vmatmul.mubr.bf16.gmra.mrb[88].mxu0 %v2551_v45  ;;  %2349 = vmatmul.mubr.msk.bf16.gmra.mrb[88].mxu1 %vm1000_vm0, %v2552_v46 }
  0xff   : > { %1325 = vmatprep.mubr.bf16.mxu0 %v2553_v47  ;;  %2352 = vmatprep.mubr.msk.bf16.mxu1 %vm1000_vm0, %v2555_v48 }
 0x106   : > { %1326 = vmatmul.mubr.bf16.gmra.mrb[92].mxu0 %v2556_v49  ;;  %2353 = vmatmul.mubr.msk.bf16.gmra.mrb[92].mxu1 %vm1000_vm0, %v2557_v50 }
 0x107   : > { %1333 = vmatprep.mubr.bf16.mxu0 %v2558_v51  ;;  %2356 = vmatprep.mubr.msk.bf16.mxu1 %vm1000_vm0, %v2560_v52 }
 0x10e   : > { %1334 = vmatmul.mubr.bf16.gmra.mrb[96].mxu0 %v2561_v53  ;;  %2357 = vmatmul.mubr.msk.bf16.gmra.mrb[96].mxu1 %vm1000_vm0, %v2562_v54 }
 0x10f   : > { %1341 = vmatprep.mubr.bf16.mxu0 %v2563_v55  ;;  %2360 = vmatprep.mubr.msk.bf16.mxu1 %vm1000_vm0, %v2565_v56 }
 0x116   : > { %1342 = vmatmul.mubr.bf16.gmra.mrb[100].mxu0 %v2566_v57  ;;  %2361 = vmatmul.mubr.msk.bf16.gmra.mrb[100].mxu1 %vm1000_vm0, %v2567_v58 }
 0x117   : > { %1349 = vmatprep.mubr.bf16.mxu0 %v2568_v59  ;;  %2364 = vmatprep.mubr.msk.bf16.mxu1 %vm1000_vm0, %v2570_v60 }
 0x11e   : > { %1350 = vmatmul.mubr.bf16.gmra.mrb[104].mxu0 %v2571_v61  ;;  %2365 = vmatmul.mubr.msk.bf16.gmra.mrb[104].mxu1 %vm1000_vm0, %v2572_v62 }
 0x121   : > { %v2848_v63 = vpop.f32.mrb[0].mxu0  ;;  %v2850_v0 = vpop.f32.mrb[0].mxu1 }
 0x122   : > { %v1145_v1 = vpop.f32.mrb[1].mxu0  ;;  %v1361_v2 = vpop.f32.mrb[1].mxu1 }
 0x123   : > { %v2852_v3 = vpop.f32.mrb[2].mxu0  ;;  %v2854_v4 = vpop.f32.mrb[2].mxu1 }
 0x124   : > { %v1148_v5 = vpop.f32.mrb[3].mxu0  ;;  %v1364_v6 = vpop.f32.mrb[3].mxu1 }
 0x129   : > { %v2856_v7 = vpop.f32.mrb[4].mxu0  ;;  %v2858_v8 = vpop.f32.mrb[4].mxu1 }
 0x12a   : > { %v1153_v9 = vpop.f32.mrb[5].mxu0  ;;  %v1369_v10 = vpop.f32.mrb[5].mxu1 }
 0x12b   : > { %v2860_v11 = vpop.f32.mrb[6].mxu0  ;;  %v2862_v12 = vpop.f32.mrb[6].mxu1 }
 0x12c   : > { %v1156_v13 = vpop.f32.mrb[7].mxu0  ;;  %v1372_v14 = vpop.f32.mrb[7].mxu1 }
 0x131   : > { %v2864_v15 = vpop.f32.mrb[8].mxu0  ;;  %v2866_v16 = vpop.f32.mrb[8].mxu1 }
 0x132   : > { %v1161_v17 = vpop.f32.mrb[9].mxu0  ;;  %v1377_v18 = vpop.f32.mrb[9].mxu1 }
 0x133   : > { %v2868_v19 = vpop.f32.mrb[10].mxu0  ;;  %v2870_v20 = vpop.f32.mrb[10].mxu1 }
 0x134   : > { %v1164_v21 = vpop.f32.mrb[11].mxu0  ;;  %v1380_v22 = vpop.f32.mrb[11].mxu1 }
 0x139   : > { %v1167_v23 = vpop.f32.mrb[12].mxu0  ;;  %v2872_v24 = vpop.f32.mrb[12].mxu1 }
 0x13a   : > { %v1169_v25 = vpop.f32.mrb[13].mxu0  ;;  %v1385_v26 = vpop.f32.mrb[13].mxu1 }
 0x13b   : > { %v2874_v27 = vpop.f32.mrb[14].mxu0  ;;  %v2876_v28 = vpop.f32.mrb[14].mxu1 }
 0x13c   : > { %v1172_v29 = vpop.f32.mrb[15].mxu0  ;;  %v1388_v30 = vpop.f32.mrb[15].mxu1 }
 0x141   : > { %v2878_v31 = vpop.f32.mrb[16].mxu0  ;;  %v2880_v32 = vpop.f32.mrb[16].mxu1 }
 0x142   : > { %v1177_v33 = vpop.f32.mrb[17].mxu0  ;;  %v1393_v34 = vpop.f32.mrb[17].mxu1 }
 0x143   : > { %v2882_v35 = vpop.f32.mrb[18].mxu0  ;;  %v2884_v36 = vpop.f32.mrb[18].mxu1 }
 0x144   : > { %v1180_v37 = vpop.f32.mrb[19].mxu0  ;;  %v1396_v38 = vpop.f32.mrb[19].mxu1 }
 0x149   : > { %v1183_v39 = vpop.f32.mrb[20].mxu0  ;;  %v2886_v40 = vpop.f32.mrb[20].mxu1 }
 0x14a   : > { %v1185_v41 = vpop.f32.mrb[21].mxu0  ;;  %v1401_v42 = vpop.f32.mrb[21].mxu1 }
 0x14b   : > { %v1186_v43 = vpop.f32.mrb[22].mxu0  ;;  %v2888_v44 = vpop.f32.mrb[22].mxu1 }
 0x14c   : > { %v1188_v45 = vpop.f32.mrb[23].mxu0  ;;  %v1404_v46 = vpop.f32.mrb[23].mxu1 }
 0x151   : > { %v2890_v47 = vpop.f32.mrb[24].mxu0  ;;  %v2892_v48 = vpop.f32.mrb[24].mxu1 }
 0x152   : > { %v1193_v49 = vpop.f32.mrb[25].mxu0  ;;  %v1409_v50 = vpop.f32.mrb[25].mxu1 }
 0x153   : > { %v2894_v51 = vpop.f32.mrb[26].mxu0  ;;  %v2896_v52 = vpop.f32.mrb[26].mxu1 }
 0x154   : > { %v1196_v53 = vpop.f32.mrb[27].mxu0  ;;  %v1412_v54 = vpop.f32.mrb[27].mxu1 }
 0x159   : > { %v1199_v55 = vpop.f32.mrb[28].mxu0  ;;  %v2898_v56 = vpop.f32.mrb[28].mxu1 }
 0x15a   : > { %3199 = vst [vmem:[#allocation2_spill] sm:$0xff] %v2898_v56  ;;  %v1201_v57 = vpop.f32.mrb[29].mxu0  ;;  %v1417_v58 = vpop.f32.mrb[29].mxu1 }
 0x15b   : > { %v1202_v59 = vpop.f32.mrb[30].mxu0  ;;  %v2900_v60 = vpop.f32.mrb[30].mxu1 }
 0x15c   : > { %3200 = vst [vmem:[#allocation3_spill] sm:$0xff] %v2900_v60  ;;  %v1204_v61 = vpop.f32.mrb[31].mxu0  ;;  %v1420_v62 = vpop.f32.mrb[31].mxu1 }
 0x161   : > { %v1207_v1 = vpop.f32.mrb[32].mxu0  ;;  %v2902_v2 = vpop.f32.mrb[32].mxu1 }
 0x162   : > { %3201 = vst [vmem:[#allocation4_spill] sm:$0xff] %v2902_v2  ;;  %v1209_v5 = vpop.f32.mrb[33].mxu0  ;;  %v1425_v6 = vpop.f32.mrb[33].mxu1 }
 0x163   : > { %v2904_v9 = vpop.f32.mrb[34].mxu0  ;;  %v2906_v10 = vpop.f32.mrb[34].mxu1 }
 0x164   : > { %3202 = vst [vmem:[#allocation5_spill] sm:$0xff] %v2906_v10  ;;  %v1212_v13 = vpop.f32.mrb[35].mxu0  ;;  %v1428_v14 = vpop.f32.mrb[35].mxu1 }
 0x169   : > { %v1215_v17 = vpop.f32.mrb[36].mxu0  ;;  %v2298_v18 = vpop.f32.mrb[36].mxu1 }
 0x16a   : > { %v2909_v21 = vadd.f32 %v2298_v18, %v2856_v7  ;;  %v1217_v22 = vpop.f32.mrb[37].mxu0  ;;  %v1464_v25 = vpop.f32.mrb[37].mxu1 }
 0x16b   : > { %v2912_v26 = vadd.f32 %v1464_v25, %v2848_v63  ;;  %v1218_v29 = vpop.f32.mrb[38].mxu0  ;;  %v2299_v30 = vpop.f32.mrb[38].mxu1 }
 0x16c   : > { %v2915_v33 = vadd.f32 %v2299_v30, %v2860_v11  ;;  %v1220_v34 = vpop.f32.mrb[39].mxu0  ;;  %v1467_v37 = vpop.f32.mrb[39].mxu1 }
 0x16d   : > { %v2918_v38 = vadd.f32 %v1467_v37, %v2852_v3 }
 0x171   : > { %v1223_v41 = vpop.f32.mrb[40].mxu0  ;;  %v2302_v42 = vpop.f32.mrb[40].mxu1 }
 0x172   : > { %v2920_v45 = vadd.f32 %v2302_v42, %v1167_v23  ;;  %v1225_v7 = vpop.f32.mrb[41].mxu0  ;;  %v1480_v46 = vpop.f32.mrb[41].mxu1 }
 0x173   : > { %v2923_v49 = vadd.f32 %v1480_v46, %v2864_v15  ;;  %v1226_v63 = vpop.f32.mrb[42].mxu0  ;;  %v2303_v50 = vpop.f32.mrb[42].mxu1 }
 0x174   : > { %v2926_v53 = vadd.f32 %v2303_v50, %v2874_v27  ;;  %v1228_v11 = vpop.f32.mrb[43].mxu0  ;;  %v1483_v54 = vpop.f32.mrb[43].mxu1 }
 0x175   : > { %v2929_v57 = vadd.f32 %v1483_v54, %v2868_v19 }
 0x179   : > { %v1231_v3 = vpop.f32.mrb[44].mxu0  ;;  %v2306_v58 = vpop.f32.mrb[44].mxu1 }
 0x17a   : > { %v2931_v61 = vadd.f32 %v2306_v58, %v1183_v39  ;;  %v1233_v23 = vpop.f32.mrb[45].mxu0  ;;  %v1496_v62 = vpop.f32.mrb[45].mxu1 }
 0x17b   : > { %v2934_v5 = vadd.f32 %v1496_v62, %v2878_v31  ;;  %v1234_v15 = vpop.f32.mrb[46].mxu0  ;;  %v2307_v6 = vpop.f32.mrb[46].mxu1 }
 0x17c   : > { %3203 = vst [vmem:[#allocation6_spill] sm:$0xff] %v2931_v61  ;;  %v2936_v13 = vadd.f32 %v2307_v6, %v1186_v43  ;;  %v1236_v27 = vpop.f32.mrb[47].mxu0  ;;  %v1499_v14 = vpop.f32.mrb[47].mxu1 }
 0x17d   : > { %v2939_v18 = vadd.f32 %v1499_v14, %v2882_v35 }
 0x17e   : > { %3204 = vst [vmem:[#allocation7_spill] sm:$0xff] %v2936_v13 }
 0x181   : > { %v1239_v19 = vpop.f32.mrb[48].mxu0  ;;  %v2310_v22 = vpop.f32.mrb[48].mxu1 }
 0x182   : > { %v2941_v25 = vadd.f32 %v2310_v22, %v1199_v55  ;;  %v1241_v39 = vpop.f32.mrb[49].mxu0  ;;  %v1512_v30 = vpop.f32.mrb[49].mxu1 }
 0x183   : > { %v2944_v34 = vadd.f32 %v1512_v30, %v2890_v47  ;;  %v1242_v31 = vpop.f32.mrb[50].mxu0  ;;  %v2311_v37 = vpop.f32.mrb[50].mxu1 }
 0x184   : > { %3205 = vst [vmem:[#allocation8_spill] sm:$0xff] %v2941_v25  ;;  %v2946_v42 = vadd.f32 %v2311_v37, %v1202_v59  ;;  %v1244_v43 = vpop.f32.mrb[51].mxu0  ;;  %v1515_v7 = vpop.f32.mrb[51].mxu1 }
 0x185   : > { %v2949_v46 = vadd.f32 %v1515_v7, %v2894_v51 }
 0x186   : > { %3206 = vst [vmem:[#allocation9_spill] sm:$0xff] %v2946_v42 }
 0x187   : > { %3207 = vst [vmem:[#allocation10_spill] sm:$0xff] %v2949_v46 }
 0x189   : > { %v1247_v35 = vpop.f32.mrb[52].mxu0  ;;  %v2314_v50 = vpop.f32.mrb[52].mxu1 }
 0x18a   : > { %v2951_v11 = vadd.f32 %v2314_v50, %v1215_v17  ;;  %v1249_v55 = vpop.f32.mrb[53].mxu0  ;;  %v1528_v54 = vpop.f32.mrb[53].mxu1 }
 0x18b   : > { %v2953_v58 = vadd.f32 %v1528_v54, %v1207_v1  ;;  %v1250_v23 = vpop.f32.mrb[54].mxu0  ;;  %v2315_v47 = vpop.f32.mrb[54].mxu1 }
 0x18c   : > { %v2957_v59 = vadd.f32 %v2315_v47, %v1218_v29  ;;  %v1252_v6 = vpop.f32.mrb[55].mxu0  ;;  %v1531_v27 = vpop.f32.mrb[55].mxu1 }
 0x18d   : > { %3208 = vst [vmem:[#allocation11_spill] sm:$0xff] %v2953_v58  ;;  %v2960_v51 = vadd.f32 %v1531_v27, %v2904_v9 }
 0x18f   : > { %3209 = vst [vmem:[#allocation12_spill] sm:$0xff] %v2960_v51 }
 0x191   : > { %v1255_v14 = vpop.f32.mrb[56].mxu0  ;;  %v2318_v22 = vpop.f32.mrb[56].mxu1 }
 0x192   : > { %v2964_v39 = vadd.f32 %v2318_v22, %v1231_v3  ;;  %v1257_v1 = vpop.f32.mrb[57].mxu0  ;;  %v1544_v30 = vpop.f32.mrb[57].mxu1 }
 0x193   : > { %v2966_v37 = vadd.f32 %v1544_v30, %v1223_v41  ;;  %v1258_v43 = vpop.f32.mrb[58].mxu0  ;;  %v2319_v7 = vpop.f32.mrb[58].mxu1 }
 0x194   : > { %v2970_v50 = vadd.f32 %v2319_v7, %v1234_v15  ;;  %v1260_v9 = vpop.f32.mrb[59].mxu0  ;;  %v1547_v55 = vpop.f32.mrb[59].mxu1 }
 0x195   : > { %v2974_v47 = vadd.f32 %v1547_v55, %v1226_v63 }
 0x199   : > { %v1263_v6 = vpop.f32.mrb[60].mxu0  ;;  %v2322_v27 = vpop.f32.mrb[60].mxu1 }
 0x19a   : > { %v2980_v22 = vadd.f32 %v2322_v27, %v1247_v35  ;;  %v1265_v1 = vpop.f32.mrb[61].mxu0  ;;  %v1560_v15 = vpop.f32.mrb[61].mxu1 }
 0x19b   : > { %v2982_v30 = vadd.f32 %v1560_v15, %v1239_v19  ;;  %v1266_v7 = vpop.f32.mrb[62].mxu0  ;;  %v2323_v9 = vpop.f32.mrb[62].mxu1 }
 0x19c   : > { %v2986_v55 = vadd.f32 %v2323_v9, %v1250_v23  ;;  %v1268_v54 = vpop.f32.mrb[63].mxu0  ;;  %v1563_v3 = vpop.f32.mrb[63].mxu1 }
 0x19d   : > { %v2990_v29 = vadd.f32 %v1563_v3, %v1242_v31 }
 0x1a1   : > { %v1271_v27 = vpop.f32.mrb[64].mxu0  ;;  %v2326_v1 = vpop.f32.mrb[64].mxu1 }
 0x1a2   : > { %v2996_v15 = vadd.f32 %v2326_v1, %v1263_v6  ;;  %v1273_v63 = vpop.f32.mrb[65].mxu0  ;;  %v1576_v23 = vpop.f32.mrb[65].mxu1 }
 0x1a3   : > { %v2998_v9 = vadd.f32 %v1576_v23, %v1255_v14  ;;  %v1274_v54 = vpop.f32.mrb[66].mxu0  ;;  %v2327_v17 = vpop.f32.mrb[66].mxu1 }
 0x1a4   : > { %3210 = vst [vmem:[#allocation13_spill] sm:$0xff] %v2996_v15  ;;  %v3002_v3 = vadd.f32 %v2327_v17, %v1266_v7  ;;  %v1276_v41 = vpop.f32.mrb[67].mxu0  ;;  %v1579_v35 = vpop.f32.mrb[67].mxu1 }
 0x1a5   : > { %3211 = vst [vmem:[#allocation14_spill] sm:$0xff] %v2998_v9  ;;  %v3006_v62 = vadd.f32 %v1579_v35, %v1258_v43 }
 0x1a6   : > { %3212 = vst [vmem:[#allocation15_spill] sm:$0xff] %v3002_v3 }
 0x1a7   : > { %3213 = vst [vmem:[#allocation16_spill] sm:$0xff] %v3006_v62 }
 0x1a9   : > { %v1279_v63 = vpop.f32.mrb[68].mxu0  ;;  %v2330_v1 = vpop.f32.mrb[68].mxu1 }
 0x1aa   : > { %v3012_v23 = vadd.f32 %v2330_v1, %v1279_v63  ;;  %v1281_v31 = vpop.f32.mrb[69].mxu0  ;;  %v1592_v17 = vpop.f32.mrb[69].mxu1 }
 0x1ab   : > { %v3014_v7 = vadd.f32 %v1592_v17, %v1271_v27  ;;  %v1282_v41 = vpop.f32.mrb[70].mxu0  ;;  %v2331_v60 = vpop.f32.mrb[70].mxu1 }
 0x1ac   : > { %3214 = vst [vmem:[#allocation17_spill] sm:$0xff] %v3012_v23  ;;  %v3018_v35 = vadd.f32 %v2331_v60, %v1282_v41  ;;  %v1284_v19 = vpop.f32.mrb[71].mxu0  ;;  %v1595_v6 = vpop.f32.mrb[71].mxu1 }
 0x1ad   : > { %3215 = vst [vmem:[#allocation18_spill] sm:$0xff] %v3014_v7  ;;  %v3022_v10 = vadd.f32 %v1595_v6, %v1274_v54 }
 0x1ae   : > { %3216 = vst [vmem:[#allocation19_spill] sm:$0xff] %v3018_v35 }
 0x1af   : > { %3217 = vst [vmem:[#allocation20_spill] sm:$0xff] %v3022_v10 }
 0x1b1   : > { %v1287_v63 = vpop.f32.mrb[72].mxu0  ;;  %v2334_v1 = vpop.f32.mrb[72].mxu1 }
 0x1b2   : > { %v1289_v17 = vpop.f32.mrb[73].mxu0  ;;  %v1608_v56 = vpop.f32.mrb[73].mxu1 }
 0x1b3   : > { %v1609_v43 = vadd.f32 %v1608_v56, %v1287_v63  ;;  %v1290_v60 = vpop.f32.mrb[74].mxu0  ;;  %v2335_v41 = vpop.f32.mrb[74].mxu1 }
 0x1b4   : > { %v1292_v19 = vpop.f32.mrb[75].mxu0  ;;  %v1611_v23 = vpop.f32.mrb[75].mxu1 }
 0x1b5   : > { %v1612_v58 = vadd.f32 %v1611_v23, %v1290_v60 }
 0x1b9   : > { %v1295_v2 = vpop.f32.mrb[76].mxu0  ;;  %v2338_v14 = vpop.f32.mrb[76].mxu1 }
 0x1ba   : > { %v3028_v54 = vadd.f32 %v2334_v1, %v1295_v2  ;;  %v1297_v6 = vpop.f32.mrb[77].mxu0  ;;  %v1624_v7 = vpop.f32.mrb[77].mxu1 }
 0x1bb   : > { %v1298_v31 = vpop.f32.mrb[78].mxu0  ;;  %v2339_v35 = vpop.f32.mrb[78].mxu1 }
 0x1bc   : > { %v3030_v51 = vadd.f32 %v2335_v41, %v1298_v31  ;;  %v1300_v27 = vpop.f32.mrb[79].mxu0  ;;  %v1627_v10 = vpop.f32.mrb[79].mxu1 }
 0x1c1   : > { %v1303_v17 = vpop.f32.mrb[80].mxu0  ;;  %v2342_v42 = vpop.f32.mrb[80].mxu1 }
 0x1c2   : > { %v1625_v56 = vadd.f32 %v1624_v7, %v1303_v17  ;;  %v1305_v63 = vpop.f32.mrb[81].mxu0  ;;  %v1640_v25 = vpop.f32.mrb[81].mxu1 }
 0x1c3   : > { %v1306_v19 = vpop.f32.mrb[82].mxu0  ;;  %v2343_v62 = vpop.f32.mrb[82].mxu1 }
 0x1c4   : > { %v1628_v23 = vadd.f32 %v1627_v10, %v1306_v19  ;;  %v1308_v60 = vpop.f32.mrb[83].mxu0  ;;  %v1643_v13 = vpop.f32.mrb[83].mxu1 }
 0x1c9   : > { %v1311_v2 = vpop.f32.mrb[84].mxu0  ;;  %v3032_v1 = vpop.f32.mrb[84].mxu1 }
 0x1ca   : > { %v3034_v6 = vadd.f32 %v2338_v14, %v1311_v2  ;;  %v1313_v3 = vpop.f32.mrb[85].mxu0  ;;  %v1656_v31 = vpop.f32.mrb[85].mxu1 }
 0x1cb   : > { %v1314_v41 = vpop.f32.mrb[86].mxu0  ;;  %v3036_v27 = vpop.f32.mrb[86].mxu1 }
 0x1cc   : > { %v3038_v46 = vadd.f32 %v2339_v35, %v1314_v41  ;;  %v1316_v7 = vpop.f32.mrb[87].mxu0  ;;  %v3040_v17 = vpop.f32.mrb[87].mxu1 }
 0x1d1   : > { %v1319_v63 = vpop.f32.mrb[88].mxu0  ;;  %v2350_v9 = vpop.f32.mrb[88].mxu1 }
 0x1d2   : > { %v3042_v10 = vadd.f32 %v1640_v25, %v1319_v63  ;;  %v1681_v19 = vadd.f32 %v2350_v9, %v2850_v0  ;;  %v1321_v60 = vpop.f32.mrb[89].mxu0  ;;  %v3045_v14 = vpop.f32.mrb[89].mxu1  ;;  %v3055_v25 = vld [vmem:[%s3182_s2] ss:$0 sm:$0xff]  ;;  %v3220_v0 = vmax.f32 %v2912_v26, %v2951_v11 }
 0x1d3   : > { %3218 = vst [vmem:[#allocation21_spill] sm:$0xff] %v3045_v14  ;;  %v1322_v3 = vpop.f32.mrb[90].mxu0  ;;  %v2351_v2 = vpop.f32.mrb[90].mxu1 }
 0x1d4   : > { %v1769_v61 = vmax.f32 %v1609_v43, %v1681_v19  ;;  %v3047_v15 = vadd.f32 %v1643_v13, %v1322_v3  ;;  %v1684_v35 = vadd.f32 %v2351_v2, %v2854_v4  ;;  %v1324_v41 = vpop.f32.mrb[91].mxu0  ;;  %v3050_v7 = vpop.f32.mrb[91].mxu1  ;;  %v3221_v13 = vmax.f32 %v2918_v38, %v2957_v59 }
 0x1d5   : > { %3219 = vst [vmem:[#allocation22_spill] sm:$0xff] %v3050_v7 }
 0x1d6   : > { %v1787_v9 = vmax.f32 %v3220_v0, %v1769_v61  ;;  %v1770_v63 = vmax.f32 %v1612_v58, %v1684_v35 }
 0x1d8   : > { %v1812_v60 = vadd.f32 %v3055_v25, %v1787_v9  ;;  %v1788_v43 = vmax.f32 %v3221_v13, %v1770_v63 }
 0x1d9   : > { %v1327_v4 = vpop.f32.mrb[92].mxu0  ;;  %v2354_v19 = vpop.f32.mrb[92].mxu1 }
 0x1da   : > { %v1813_v3 = vadd.f32 %v3055_v25, %v1788_v43  ;;  %v3066_v2 = vadd.f32 %v2342_v42, %v1327_v4  ;;  %v1697_v41 = vadd.f32 %v2354_v19, %v2866_v16  ;;  %v1329_v7 = vpop.f32.mrb[93].mxu0  ;;  %v1688_v14 = vpop.f32.mrb[93].mxu1  ;;  %v1830_v26 = vmax.f32 %v1812_v60, 0.0 }
 0x1db   : > { %v1689_v61 = vadd.f32 %v1688_v14, %v2858_v8  ;;  %v1330_v11 = vpop.f32.mrb[94].mxu0  ;;  %v2355_v58 = vpop.f32.mrb[94].mxu1 }
 0x1dc   : > { %v1831_v35 = vmax.f32 %v1813_v3, 0.0  ;;  %v1773_v0 = vmax.f32 %v1625_v56, %v1697_v41  ;;  %v3070_v38 = vadd.f32 %v2343_v62, %v1330_v11  ;;  %v1700_v59 = vadd.f32 %v2355_v58, %v2870_v20  ;;  %v1332_v9 = vpop.f32.mrb[95].mxu0  ;;  %v1691_v63 = vpop.f32.mrb[95].mxu1 }
 0x1dd   : > { %v1771_v16 = vmax.f32 %v3028_v54, %v1689_v61  ;;  %v1692_v8 = vadd.f32 %v1691_v63, %v2862_v12  ;;  %v3222_v56 = vmax.f32 %v2923_v49, %v2964_v39  ;;  %v3223_v20 = vmax.f32 %v2909_v21, %v2966_v37 }
 0x1de   : > { %v2204_v42 = vpack.c.bf16 %v1831_v35, %v1830_v26  ;;  %v1774_v14 = vmax.f32 %v1628_v23, %v1700_v59  ;;  %v3224_v54 = vmax.f32 %v2929_v57, %v2970_v50  ;;  %v3225_v49 = vmax.f32 %v2915_v33, %v2974_v47 }
 0x1df   : > { %v1791_v62 = vmax.f32 %v3222_v56, %v1773_v0  ;;  %v1789_v7 = vmax.f32 %v3223_v20, %v1771_v16  ;;  %v1772_v60 = vmax.f32 %v3030_v51, %v1692_v8  ;;  %v3226_v63 = vmax.f32 %v2934_v5, %v2980_v22 }
 0x1e0   : > { %2205 = vst [vmem:[%s3076_s6] sm:$0xff] %v2204_v42   ;;  %v1792_v43 = vmax.f32 %v3224_v54, %v1774_v14  ;;  %v3229_v22 = vmax.f32 %v2926_v53, %v2990_v29 }
 0x1e1   : > { %v1816_v13 = vadd.f32 %v3055_v25, %v1791_v62  ;;  %v1814_v12 = vadd.f32 %v3055_v25, %v1789_v7  ;;  %v1790_v39 = vmax.f32 %v3225_v49, %v1772_v60  ;;  %v1335_v23 = vpop.f32.mrb[96].mxu0  ;;  %v2358_v4 = vpop.f32.mrb[96].mxu1 }
 0x1e2   : > { %v1817_v21 = vadd.f32 %v3055_v25, %v1792_v43  ;;  %v1657_v37 = vadd.f32 %v1656_v31, %v1335_v23  ;;  %v1713_v51 = vadd.f32 %v2358_v4, %v2880_v32  ;;  %v1337_v19 = vpop.f32.mrb[97].mxu0  ;;  %v1704_v3 = vpop.f32.mrb[97].mxu1 }
 0x1e3   : > { %v1834_v41 = vmax.f32 %v1816_v13, 0.0  ;;  %v1815_v26 = vadd.f32 %v3055_v25, %v1790_v39  ;;  %v1705_v57 = vadd.f32 %v1704_v3, %v2872_v24  ;;  %v1338_v50 = vpop.f32.mrb[98].mxu0  ;;  %v2359_v61 = vpop.f32.mrb[98].mxu1  ;;  %v1832_v35 = vmax.f32 %v1814_v12, 0.0 }
 0x1e4   : > { %v1835_v11 = vmax.f32 %v1817_v21, 0.0  ;;  %v1777_v33 = vmax.f32 %v3042_v10, %v1713_v51  ;;  %v1660_v47 = vadd.f32 %v3040_v17, %v1338_v50  ;;  %v1716_v58 = vadd.f32 %v2359_v61, %v2884_v36  ;;  %v1340_v31 = vpop.f32.mrb[99].mxu0  ;;  %v1707_v32 = vpop.f32.mrb[99].mxu1  ;;  %v3235_v61 = vld [vmem:[#allocation10_spill] sm:$0xff] }
 0x1e5   : > { %v1833_v0 = vmax.f32 %v1815_v26, 0.0  ;;  %v1775_v59 = vmax.f32 %v3034_v6, %v1705_v57  ;;  %v1708_v9 = vadd.f32 %v1707_v32, %v2876_v28  ;;  %v3227_v36 = vmax.f32 %v2920_v45, %v2982_v30 }
 0x1e6   : > { %v2214_v24 = vpack.c.bf16 %v1835_v11, %v1834_v41  ;;  %v1795_v16 = vmax.f32 %v3226_v63, %v1777_v33  ;;  %v1778_v10 = vmax.f32 %v3047_v15, %v1716_v58  ;;  %v3228_v28 = vmax.f32 %v2939_v18, %v2986_v55  ;;  %v3232_v41 = vld [vmem:[#allocation6_spill] sm:$0xff]  ;;  %v3239_v58 = vld [vmem:[#allocation16_spill] sm:$0xff] }
 0x1e7   : > { %v2209_v8 = vpack.c.bf16 %v1833_v0, %v1832_v35  ;;  %v1793_v17 = vmax.f32 %v3227_v36, %v1775_v59  ;;  %v1776_v42 = vmax.f32 %v3038_v46, %v1708_v9  ;;  %v3241_v59 = vld [vmem:[#allocation21_spill] sm:$0xff]  ;;  %v3242_v9 = vld [vmem:[#allocation4_spill] sm:$0xff]  ;;  %v3243_v36 = vld [vmem:[#allocation2_spill] sm:$0xff] }
 0x1e8   : > { %2247 = vst [vmem:[%s3076_s6 + $0x10] sm:$0xff] %v2214_v24   ;;  %v1820_v56 = vadd.f32 %v3055_v25, %v1795_v16  ;;  %v1796_v6 = vmax.f32 %v3228_v28, %v1778_v10 }
 0x1e9   : > { %2246 = vst [vmem:[%s3076_s6 + $0x8] sm:$0xff] %v2209_v8   ;;  %v1818_v5 = vadd.f32 %v3055_v25, %v1793_v17  ;;  %v1794_v15 = vmax.f32 %v3229_v22, %v1776_v42  ;;  %v1343_v62 = vpop.f32.mrb[100].mxu0  ;;  %v2362_v14 = vpop.f32.mrb[100].mxu1 }
 0x1ea   : > { %v1821_v45 = vadd.f32 %v3055_v25, %v1796_v6  ;;  %v1665_v46 = vadd.f32 %v3032_v1, %v1343_v62  ;;  %v1729_v30 = vadd.f32 %v2362_v14, %v2892_v48  ;;  %v1345_v20 = vpop.f32.mrb[101].mxu0  ;;  %v1720_v7 = vpop.f32.mrb[101].mxu1  ;;  %v1838_v60 = vmax.f32 %v1820_v56, 0.0 }
 0x1eb   : > { %v1819_v18 = vadd.f32 %v3055_v25, %v1794_v15  ;;  %v1721_v55 = vadd.f32 %v1720_v7, %v2886_v40  ;;  %v1346_v13 = vpop.f32.mrb[102].mxu0  ;;  %v2363_v54 = vpop.f32.mrb[102].mxu1  ;;  %v1836_v48 = vmax.f32 %v1818_v5, 0.0  ;;  %v3230_v40 = vld [vmem:[#allocation13_spill] sm:$0xff]  ;;  %v3244_v5 = vld [vmem:[#allocation22_spill] sm:$0xff] }
 0x1ec   : > { %v1839_v43 = vmax.f32 %v1821_v45, 0.0  ;;  %v1781_v53 = vmax.f32 %v1657_v37, %v1729_v30  ;;  %v1668_v29 = vadd.f32 %v3036_v27, %v1346_v13  ;;  %v1732_v12 = vadd.f32 %v2363_v54, %v2896_v52  ;;  %v1348_v1 = vpop.f32.mrb[103].mxu0  ;;  %v1723_v49 = vpop.f32.mrb[103].mxu1  ;;  %v3233_v27 = vld [vmem:[#allocation14_spill] sm:$0xff]  ;;  %v3245_v15 = vld [vmem:[#allocation5_spill] sm:$0xff]  ;;  %v3247_v13 = vld [vmem:[#allocation11_spill] sm:$0xff] }
 0x1ed   : > { %v1837_v39 = vmax.f32 %v1819_v18, 0.0  ;;  %v1779_v23 = vmax.f32 %v3066_v2, %v1721_v55  ;;  %v1724_v4 = vadd.f32 %v1723_v49, %v2888_v44  ;;  %v3231_v51 = vmax.f32 %v2944_v34, %v3230_v40  ;;  %v3236_v2 = vld [vmem:[#allocation15_spill] sm:$0xff]  ;;  %v3248_v54 = vld [vmem:[#allocation17_spill] sm:$0xff]  ;;  %v3250_v49 = vld [vmem:[#allocation8_spill] sm:$0xff] }
 0x1ee   : > { %v2224_v21 = vpack.c.bf16 %v1839_v43, %v1838_v60  ;;  %v1782_v3 = vmax.f32 %v1660_v47, %v1732_v12  ;;  %v3234_v26 = vmax.f32 %v3232_v41, %v3233_v27  ;;  %v3237_v11 = vmax.f32 %v3235_v61, %v3236_v2  ;;  %v3238_v34 = vld [vmem:[#allocation7_spill] sm:$0xff]  ;;  %v3257_v41 = vld [vmem:[#allocation20_spill] sm:$0xff] }
 0x1ef   : > { %v1799_v19 = vmax.f32 %v3231_v51, %v1781_v53  ;;  %v2219_v37 = vpack.c.bf16 %v1837_v39, %v1836_v48  ;;  %v1780_v57 = vmax.f32 %v3070_v38, %v1724_v4  ;;  %v3240_v47 = vmax.f32 %v3238_v34, %v3239_v58  ;;  %v3246_v60 = vld [vmem:[#allocation3_spill] sm:$0xff]  ;;  %v3251_v48 = vld [vmem:[#allocation18_spill] sm:$0xff] }
 0x1f0   : > { %v1797_v52 = vmax.f32 %v3234_v26, %v1779_v23  ;;  %2249 = vst [vmem:[%s3076_s6 + $0x20] sm:$0xff] %v2224_v21   ;;  %v1800_v44 = vmax.f32 %v3237_v11, %v1782_v3  ;;  %v3249_v43 = vmax.f32 %v3247_v13, %v3248_v54  ;;  %v3252_v39 = vmax.f32 %v3250_v49, %v3251_v48  ;;  %v3254_v40 = vld [vmem:[#allocation19_spill] sm:$0xff] }
 0x1f1   : > { %v1824_v50 = vadd.f32 %v3055_v25, %v1799_v19  ;;  %2248 = vst [vmem:[%s3076_s6 + $0x18] sm:$0xff] %v2219_v37   ;;  %v1798_v31 = vmax.f32 %v3240_v47, %v1780_v57  ;;  %v1351_v32 = vpop.f32.mrb[104].mxu0  ;;  %v2366_v35 = vpop.f32.mrb[104].mxu1  ;;  %v3256_v37 = vld [vmem:[#allocation9_spill] sm:$0xff] }
 0x1f2   : > { %v1822_v33 = vadd.f32 %v3055_v25, %v1797_v52  ;;  %v1825_v0 = vadd.f32 %v3055_v25, %v1800_v44  ;;  %v1673_v38 = vadd.f32 %v3241_v59, %v1351_v32  ;;  %v1745_v24 = vadd.f32 %v2366_v35, %v3242_v9  ;;  %v1353_v63 = vpop.f32.mrb[105].mxu0  ;;  %v1736_v16 = vpop.f32.mrb[105].mxu1 }
 0x1f3   : > { %v1842_v10 = vmax.f32 %v1824_v50, 0.0  ;;  %v1823_v8 = vadd.f32 %v3055_v25, %v1798_v31  ;;  %v1737_v17 = vadd.f32 %v1736_v16, %v3243_v36  ;;  %v1354_v42 = vpop.f32.mrb[106].mxu0  ;;  %v2367_v56 = vpop.f32.mrb[106].mxu1  ;;  %v3258_v27 = vmax.f32 %v3256_v37, %v3257_v41 }
 0x1f4   : > { %v1843_v28 = vmax.f32 %v1825_v0, 0.0  ;;  %v1785_v6 = vmax.f32 %v1673_v38, %v1745_v24  ;;  %v1676_v22 = vadd.f32 %v3244_v5, %v1354_v42  ;;  %v1748_v62 = vadd.f32 %v2367_v56, %v3245_v15  ;;  %v1356_v14 = vpop.f32.mrb[107].mxu0  ;;  %v1739_v45 = vpop.f32.mrb[107].mxu1 }
 0x1f5   : > { %v1840_v30 = vmax.f32 %v1822_v33, 0.0  ;;  %v1841_v20 = vmax.f32 %v1823_v8, 0.0  ;;  %v1783_v7 = vmax.f32 %v1665_v46, %v1737_v17  ;;  %v1740_v18 = vadd.f32 %v1739_v45, %v3246_v60  ;;  %v3253_v46 = vld [vmem:[#allocation12_spill] sm:$0xff] }
 0x1f6   : > { %v2234_v55 = vpack.c.bf16 %v1843_v28, %v1842_v10  ;;  %v1803_v53 = vmax.f32 %v3249_v43, %v1785_v6  ;;  %v1786_v12 = vmax.f32 %v1676_v22, %v1748_v62  ;;  %v3255_v51 = vmax.f32 %v3253_v46, %v3254_v40 }
 0x1f7   : > { %v2229_v1 = vpack.c.bf16 %v1841_v20, %v1840_v30  ;;  %v1801_v23 = vmax.f32 %v3252_v39, %v1783_v7  ;;  %v1784_v4 = vmax.f32 %v1668_v29, %v1740_v18 }
 0x1f8   : > { %2251 = vst [vmem:[%s3076_s6 + $0x30] sm:$0xff] %v2234_v55   ;;  %v1828_v21 = vadd.f32 %v3055_v25, %v1803_v53  ;;  %v1804_v19 = vmax.f32 %v3255_v51, %v1786_v12 }
 0x1f9   : > { %2250 = vst [vmem:[%s3076_s6 + $0x28] sm:$0xff] %v2229_v1   ;;  %v1826_v3 = vadd.f32 %v3055_v25, %v1801_v23  ;;  %v1802_v26 = vmax.f32 %v3258_v27, %v1784_v4 }
 0x1fa   : > { %v1829_v52 = vadd.f32 %v3055_v25, %v1804_v19  ;;  %v1846_v29 = vmax.f32 %v1828_v21, 0.0 }
 0x1fb   : > { %v1827_v57 = vadd.f32 %v3055_v25, %v1802_v26  ;;  %v1844_v61 = vmax.f32 %v1826_v3, 0.0 }
 0x1fc   : > { %v1847_v50 = vmax.f32 %v1829_v52, 0.0 }
 0x1fd   : > { %v1845_v2 = vmax.f32 %v1827_v57, 0.0 }
 0x1fe   : > { %v2244_v11 = vpack.c.bf16 %v1847_v50, %v1846_v29 }
 0x1ff   : > { %v2239_v44 = vpack.c.bf16 %v1845_v2, %v1844_v61 }
 0x200   : > { %2253 = vst [vmem:[%s3076_s6 + $0x40] sm:$0xff] %v2244_v11  }
 0x201   : > { %2252 = vst [vmem:[%s3076_s6 + $0x38] sm:$0xff] %v2239_v44  }
 0x202 PF: > { %s13_s12 = sadd.s32 1, %s2579_s12  }
 0x203   : > { %p10_p4 = scmp.ge.s32.totalorder %s13_s12, 4  }
 0x205   :  { %12 = sbr.rel (!%p10_p4) target bundleno = 1 (0x1), region = 62 }

// kernel: base_model_forward.5
= control target key start
LH: loop header
LB: loop body
LE: loop exit
PB: predicated region body
PF: predicated region fallthrough
CT: control target
= control target key end

     0   :  { %10 = vsyncpa [#allocation3], 0  ;;  %s2183_s0 = inlined_call_operand.vmem [shape: bf16[2,100,576], index: 0, kind: input, shape index: {}]   ;;  %s2184_s1 = inlined_call_operand.vmem [shape: bf16[576,128], index: 1, kind: input, shape index: {}]   ;;  %s2185_s2 = inlined_call_operand.vmem [shape: f32[1,128], index: 2, kind: input, shape index: {}]   ;;  %s2186_s3 = inlined_call_operand.vmem [shape: f32[128,128], index: 3, kind: input, shape index: {}]   ;;  %s2187_s4 = inlined_call_operand.vmem [shape: f32[1,128], index: 4, kind: input, shape index: {}]   ;;  %s2188_s5 = inlined_call_operand.hbm [shape: f32[2,1,128], index: 5, kind: output, shape index: {}]  }
   0x1   :  { %12 = vsyncpa [#allocation3 + $0x1], 0  ;;  %s1811_s18 = smov 0   ;;  %s1813_s19 = smov 0  }
   0x2   :  { %s1815_s20 = smov 0   ;;  %s1817_s21 = smov 0  }
   0x3 LB: > { %s1832_s22 = sadd.s32 4294967295, %s1775_s21   ;;  %s1245_s23 = sadd.s32 4294967294, %s1775_s21   ;;  %s1775_s21 = sphi %s1817_s21, %s2194_s21   ;;  %s1771_s20 = sphi %s1815_s20, %s2193_s20   ;;  %s1767_s19 = sphi %s1813_s19, %s2192_s19   ;;  %s1763_s18 = sphi %s1811_s18, %s2191_s18  }
   0x4   : > { %s1836_s24 = sadd.s32 1, %s1775_s21   ;;  %s135_s25 = sadd.s32 1, %s1771_s20 }
   0x5   : > { %s132_s26 = ssub.s32 %s1775_s21, %s1836_s24  ;;  %p145_p0 = scmp.ne.s32.totalorder %s1771_s20, %s1767_s19 }
   0x6   : > { %p133_p1 = scmp.eq.s32.totalorder %s132_s26, 0  ;;  %p146_p2 = scmp.eq.s32.totalorder %s1832_s22, 1 }
   0x7   : > { %p151_p3 = scmp.ne.s32.totalorder %s1767_s19, %s1763_s18  ;;  %p152_p4 = scmp.eq.s32.totalorder %s1245_s23, 1 }
   0x8   : > { %s1847_s27 = scalar_select %p133_p1, %s1771_s20, %s135_s25  }
   0x9   : > { %p1849_p5 = por %p146_p2, %p145_p0  ;;  %p1853_p6 = por %p152_p4, %p151_p3 }
   0xa   : > { %p1248_p7 = scmp.ge.s32.totalorder %s1775_s21, 1  ;;  %p190_p8 = scmp.lt.s32.totalorder %s1775_s21, 3 }
   0xc   : > { %p191_p9 = pnand %p1248_p7, %p190_p8 }
   0xd   : > { %v1630_v0 = vld [vmem:[%s2184_s1 + $0x40] sm:$0xff] (!%p191_p9)   ;;  %v1632_v2 = vld [vmem:[%s2184_s1 + $0x48] sm:$0xff] (!%p191_p9)   ;;  %p217_p10 = scmp.lt.s32.totalorder (!%p191_p9), %s1832_s22, 1  ;;  %v1634_v4 = vld [vmem:[%s2184_s1 + $0x50] sm:$0xff] (!%p191_p9)   ;;  %v1777_v24 = vmov (!%p191_p9), 0.0   ;;  %vm1778_vm0 = vmmov (!%p191_p9), 0  }
   0xe   : > { %194 = sbr.rel (%p191_p9) target bundleno = 607 (0x25f), region = 40  ;;  %v1631_v1 = vld [vmem:[%s2184_s1] sm:$0xff] (!%p191_p9)   ;;  %1571 = vmatprep.subr.bf16.mxu1 (!%p191_p9), %v1630_v0  ;;  %1332 = vmatprep.subr.bf16.mxu0 (!%p191_p9), %v1630_v0  ;;  %v1633_v3 = vld [vmem:[%s2184_s1 + $0x8] sm:$0xff] (!%p191_p9)   ;;  %v1635_v5 = vld [vmem:[%s2184_s1 + $0x10] sm:$0xff] (!%p191_p9)   ;;  %vm717_vm1 = vcmask (!%p191_p9), 523264   ;;  %vm1007_vm2 = vcmask (!%p191_p9), 1046528  }
   0xf   : > { %1579 = vmatpush3.bf16.msra.mxu1 (!%p191_p9), %v1631_v1  ;;  %1333 = vmatpush3.bf16.msra.mxu0 (!%p191_p9), %v1631_v1  ;;  %v1636_v6 = vld [vmem:[%s2184_s1 + $0x58] sm:$0xff] (!%p191_p9)   ;;  %v1638_v8 = vld [vmem:[%s2184_s1 + $0x60] sm:$0xff] (!%p191_p9)   ;;  %v1640_v10 = vld [vmem:[%s2184_s1 + $0x68] sm:$0xff] (!%p191_p9)   ;;  %vm1046_vm3 = vcmask (!%p191_p9), 1045504   ;;  %vm1079_vm4 = vcmask (!%p191_p9), 1040384   ;;  %s215_s7 = sand.u32 (!%p191_p9), 1, %s1767_s19  }
  0x10   : > { %1572 = vmatprep.subr.bf16.mxu1 (!%p191_p9), %v1632_v2  ;;  %1334 = vmatprep.subr.bf16.mxu0 (!%p191_p9), %v1632_v2  ;;  %v1637_v7 = vld [vmem:[%s2184_s1 + $0x18] sm:$0xff] (!%p191_p9)   ;;  %v1639_v9 = vld [vmem:[%s2184_s1 + $0x20] sm:$0xff] (!%p191_p9)   ;;  %v1641_v12 = vld [vmem:[%s2184_s1 + $0x28] sm:$0xff] (!%p191_p9)   ;;  %s1329_s9 = sshll.u32 (!%p191_p9), %s1832_s22, 4  ;;  %s216_s10 = scalar_lea.vmem (!%p191_p9), [#allocation2], %s215_s7 }
  0x11   : > { %v1642_v13 = vld [vmem:[%s2184_s1 + $0x70] sm:$0xff] (!%p191_p9)   ;;  %v1644_v15 = vld [vmem:[%s2184_s1 + $0x78] sm:$0xff] (!%p191_p9)   ;;  %v1649_v19 = vld [vmem:[%s2184_s1 + $0xc0] sm:$0xff] (!%p191_p9)   ;;  %s1190_s12 = sshll.u32 (!%p191_p9), %s216_s10, 4  ;;  %s1178_s16 = scalar_lea.sflag (!%p191_p9), [#allocation3], %s215_s7  ;;  %s2143_s12 = int_to_ptr.vmem [resolvable:$true] %s1190_s12 }
  0x12   : > { %v1643_v14 = vld [vmem:[%s2184_s1 + $0x30] sm:$0xff] (!%p191_p9)   ;;  %v1645_v17 = vld [vmem:[%s2184_s1 + $0x38] sm:$0xff] (!%p191_p9)   ;;  %v1650_v20 = vld [vmem:[%s2184_s1 + $0x80] sm:$0xff] (!%p191_p9)   ;;  %s1713_s17 = scalar_lea.vmem (!%p191_p9), %s2143_s12, 16 }
  0x13   : > { %1580 = vmatpush3.bf16.msra.mxu1 (!%p191_p9), %v1633_v3  ;;  %1335 = vmatpush3.bf16.msra.mxu0 (!%p191_p9), %v1633_v3  ;;  %v1651_v21 = vld [vmem:[%s2184_s1 + $0xc8] sm:$0xff] (!%p191_p9)   ;;  %v1663_v25 = vld [vmem:[%s2184_s1 + $0x100] sm:$0xff] (!%p191_p9)   ;;  %v1656_v29 = vld [vmem:[%s2184_s1 + $0xd0] sm:$0xff] (!%p191_p9)   ;;  %p1714_p11 = scmp.ne.s32.totalorder (!%p191_p9), %s2143_s12, %s1713_s17 }
  0x14   : > { %1573 = vmatprep.subr.bf16.mxu1 (!%p191_p9), %v1634_v4  ;;  %1336 = vmatprep.subr.bf16.mxu0 (!%p191_p9), %v1634_v4  ;;  %v1652_v27 = vld [vmem:[%s2184_s1 + $0x88] sm:$0xff] (!%p191_p9)   ;;  %v1657_v31 = vld [vmem:[%s2184_s1 + $0x90] sm:$0xff] (!%p191_p9)   ;;  %v1661_v32 = vld [vmem:[%s2184_s1 + $0xd8] sm:$0xff] (!%p191_p9)  }
  0x15   : > { %s218_s15 = scalar_select %p217_p10, %s1832_s22, 1  ;;  %v1673_v30 = vld [vmem:[%s2184_s1 + $0x108] sm:$0xff]   ;;  %v1681_v36 = vld [vmem:[%s2184_s1 + $0x110] sm:$0xff]   ;;  %v1662_v37 = vld [vmem:[%s2184_s1 + $0x98] sm:$0xff]  }
  0x16   : > { %v1667_v39 = vld [vmem:[%s2184_s1 + $0xe0] sm:$0xff]   ;;  %v1688_v41 = vld [vmem:[%s2184_s1 + $0x118] sm:$0xff]   ;;  %v1672_v45 = vld [vmem:[%s2184_s1 + $0xe8] sm:$0xff]   ;;  %p1715_p12 = pnand %p1714_p11, %p1849_p5  ;;  %s1780_s22 = smov [#allocation2]  }
  0x17   : > { %s1587_s26 = smul.u32 260, %s218_s15  ;;  %1581 = vmatpush3.bf16.msra.mxu1 %v1635_v5  ;;  %1337 = vmatpush3.bf16.msra.mxu0 %v1635_v5  ;;  %v1668_v43 = vld [vmem:[%s2184_s1 + $0xa0] sm:$0xff]   ;;  %v1674_v46 = vld [vmem:[%s2184_s1 + $0xa8] sm:$0xff]   ;;  %v1677_v47 = vld [vmem:[%s2184_s1 + $0xf0] sm:$0xff]   ;;  %s2141_s15 = scalar_lea.hbm %s2188_s5, %s1329_s9 }
  0x18   : > { %1574 = vmatprep.subr.bf16.mxu1 %v1636_v6  ;;  %1338 = vmatprep.subr.bf16.mxu0 %v1636_v6  ;;  %v1678_v49 = vld [vmem:[%s2184_s1 + $0xb0] sm:$0xff]   ;;  %v1683_v52 = vld [vmem:[%s2184_s1 + $0xf8] sm:$0xff]   ;;  %p1716_p13 = pneg %p1715_p12  ;;  %s1717_s23 = sshll.u32 %s1780_s22, 4  ;;  %s1718_s23 = int_to_ptr.vmem [resolvable:$false] %s1717_s23 }
  0x19   : > { %s1891_s11 = scalar_lea.vmem %s2183_s0, %s1587_s26  ;;  %v1684_v53 = vld [vmem:[%s2184_s1 + $0xb8] sm:$0xff]   ;;  %s1719_s25 = scalar_lea.vmem %s1718_s23, 32 }
  0x1a   : > { %v1648_v11 = vld [vmem:[%s1891_s11 + $0x7c] ss:$20 sps:$4 sm:$0xff]   ;;  %v1660_v16 = vld [vmem:[%s1891_s11 + $0x4] ss:$20 sps:$4 sm:$0xff]   ;;  %v1658_v22 = vld [vmem:[%s1891_s11] ss:$20 sps:$4 sm:$0xff]   ;;  %p1720_p0 = scmp.lt.s32.totalorder %s2143_s12, %s1718_s23  ;;  %p1721_p1 = scmp.lt.s32.totalorder %s1719_s25, %s1713_s17 }
  0x1b   : > { %1582 = vmatpush3.bf16.msra.mxu1 %v1637_v7  ;;  %1339 = vmatpush3.bf16.msra.mxu0 %v1637_v7  ;;  %v1646_v18 = vld [vmem:[%s1891_s11 + $0x78] ss:$20 sps:$4 sm:$0xff]   ;;  %v1655_v28 = vld [vmem:[%s1891_s11 + $0xa0] ss:$20 sps:$4 sm:$0xff]   ;;  %v1671_v33 = vld [vmem:[%s1891_s11 + $0x28] ss:$20 sps:$4 sm:$0xff]  }
  0x1c   : > { %1575 = vmatprep.subr.bf16.mxu1 %v1638_v8  ;;  %1340 = vmatprep.subr.bf16.mxu0 %v1638_v8  ;;  %v1653_v23 = vld [vmem:[%s1891_s11 + $0xa4] ss:$20 sps:$4 sm:$0xff]   ;;  %v1669_v26 = vld [vmem:[%s1891_s11 + $0x2c] ss:$20 sps:$4 sm:$0xff]   ;;  %v1679_v35 = vld [vmem:[%s1891_s11 + $0x54] ss:$20 sps:$4 sm:$0xff]   ;;  %p1722_p2 = por %p1721_p1, %p1720_p0 }
  0x1d   : > { %795 = vmatprep.mubr.bf16.mxu1 %v1648_v11  ;;  %771 = vmatprep.mubr.bf16.mxu0 %v1660_v16  ;;  %v1664_v34 = vld [vmem:[%s1891_s11 + $0xcc] ss:$20 sps:$4 sm:$0xff]   ;;  %v1666_v38 = vld [vmem:[%s1891_s11 + $0xc8] ss:$20 sps:$4 sm:$0xff]   ;;  %v259_v40 = vld [vmem:[%s1891_s11 + $0xf0] sm:$0x33] }
  0x1e   : > { %v1682_v42 = vld [vmem:[%s1891_s11 + $0x50] ss:$20 sps:$4 sm:$0xff]   ;;  %v1281_v44 = vcombine.high %v259_v40, %v259_v40  ;;  %v1280_v48 = vcombine.low %v259_v40, %v259_v40  ;;  %v1687_v51 = vld [vmem:[%s1891_s11 + $0xc] ss:$20 sps:$4 sm:$0xff]   ;;  %v1685_v54 = vld [vmem:[%s1891_s11 + $0x8] ss:$20 sps:$4 sm:$0xff]   ;;  %p1723_p3 = pnand %p1722_p2, %p1716_p13 }
  0x1f   : > { %1583 = vmatpush3.bf16.msra.mxu1 %v1639_v9  ;;  %1341 = vmatpush3.bf16.msra.mxu0 %v1639_v9  ;;  %v1689_v50 = vld [vmem:[%s1891_s11 + $0x10] ss:$20 sps:$4 sm:$0xff]   ;;  %v1693_v55 = vld [vmem:[%s1891_s11 + $0x38] ss:$20 sps:$4 sm:$0xff]   ;;  %v1690_v56 = vld [vmem:[%s1891_s11 + $0x34] ss:$20 sps:$4 sm:$0xff]  }
  0x20   : > { %1576 = vmatprep.subr.bf16.mxu1 %v1640_v10  ;;  %1342 = vmatprep.subr.bf16.mxu0 %v1640_v10  ;;  %v1692_v57 = vld [vmem:[%s1891_s11 + $0x30] ss:$20 sps:$4 sm:$0xff]   ;;  %v1697_v58 = vld [vmem:[%s1891_s11 + $0x60] ss:$20 sps:$4 sm:$0xff]   ;;  %v1696_v60 = vld [vmem:[%s1891_s11 + $0x58] ss:$20 sps:$4 sm:$0xff]  }
  0x21   : > { %v1694_v59 = vld [vmem:[%s1891_s11 + $0x5c] ss:$20 sps:$4 sm:$0xff]   ;;  %v1698_v62 = vld [vmem:[%s1891_s11 + $0x84] ss:$20 sps:$4 sm:$0xff]   ;;  %v1700_v63 = vld [vmem:[%s1891_s11 + $0x80] ss:$20 sps:$4 sm:$0xff]  }
  0x22   : > { %v1701_v61 = vld [vmem:[%s1891_s11 + $0x88] ss:$20 sps:$4 sm:$0xff]   ;;  %v1705_v0 = vld [vmem:[%s1891_s11 + $0xb0] ss:$20 sps:$4 sm:$0xff]   ;;  %v1702_v1 = vld [vmem:[%s1891_s11 + $0xac] ss:$20 sps:$4 sm:$0xff]  }
  0x23   : > { %1584 = vmatpush3.bf16.msra.mxu1 %v1641_v12  ;;  %1343 = vmatpush3.bf16.msra.mxu0 %v1641_v12  ;;  %v1704_v2 = vld [vmem:[%s1891_s11 + $0xa8] ss:$20 sps:$4 sm:$0xff]   ;;  %v1709_v3 = vld [vmem:[%s1891_s11 + $0xd8] ss:$20 sps:$4 sm:$0xff]   ;;  %v1708_v6 = vld [vmem:[%s1891_s11 + $0xd0] ss:$20 sps:$4 sm:$0xff]  }
  0x24   : > { %1577 = vmatprep.subr.bf16.mxu1 %v1642_v13  ;;  %1344 = vmatprep.subr.bf16.mxu0 %v1642_v13  ;;  %v1706_v4 = vld [vmem:[%s1891_s11 + $0xd4] ss:$20 sps:$4 sm:$0xff]   ;;  %v260_v5 = vld [vmem:[%s1891_s11 + $0xf8] sm:$0x33]  ;;  %v1779_v10 = vmov 0.0|0.0   ;;  %v1089_v11 = vld [vmem:[%s2186_s3] sm:$0xff] }
  0x25   : > { %v1712_v7 = vld [vmem:[%s1891_s11 + $0x100] ss:$0 sps:$4 sm:$0x33]   ;;  %v1283_v8 = vcombine.high %v260_v5, %v260_v5  ;;  %v1282_v9 = vcombine.low %v260_v5, %v260_v5  ;;  %v1090_v12 = vld [vmem:[%s2186_s3 + $0x8] sm:$0xff] }
  0x26   : > { %v1548_v13 = vpack.c.bf16 %v1090_v12, %v1089_v11 }
  0x27   : > { %1585 = vmatpush3.bf16.msra.mxu1 %v1643_v14  ;;  %1345 = vmatpush3.bf16.msra.mxu0 %v1643_v14  ;;  %v1091_v14 = vld [vmem:[%s2186_s3 + $0x10] sm:$0xff] }
  0x28   : > { %1578 = vmatprep.subr.bf16.mxu1 %v1644_v15  ;;  %1346 = vmatprep.subr.bf16.mxu0 %v1644_v15  ;;  %v1092_v15 = vld [vmem:[%s2186_s3 + $0x18] sm:$0xff] }
  0x29   : > { %v1551_v16 = vpack.c.bf16 %v1092_v15, %v1091_v14 }
  0x2b   : > { %1586 = vmatpush3.bf16.msra.mxu1 %v1645_v17  ;;  %1347 = vmatpush3.bf16.msra.mxu0 %v1645_v17  ;;  %v1093_v17 = vld [vmem:[%s2186_s3 + $0x20] sm:$0xff] }
  0x2c   : > { %1390 = vmatprep.subr.bf16.mxu1 %v1649_v19  ;;  %1476 = vmatprep.subr.bf16.mxu0 %v1777_v24 }
  0x2e   : > { %796 = vmatmul.mubr.bf16.vlgmr.msra.gmra.mrb[0].mxu1 %v1646_v18  ;;  %772 = vmatmul.mubr.bf16.vlgmr.msra.gmra.mrb[0].mxu0 %v1658_v22  ;;  %v1094_v18 = vld [vmem:[%s2186_s3 + $0x28] sm:$0xff] }
  0x2f   : > { %1391 = vmatpush3.bf16.msra.mxu1 %v1650_v20  ;;  %803 = vmatprep.mubr.bf16.mxu1 %v1653_v23  ;;  %v1554_v19 = vpack.c.bf16 %v1094_v18, %v1093_v17  ;;  %v1095_v20 = vld [vmem:[%s2186_s3 + $0x30] sm:$0xff]  ;;  %v1097_v23 = vld [vmem:[%s2186_s3 + $0x40] sm:$0xff] }
  0x30   : > { %1392 = vmatprep.subr.bf16.mxu1 %v1651_v21  ;;  %1477 = vmatpush3.bf16.msra.mxu0 %v1663_v25  ;;  %v1096_v21 = vld [vmem:[%s2186_s3 + $0x38] sm:$0xff] }
  0x31   : > { %779 = vmatprep.mubr.bf16.mxu0 %v1669_v26  ;;  %1478 = vmatprep.subr.bf16.mxu0 %v1777_v24  ;;  %v1557_v22 = vpack.c.bf16 %v1096_v21, %v1095_v20  ;;  %v1099_v26 = vld [vmem:[%s2186_s3 + $0x50] sm:$0xff] }
  0x33   : > { %1393 = vmatpush3.bf16.msra.mxu1 %v1652_v27  ;;  %v1100_v27 = vld [vmem:[%s2186_s3 + $0x58] sm:$0xff] }
  0x34   : > { %1394 = vmatprep.subr.bf16.mxu1 %v1656_v29  ;;  %1479 = vmatpush3.bf16.msra.mxu0 %v1673_v30  ;;  %v1101_v29 = vld [vmem:[%s2186_s3 + $0x60] sm:$0xff]  ;;  %v1102_v30 = vld [vmem:[%s2186_s3 + $0x68] sm:$0xff] }
  0x35   : > { %1480 = vmatprep.subr.bf16.mxu0 %v1777_v24 }
  0x36   : > { %804 = vmatmul.mubr.bf16.gmra.mrb[4].mxu1 %v1655_v28  ;;  %780 = vmatmul.mubr.bf16.gmra.mrb[4].mxu0 %v1671_v33  ;;  %v1563_v28 = vpack.c.bf16 %v1100_v27, %v1099_v26  ;;  %v1104_v33 = vld [vmem:[%s2186_s3 + $0x78] sm:$0xff] }
  0x37   : > { %1395 = vmatpush3.bf16.msra.mxu1 %v1657_v31  ;;  %811 = vmatprep.mubr.bf16.mxu1 %v1664_v34  ;;  %v1103_v31 = vld [vmem:[%s2186_s3 + $0x70] sm:$0xff] }
  0x38   : > { %1396 = vmatprep.subr.bf16.mxu1 %v1661_v32  ;;  %787 = vmatprep.mubr.bf16.mxu0 %v1679_v35  ;;  %v1566_v32 = vpack.c.bf16 %v1102_v30, %v1101_v29  ;;  %v1569_v34 = vpack.c.bf16 %v1104_v33, %v1103_v31 }
  0x39   : > { %1481 = vmatpush3.bf16.msra.mxu0 %v1681_v36 }
  0x3a   : > { %1482 = vmatprep.subr.bf16.mxu0 %v1777_v24 }
  0x3b   : > { %1397 = vmatpush3.bf16.msra.mxu1 %v1662_v37 }
  0x3c   : > { %1398 = vmatprep.subr.bf16.mxu1 %v1667_v39 }
  0x3d   : > { %1483 = vmatpush3.bf16.msra.mxu0 %v1688_v41 }
  0x3e   : > { %812 = vmatmul.mubr.bf16.gmra.mrb[8].mxu1 %v1666_v38  ;;  %788 = vmatmul.mubr.bf16.gmra.mrb[8].mxu0 %v1682_v42 }
  0x3f   : > { %1399 = vmatpush3.bf16.msra.mxu1 %v1668_v43  ;;  %819 = vmatprep.mubr.bf16.mxu1 %v1281_v44 }
  0x40   : > { %1400 = vmatprep.subr.bf16.mxu1 %v1672_v45  ;;  %1484 = vmatprep.mubr.msk.bf16.mxu0 %vm1778_vm0, %v1777_v24 }
  0x43   : > { %1401 = vmatpush3.bf16.msra.mxu1 %v1674_v46 }
  0x44   : > { %1402 = vmatprep.subr.bf16.mxu1 %v1677_v47 }
  0x46   : > { %820 = vmatmul.mubr.bf16.gmra.mrb[12].mxu1 %v1280_v48  ;;  %1485 = vmatmul.mubr.msk.bf16.vlgmr.msra.gmra.mrb[12].mxu0 %vm717_vm1, %v1689_v50 }
  0x47   : > { %1403 = vmatpush3.bf16.msra.mxu1 %v1678_v49  ;;  %859 = vmatprep.mubr.bf16.mxu1 %v1687_v51 }
  0x48   : > { %1404 = vmatprep.subr.bf16.mxu1 %v1683_v52  ;;  %1488 = vmatprep.mubr.msk.bf16.mxu0 %vm1778_vm0, %v1777_v24 }
  0x4b   : > { %1405 = vmatpush3.bf16.msra.mxu1 %v1684_v53 }
  0x4c   : > { %1547 = vmatprep.subr.bf16.mxu1 %v1779_v10 }
  0x4e   : > { %860 = vmatmul.mubr.bf16.vlgmr.msra.gmra.mrb[16].mxu1 %v1685_v54  ;;  %1489 = vmatmul.mubr.msk.bf16.gmra.mrb[16].mxu0 %vm717_vm1, %v1693_v55 }
  0x4f   : > { %867 = vmatprep.mubr.bf16.mxu1 %v1690_v56  ;;  %1492 = vmatprep.mubr.msk.bf16.mxu0 %vm1778_vm0, %v1777_v24 }
  0x50   : > { %1549 = vmatpush3.bf16.msra.mxu1 %v1548_v13 }
  0x51   : > { %1550 = vmatprep.subr.bf16.mxu1 %v1779_v10 }
  0x54   : > { %1552 = vmatpush3.bf16.msra.mxu1 %v1551_v16 }
  0x55   : > { %1553 = vmatprep.subr.bf16.mxu1 %v1779_v10 }
  0x56   : > { %868 = vmatmul.mubr.bf16.gmra.mrb[20].mxu1 %v1692_v57  ;;  %1493 = vmatmul.mubr.msk.bf16.gmra.mrb[20].mxu0 %vm717_vm1, %v1697_v58 }
  0x57   : > { %875 = vmatprep.mubr.bf16.mxu1 %v1694_v59  ;;  %1496 = vmatprep.mubr.msk.bf16.mxu0 %vm1778_vm0, %v1777_v24 }
  0x58   : > { %1555 = vmatpush3.bf16.msra.mxu1 %v1554_v19 }
  0x59   : > { %1556 = vmatprep.subr.bf16.mxu1 %v1779_v10 }
  0x5c   : > { %1558 = vmatpush3.bf16.msra.mxu1 %v1557_v22 }
  0x5d   : > { %1559 = vmatprep.subr.bf16.mxu1 %v1779_v10 }
  0x5e   : > { %876 = vmatmul.mubr.bf16.gmra.mrb[24].mxu1 %v1696_v60  ;;  %1497 = vmatmul.mubr.msk.bf16.gmra.mrb[24].mxu0 %vm717_vm1, %v1701_v61 }
  0x5f   : > { %883 = vmatprep.mubr.bf16.mxu1 %v1698_v62  ;;  %1500 = vmatprep.mubr.msk.bf16.mxu0 %vm1778_vm0, %v1777_v24 }
  0x66   : > { %884 = vmatmul.mubr.bf16.gmra.mrb[28].mxu1 %v1700_v63  ;;  %1501 = vmatmul.mubr.msk.bf16.gmra.mrb[28].mxu0 %vm717_vm1, %v1705_v0 }
  0x67   : > { %891 = vmatprep.mubr.bf16.mxu1 %v1702_v1  ;;  %1504 = vmatprep.mubr.msk.bf16.mxu0 %vm1778_vm0, %v1777_v24 }
  0x6e   : > { %892 = vmatmul.mubr.bf16.gmra.mrb[32].mxu1 %v1704_v2  ;;  %1505 = vmatmul.mubr.msk.bf16.gmra.mrb[32].mxu0 %vm717_vm1, %v1709_v3 }
  0x6f   : > { %899 = vmatprep.mubr.bf16.mxu1 %v1706_v4  ;;  %1508 = vmatprep.mubr.msk.bf16.mxu0 %vm1778_vm0, %v1777_v24 }
  0x76   : > { %900 = vmatmul.mubr.bf16.gmra.mrb[36].mxu1 %v1708_v6  ;;  %1509 = vmatmul.mubr.msk.bf16.gmra.mrb[36].mxu0 %vm717_vm1, %v1712_v7 }
  0x77   : > { %907 = vmatprep.mubr.bf16.mxu1 %v1283_v8 }
  0x7e   : > { %908 = vmatmul.mubr.bf16.gmra.mrb[40].mxu1 %v1282_v9 }
  0x7f   : > { %1544 = vmatprep.mubr.msk.f32.mxu1 %vm1778_vm0, %v1777_v24  ;;  %v1098_v24 = vld [vmem:[%s2186_s3 + $0x48] sm:$0xff] }
  0x80   : > { %v1560_v25 = vpack.c.bf16 %v1098_v24, %v1097_v23 }
  0x82   : > { %1561 = vmatpush3.bf16.msra.mxu1 %v1560_v25 }
  0x83   : > { %1562 = vmatprep.subr.bf16.mxu1 %v1779_v10 }
  0x86   : > { %1564 = vmatpush3.bf16.msra.mxu1 %v1563_v28 }
  0x87   : > { %1565 = vmatprep.subr.bf16.mxu1 %v1779_v10 }
  0x8a   : > { %1567 = vmatpush3.bf16.msra.mxu1 %v1566_v32 }
  0x8b   : > { %1568 = vmatprep.subr.bf16.mxu1 %v1779_v10 }
  0x8e   : > { %1570 = vmatpush3.bf16.msra.mxu1 %v1569_v34 }
 0x101   : > { %v1366_v35 = vpop.f32.mrb[0].mxu1  ;;  %v1348_v36 = vpop.f32.mrb[0].mxu0 }
 0x102   : > { %v1367_v37 = vpop.f32.mrb[1].mxu1  ;;  %v1349_v38 = vpop.f32.mrb[1].mxu0 }
 0x103   : > { %v2082_v39 = vadd.f32 %v1367_v37, %v1366_v35  ;;  %v1369_v40 = vpop.f32.mrb[2].mxu1  ;;  %v1350_v41 = vadd.f32 %v1349_v38, %v1348_v36  ;;  %v1351_v42 = vpop.f32.mrb[2].mxu0 }
 0x104   : > { %v1370_v43 = vpop.f32.mrb[3].mxu1  ;;  %v1352_v44 = vpop.f32.mrb[3].mxu0 }
 0x105   : > { %v2084_v45 = vadd.f32 %v1370_v43, %v1369_v40  ;;  %v1353_v46 = vadd.f32 %v1352_v44, %v1351_v42 }
 0x109   : > { %v1372_v47 = vpop.f32.mrb[4].mxu1  ;;  %v1354_v48 = vpop.f32.mrb[4].mxu0 }
 0x10a   : > { %v1373_v49 = vpop.f32.mrb[5].mxu1  ;;  %v1355_v50 = vpop.f32.mrb[5].mxu0 }
 0x10b   : > { %v2086_v51 = vadd.f32 %v1373_v49, %v1372_v47  ;;  %v1375_v52 = vpop.f32.mrb[6].mxu1  ;;  %v1356_v53 = vadd.f32 %v1355_v50, %v1354_v48  ;;  %v1357_v54 = vpop.f32.mrb[6].mxu0 }
 0x10c   : > { %v1376_v55 = vpop.f32.mrb[7].mxu1  ;;  %v1358_v56 = vpop.f32.mrb[7].mxu0 }
 0x10d   : > { %v2088_v57 = vadd.f32 %v1376_v55, %v1375_v52  ;;  %v1359_v58 = vadd.f32 %v1358_v56, %v1357_v54 }
 0x111   : > { %v1378_v59 = vpop.f32.mrb[8].mxu1  ;;  %v1360_v60 = vpop.f32.mrb[8].mxu0 }
 0x112   : > { %v1379_v61 = vpop.f32.mrb[9].mxu1  ;;  %v1361_v62 = vpop.f32.mrb[9].mxu0 }
 0x113   : > { %v2090_v63 = vadd.f32 %v1379_v61, %v1378_v59  ;;  %v1381_v0 = vpop.f32.mrb[10].mxu1  ;;  %v1362_v1 = vadd.f32 %v1361_v62, %v1360_v60  ;;  %v1363_v2 = vpop.f32.mrb[10].mxu0 }
 0x114   : > { %v1382_v3 = vpop.f32.mrb[11].mxu1  ;;  %v1364_v4 = vpop.f32.mrb[11].mxu0 }
 0x115   : > { %v2092_v5 = vadd.f32 %v1382_v3, %v1381_v0  ;;  %v1365_v6 = vadd.f32 %v1364_v4, %v1363_v2 }
 0x119   : > { %v1384_v7 = vpop.f32.mrb[12].mxu1  ;;  %v949_v8 = vpop.f32.mrb[12].mxu0 }
 0x11a   : > { %v1385_v9 = vpop.f32.mrb[13].mxu1  ;;  %v1486_v10 = vpop.f32.mrb[13].mxu0 }
 0x11b   : > { %v2094_v11 = vadd.f32 %v1385_v9, %v1384_v7  ;;  %v1387_v12 = vpop.f32.mrb[14].mxu1  ;;  %v952_v13 = vpop.f32.mrb[14].mxu0 }
 0x11c   : > { %v1388_v14 = vpop.f32.mrb[15].mxu1  ;;  %v1487_v15 = vpop.f32.mrb[15].mxu0 }
 0x121   : > { %v1406_v16 = vpop.f32.mrb[16].mxu1  ;;  %v957_v17 = vpop.f32.mrb[16].mxu0 }
 0x122   : > { %v1407_v18 = vpop.f32.mrb[17].mxu1  ;;  %v1490_v19 = vpop.f32.mrb[17].mxu0 }
 0x123   : > { %v1408_v20 = vadd.f32 %v1407_v18, %v1406_v16  ;;  %v1409_v21 = vpop.f32.mrb[18].mxu1  ;;  %v960_v22 = vpop.f32.mrb[18].mxu0 }
 0x124   : > { %v1410_v23 = vpop.f32.mrb[19].mxu1  ;;  %v1491_v24 = vpop.f32.mrb[19].mxu0 }
 0x125   : > { %v1411_v25 = vadd.f32 %v1410_v23, %v1409_v21  ;;  %v862_v26 = vadd.f32 %v1408_v20, %v1350_v41 }
 0x127   : > { %v2096_v27 = vadd.f32 %v949_v8, %v862_v26  ;;  %v865_v28 = vadd.f32 %v1411_v25, %v1353_v46 }
 0x129   : > { %v2098_v29 = vadd.f32 %v952_v13, %v865_v28  ;;  %v1412_v30 = vpop.f32.mrb[20].mxu1  ;;  %v965_v31 = vpop.f32.mrb[20].mxu0 }
 0x12a   : > { %v1413_v32 = vpop.f32.mrb[21].mxu1  ;;  %v1494_v33 = vpop.f32.mrb[21].mxu0 }
 0x12b   : > { %v1414_v34 = vadd.f32 %v1413_v32, %v1412_v30  ;;  %v1415_v35 = vpop.f32.mrb[22].mxu1  ;;  %v968_v36 = vpop.f32.mrb[22].mxu0 }
 0x12c   : > { %v1416_v37 = vpop.f32.mrb[23].mxu1  ;;  %v1495_v38 = vpop.f32.mrb[23].mxu0 }
 0x12d   : > { %v1417_v40 = vadd.f32 %v1416_v37, %v1415_v35  ;;  %v870_v42 = vadd.f32 %v1414_v34, %v1356_v53 }
 0x12f   : > { %v2100_v43 = vadd.f32 %v957_v17, %v870_v42  ;;  %v873_v44 = vadd.f32 %v1417_v40, %v1359_v58 }
 0x131   : > { %v961_v41 = vadd.f32 %v960_v22, %v873_v44  ;;  %v1418_v47 = vpop.f32.mrb[24].mxu1  ;;  %v973_v48 = vpop.f32.mrb[24].mxu0 }
 0x132   : > { %v1419_v46 = vpop.f32.mrb[25].mxu1  ;;  %v1498_v49 = vpop.f32.mrb[25].mxu0 }
 0x133   : > { %v1420_v50 = vadd.f32 %v1419_v46, %v1418_v47  ;;  %v1421_v52 = vpop.f32.mrb[26].mxu1  ;;  %v976_v54 = vpop.f32.mrb[26].mxu0  ;;  %v1008_v0 = vrot.slane %v961_v41, 1 }
 0x134   : > { %v1422_v55 = vpop.f32.mrb[27].mxu1  ;;  %v1499_v56 = vpop.f32.mrb[27].mxu0 }
 0x135   : > { %v1423_v59 = vadd.f32 %v1422_v55, %v1421_v52  ;;  %v878_v60 = vadd.f32 %v1420_v50, %v1362_v1 }
 0x137   : > { %v966_v61 = vadd.f32 %v965_v31, %v878_v60  ;;  %v881_v62 = vadd.f32 %v1423_v59, %v1365_v6 }
 0x139   : > { %v1009_v53 = vrot.slane %v966_v61, 1  ;;  %v969_v2 = vadd.f32 %v968_v36, %v881_v62  ;;  %v1424_v3 = vpop.f32.mrb[28].mxu1  ;;  %v981_v58 = vpop.f32.mrb[28].mxu0 }
 0x13a   : > { %v1425_v4 = vpop.f32.mrb[29].mxu1  ;;  %v1502_v7 = vpop.f32.mrb[29].mxu0 }
 0x13b   : > { %v2103_v8 = vsel %vm1007_vm2, %v1008_v0, %v1009_v53  ;;  %v1011_v9 = vrot.slane %v969_v2, 1  ;;  %v1426_v10 = vadd.f32 %v1425_v4, %v1424_v3  ;;  %v1427_v12 = vpop.f32.mrb[30].mxu1  ;;  %v984_v13 = vpop.f32.mrb[30].mxu0 }
 0x13c   : > { %v1019_v1 = vmax.f32 %v2096_v27, %v2103_v8  ;;  %v1428_v14 = vpop.f32.mrb[31].mxu1  ;;  %v1503_v6 = vpop.f32.mrb[31].mxu0 }
 0x13d   : > { %v2108_v15 = vsel %vm1007_vm2, %v1009_v53, %v1011_v9  ;;  %v1429_v16 = vadd.f32 %v1428_v14, %v1427_v12  ;;  %v886_v17 = vadd.f32 %v1426_v10, %v2082_v39 }
 0x13e   : > { %v1020_v18 = vmax.f32 %v2098_v29, %v2108_v15 }
 0x13f   : > { %v974_v19 = vadd.f32 %v973_v48, %v886_v17  ;;  %v889_v20 = vadd.f32 %v1429_v16, %v2084_v45 }
 0x141   : > { %v1013_v21 = vrot.slane %v974_v19, 1  ;;  %v977_v22 = vadd.f32 %v976_v54, %v889_v20  ;;  %v1430_v23 = vpop.f32.mrb[32].mxu1  ;;  %v989_v24 = vpop.f32.mrb[32].mxu0 }
 0x142   : > { %v1431_v25 = vpop.f32.mrb[33].mxu1  ;;  %v1506_v26 = vpop.f32.mrb[33].mxu0 }
 0x143   : > { %v1014_v28 = vsel %vm1007_vm2, %v1011_v9, %v1013_v21  ;;  %v1022_v30 = vmax.f32 %v961_v41, %v1013_v21  ;;  %v1432_v31 = vadd.f32 %v1431_v25, %v1430_v23  ;;  %v1433_v32 = vpop.f32.mrb[34].mxu1  ;;  %v992_v33 = vpop.f32.mrb[34].mxu0 }
 0x144   : > { %v1021_v39 = vmax.f32 %v2100_v43, %v1014_v28  ;;  %v1434_v34 = vpop.f32.mrb[35].mxu1  ;;  %v1507_v35 = vpop.f32.mrb[35].mxu0 }
 0x145   : > { %v1435_v36 = vadd.f32 %v1434_v34, %v1433_v32  ;;  %v894_v37 = vadd.f32 %v1432_v31, %v2086_v51 }
 0x147   : > { %v982_v45 = vadd.f32 %v981_v58, %v894_v37  ;;  %v897_v38 = vadd.f32 %v1435_v36, %v2088_v57 }
 0x149   : > { %v985_v40 = vadd.f32 %v984_v13, %v897_v38  ;;  %v1436_v42 = vpop.f32.mrb[36].mxu1  ;;  %v997_v44 = vpop.f32.mrb[36].mxu0 }
 0x14a   : > { %v1437_v47 = vpop.f32.mrb[37].mxu1  ;;  %v1510_v48 = vpop.f32.mrb[37].mxu0 }
 0x14b   : > { %v1438_v46 = vadd.f32 %v1437_v47, %v1436_v42  ;;  %v1439_v41 = vpop.f32.mrb[38].mxu1  ;;  %v1000_v49 = vpop.f32.mrb[38].mxu0  ;;  %v1027_v51 = vrot.slane %v985_v40, 1 }
 0x14c   : > { %v1440_v50 = vpop.f32.mrb[39].mxu1  ;;  %v1511_v52 = vpop.f32.mrb[39].mxu0 }
 0x14d   : > { %v1441_v54 = vadd.f32 %v1440_v50, %v1439_v41  ;;  %v902_v43 = vadd.f32 %v1438_v46, %v2090_v63 }
 0x14f   : > { %v990_v55 = vadd.f32 %v989_v24, %v902_v43  ;;  %v905_v56 = vadd.f32 %v1441_v54, %v2092_v5 }
 0x151   : > { %v1028_v59 = vrot.slane %v990_v55, 1  ;;  %v993_v60 = vadd.f32 %v992_v33, %v905_v56  ;;  %v1442_v57 = vpop.f32.mrb[40].mxu1 }
 0x152   : > { %v1443_v61 = vpop.f32.mrb[41].mxu1 }
 0x153   : > { %v1029_v62 = vsel %vm1007_vm2, %v1027_v51, %v1028_v59  ;;  %v1030_v0 = vrot.slane %v993_v60, 1  ;;  %v1444_v53 = vadd.f32 %v1443_v61, %v1442_v57  ;;  %v1445_v2 = vpop.f32.mrb[42].mxu1 }
 0x154   : > { %v1038_v3 = vmax.f32 %v974_v19, %v1029_v62  ;;  %v1446_v58 = vpop.f32.mrb[43].mxu1 }
 0x155   : > { %v1031_v4 = vsel %vm1007_vm2, %v1028_v59, %v1030_v0  ;;  %v910_v7 = vadd.f32 %v1444_v53, %v2094_v11  ;;  %v1328_v11 = vld [vmem:[%s2185_s2] ss:$0 sm:$0xff] }
 0x156   : > { %v1039_v63 = vmax.f32 %v977_v22, %v1031_v4  ;;  %v1047_v5 = vrot.slane %v1038_v3, 2 }
 0x157   : > { %v998_v9 = vadd.f32 %v997_v44, %v910_v7 }
 0x158   : > { %v1048_v10 = vrot.slane %v1039_v63, 2 }
 0x159   : > { %v1032_v12 = vrot.slane %v998_v9, 1 }
 0x15a   : > { %v1049_v13 = vsel %vm1046_vm3, %v1047_v5, %v1048_v10 }
 0x15b   : > { %v1033_v14 = vsel %vm1007_vm2, %v1030_v0, %v1032_v12  ;;  %v1041_v6 = vmax.f32 %v985_v40, %v1032_v12  ;;  %v1058_v16 = vmax.f32 %v1019_v1, %v1049_v13  ;;  %v1105_v40 = vld [vmem:[%s2187_s4] sm:$0x1] }
 0x15c   : > { %v1040_v17 = vmax.f32 %v982_v45, %v1033_v14 }
 0x15d   : > { %v1052_v19 = vrot.slane %v1041_v6, 2  ;;  %v1069_v26 = vadd.f32 %v1328_v11, %v1058_v16 }
 0x15e   : > { %v1050_v20 = vrot.slane %v1040_v17, 2 }
 0x15f   : > { %v1061_v21 = vmax.f32 %v1022_v30, %v1052_v19  ;;  %v1073_v8 = vmax.f32 %v1069_v26, 0.0 }
 0x160   : > { %v1051_v22 = vsel %vm1046_vm3, %v1048_v10, %v1050_v20  ;;  %v1053_v23 = vsel %vm1046_vm3, %v1050_v20, %v1052_v19 }
 0x161   : > { %v1059_v24 = vmax.f32 %v1020_v18, %v1051_v22  ;;  %v1060_v25 = vmax.f32 %v1021_v39, %v1053_v23  ;;  %v1072_v28 = vadd.f32 %v1328_v11, %v1061_v21 }
 0x163   : > { %v1070_v31 = vadd.f32 %v1328_v11, %v1059_v24  ;;  %v1071_v27 = vadd.f32 %v1328_v11, %v1060_v25  ;;  %v1076_v32 = vmax.f32 %v1072_v28, 0.0 }
 0x165   : > { %v1074_v1 = vmax.f32 %v1070_v31, 0.0  ;;  %v1075_v33 = vmax.f32 %v1071_v27, 0.0  ;;  %v1080_v35 = vsel %vm1079_vm4, %v1076_v32, 0.0 }
 0x167   : > { %v1077_v34 = vadd.f32 %v1074_v1, %v1073_v8 }
 0x169   : > { %v1078_v30 = vadd.f32 %v1077_v34, %v1075_v33 }
 0x16b   : > { %v1081_v36 = vadd.f32 %v1080_v35, %v1078_v30 }
 0x16d   : > { %v1082_v37 = vrot.slane %v1081_v36, 4 }
 0x16f   : > { %v1083_v45 = vadd.f32 %v1082_v37, %v1081_v36 }
 0x171   : > { %v1084_v29 = vrot.slane %v1083_v45, 2 }
 0x173   : > { %v1085_v15 = vadd.f32 %v1084_v29, %v1083_v45 }
 0x175   : > { %v1086_v18 = vrot.slane %v1085_v15, 1 }
 0x177   : > { %v1087_v39 = vadd.f32 %v1086_v18, %v1085_v15 }
 0x179   : > { %v1088_v38 = vmul.f32 0.04, %v1087_v39 }
 0x17b   : > { %1545 = vmatmul.mubr.f32.vlgmr.msra.gmra.mrb[44].mxu1 %v1088_v38 }
 0x24e   : > { %v1172_v42 = vpop.f32.mrb[44].mxu1 }
 0x24f   : > { %v1173_v44 = vadd.f32 %v1172_v42, %v1105_v40  ;;  %v1546_v47 = vpop.f32.mrb[45].mxu1 }
 0x251   : > { %1176 = vst [vmem:[%s216_s10] sm:$0x1] %v1173_v44 }
 0x252   : > { %1726 = shalt.err (!%p1723_p3)
}
 0x253   : > { %s1727_s26 = scalar_lea.hbm %s2141_s15, 16  ;;  %s1731_s7 = scalar_lea.hbm %s2188_s5, 32 }
 0x254   : > { %p1728_p4 = scmp.ne.s32.totalorder %s2141_s15, %s1727_s26  ;;  %p1732_p9 = scmp.lt.u32.totalorder %s2141_s15, %s2188_s5 }
 0x255   : > { %p1733_p10 = scmp.lt.u32.totalorder %s1731_s7, %s1727_s26  ;;  %p1735_p12 = scmp.lt.u32.totalorder %s1727_s26, %s2141_s15 }
 0x256   : > { %p1729_p7 = pnand %p1728_p4, %p1849_p5 }
 0x257   : > { %p1734_p11 = por %p1733_p10, %p1732_p9 }
 0x258   : > { %p1730_p8 = pneg %p1729_p7 }
 0x259   : > { %p1736_p13 = por %p1735_p12, %p1734_p11 }
 0x25b   : > { %p1737_p0 = pnand %p1736_p13, %p1730_p8 }
 0x25d   : > { %1740 = shalt.err (!%p1737_p0)
}
 0x25e   : > { %1588 = dma.vmem_to_hbm [thread:$0]  (%p1849_p5), %s2143_s12, 16, %s2141_s15, %s1178_s16  }
 0x25f PF: > { %p1594_p1 = scmp.ge.s32.totalorder %s1775_s21, 2  ;;  %s1202_s9 = sand.u32 1, %s1763_s18  }
 0x260   : > { %s1203_s10 = scalar_lea.sflag [#allocation3], %s1202_s9 }
 0x261   : > { %p1591_p2 = pnand %p1594_p1, %p1853_p6 }
 0x263   : > { %1758 = dma.done.wait (!%p1591_p2), %s1203_s10, 16  }
 0x264   : > { %1760 = vsyncadd (!%p1591_p2), %s1203_s10, 4294967280  ;;  %p15_p3 = scmp.ge.s32.totalorder %s1836_s24, 4   ;;  %s2191_s18 = smov %s1767_s19 }
 0x265   : > { %s2192_s19 = smov %s1771_s20  ;;  %s2193_s20 = smov %s1847_s27 }
 0x266   : > { %s2194_s21 = smov %s1836_s24  ;;  %17 = sbr.rel (!%p15_p3) target bundleno = 3 (0x3), region = 75 }
 0x26d   :  { %1207 = vsyncpa [#allocation3], 1 }
 0x26e   :  { %1209 = vsyncpa [#allocation3 + $0x1], 1 }

</bundles_post_ra>
